<compile_context>
chip_gen: v7x
topology: tpu7x:2x2x1
jax: 0.10.0
libtpu: 0.0.40
codegen_flags: <defaults>
</compile_context>

<pallas_src>
import numpy as np

import jax
import jax.numpy as jnp
from jax.experimental import pallas as pl
from jax.experimental.pallas import tpu as pltpu


# ------------------------- flat-layout constants --------------------------- #
_W = 28                                   # layout width of every flat activation
_TAPS = tuple((dy, dx) for dy in range(3) for dx in range(3))
_P0, _P1, _P2 = 800, 736, 672             # padded lane lengths: input, conv1, conv2
_LM, _PPOOL = 640, 368                    # pool: pre-downsample / pooled lengths
_P3, _P4, _P5 = 304, 240, 176             # conv3 .. conv5
_Z5, _P6 = 232, 168                       # zero-padded conv6 input / conv6 output


# ------------------------------ Pallas kernel ------------------------------ #

def _net5_kernel(x_ref, w1_ref, b1_ref, w2_ref, b2_ref, bn1s_ref, bn1t_ref,
                 w3_ref, b3_ref, w4_ref, b4_ref, bn2s_ref, bn2t_ref,
                 w5_ref, b5_ref, w6_ref, b6_ref, w8_ref, b8_ref,
                 spool_ref, sh29_ref, mask_ref, out_ref):
    f32 = jnp.float32
    x0 = x_ref[0]                                      # (1, 800): flat 28x28 + zero pad

    # conv1 (1->16) + ReLU: Cin == 1, so 9 VPU broadcast MACs instead of a GEMM.
    w1 = w1_ref[...]                                   # (16, 9)
    a1 = jnp.zeros((16, _P1), f32)
    for t, (dy, dx) in enumerate(_TAPS):
        s = dy * _W + dx
        a1 = a1 + w1[:, t:t + 1] * x0[:, s:s + _P1]
    a1 = jnp.maximum(a1 + b1_ref[...], 0.0)            # (16, 736)

    def conv3x3(x, w_ref, b_ref, pout):
        # x: (Cin, Pin) flat activation. 9 taps of (Cout,Cin)@(Cin,pout) on MXU,
        # lane-dense (Cout, pout) accumulator; im2col is just lane slicing.
        cout = w_ref.shape[1]
        acc = jnp.zeros((cout, pout), f32)
        for t, (dy, dx) in enumerate(_TAPS):
            s = dy * _W + dx
            acc = acc + jnp.dot(w_ref[t], x[:, s:s + pout],
                                preferred_element_type=f32)
        return acc + b_ref[...]

    # conv2 (16->10) + ReLU
    a2 = jnp.maximum(conv3x3(a1, w2_ref, b2_ref, _P2), 0.0)          # (10, 672)

    # MaxPool2d(2,2): max of the 4 window taps (pure lane shifts), then keep
    # every even flat index with a 0/1 selection matmul so the activation stays
    # lane-dense.  BatchNorm2d(10) eval-affine is applied after the pool.
    m = jnp.maximum(jnp.maximum(a2[:, 0:_LM], a2[:, 1:_LM + 1]),
                    jnp.maximum(a2[:, _W:_LM + _W], a2[:, _W + 1:_LM + _W + 1]))
    pooled = jnp.dot(m, spool_ref[...], preferred_element_type=f32)  # (10, 368)
    pooled = pooled * bn1s_ref[...] + bn1t_ref[...]

    # conv3 / conv4 (+BN2) / conv5
    a3 = jnp.maximum(conv3x3(pooled, w3_ref, b3_ref, _P3), 0.0)      # (10, 304)
    a4 = jnp.maximum(conv3x3(a3, w4_ref, b4_ref, _P4), 0.0)          # (16, 240)
    a4 = a4 * bn2s_ref[...] + bn2t_ref[...]
    a5 = jnp.maximum(conv3x3(a4, w5_ref, b5_ref, _P5), 0.0)          # (16, 176)

    # conv6 (padding=1, no ReLU): zero the invalid columns/rows of a5 and shift
    # the flat layout by one row + one column (29 lanes) with a 0/1 matmul so
    # the valid-conv tap loop implements the zero padding exactly.
    z5 = jnp.dot(a5 * mask_ref[...], sh29_ref[...],
                 preferred_element_type=f32)                         # (16, 232)
    a6 = conv3x3(z5, w6_ref, b6_ref, _P6)                            # (16, 168)

    # Head: AvgPool(6) over the 6x6 valid region + 1x1 conv + log_softmax.
    # (1x1 conv and spatial mean commute, so do the GEMM first, then reduce.)
    a6m = a6 * mask_ref[:, 0:_P6]                                    # (16, 168)
    th = jnp.dot(w8_ref[...], a6m, preferred_element_type=f32)       # (10, 168)
    logits = jnp.sum(th, axis=1, keepdims=True) * (1.0 / 36.0) + b8_ref[...]
    mx = jnp.max(logits, axis=0, keepdims=True)
    z = logits - mx
    lse = jnp.log(jnp.sum(jnp.exp(z), axis=0, keepdims=True))
    out_ref[0] = (z - lse).astype(out_ref.dtype)                     # (10, 1)


# ------------------------------ host wrapper -------------------------------- #

def _resident(shape):
    """Full-array block that stays VMEM-resident across the batch grid."""
    nd = len(shape)
    return pl.BlockSpec(tuple(shape), lambda b, _nd=nd: (0,) * _nd)


@jax.jit
def net5_forward(x_nchw, kp):
    B = x_nchw.shape[0]
    x = x_nchw.astype(jnp.float32).reshape(B, 1, 28 * 28)
    x = jnp.pad(x, ((0, 0), (0, 0), (0, _P0 - 28 * 28)))             # (B, 1, 800)

    args = (x, kp['w1'], kp['b1'], kp['w2'], kp['b2'], kp['bn1s'], kp['bn1t'],
            kp['w3'], kp['b3'], kp['w4'], kp['b4'], kp['bn2s'], kp['bn2t'],
            kp['w5'], kp['b5'], kp['w6'], kp['b6'], kp['w8'], kp['b8'],
            kp['spool'], kp['sh29'], kp['mask'])

    in_specs = [pl.BlockSpec((1, 1, _P0), lambda b: (b, 0, 0))]
    in_specs += [_resident(a.shape) for a in args[1:]]

    out = pl.pallas_call(
        _net5_kernel,
        out_shape=jax.ShapeDtypeStruct((B, 10, 1), jnp.float32),
        grid_spec=pltpu.PrefetchScalarGridSpec(
            num_scalar_prefetch=0,
            grid=(B,),
            in_specs=in_specs,
            out_specs=pl.BlockSpec((1, 10, 1), lambda b: (b, 0, 0)),
        ),
        compiler_params=pltpu.CompilerParams(
            dimension_semantics=("parallel",)),
    )(*args)
    return out[:, :, 0]                                              # (B, 10)


# ------------------------------- parameters -------------------------------- #

def init_params(key):
    keys = jax.random.split(key, 9)

    def conv(k, cout, cin, kk):
        kw, kb = jax.random.split(k)
        fan_in = cin * kk * kk
        bound = 1.0 / (fan_in ** 0.5)
        W = jax.random.uniform(kw, (cout, cin, kk, kk), jnp.float32, -bound, bound)
        b = jax.random.uniform(kb, (cout,), jnp.float32, -bound, bound)
        return W, b

    def bn(k, c):
        k1, k2, k3, k4 = jax.random.split(k, 4)
        gamma = 1.0 + 0.1 * jax.random.normal(k1, (c,), jnp.float32)
        beta = 0.1 * jax.random.normal(k2, (c,), jnp.float32)
        rmean = 0.1 * jax.random.normal(k3, (c,), jnp.float32)
        rvar = 1.0 + 0.1 * jnp.abs(jax.random.normal(k4, (c,), jnp.float32))
        scale = gamma / jnp.sqrt(rvar + 1e-5)
        shift = beta - rmean * scale
        return scale.reshape(1, c), shift.reshape(1, c)

    p = {}
    p['w1'], p['b1'] = conv(keys[0], 16, 1, 3)    # conv1
    p['w2'], p['b2'] = conv(keys[1], 10, 16, 3)   # conv2
    p['bn1_scale'], p['bn1_shift'] = bn(keys[2], 10)
    p['w3'], p['b3'] = conv(keys[3], 10, 10, 3)   # conv3
    p['w4'], p['b4'] = conv(keys[4], 16, 10, 3)   # conv4
    p['bn2_scale'], p['bn2_shift'] = bn(keys[5], 16)
    p['w5'], p['b5'] = conv(keys[6], 16, 16, 3)   # conv5
    p['w6'], p['b6'] = conv(keys[7], 16, 16, 3)   # conv6 (padding=1)
    p['w8'], p['b8'] = conv(keys[8], 10, 16, 1)   # conv8 (1x1)
    return p


def prepare_params(p):
    """PyTorch-layout params -> kernel-ready VMEM-resident arrays."""
    def conv_taps(w):                              # (Cout,Cin,3,3) -> (9,Cout,Cin)
        cout, cin = w.shape[0], w.shape[1]
        return jnp.transpose(w, (2, 3, 0, 1)).reshape(9, cout, cin).astype(jnp.float32)

    col = lambda v: jnp.asarray(v, jnp.float32).reshape(-1, 1)

    # 0/1 "take every even flat index" matrix for the 2x2 max-pool downsample.
    i = np.arange(_LM)[:, None]
    j = np.arange(_PPOOL)[None, :]
    spool = (i == 2 * j).astype(np.float32)                  # (640, 368)

    # 0/1 shift-by-(one row + one col) matrix for conv6's zero padding.
    i5 = np.arange(_P5)[:, None]
    g5 = np.arange(_Z5)[None, :]
    sh29 = (g5 == i5 + (_W + 1)).astype(np.float32)          # (176, 232)

    # Valid-column mask of the 6x6 region in the 28-wide flat layout.
    f = np.arange(_P5)
    mask = (((f % _W) < 6) & (f < _P6)).astype(np.float32)[None, :]   # (1, 176)

    return {
        'w1': p['w1'][:, 0].reshape(16, 9).astype(jnp.float32), 'b1': col(p['b1']),
        'w2': conv_taps(p['w2']), 'b2': col(p['b2']),
        'bn1s': col(p['bn1_scale']), 'bn1t': col(p['bn1_shift']),
        'w3': conv_taps(p['w3']), 'b3': col(p['b3']),
        'w4': conv_taps(p['w4']), 'b4': col(p['b4']),
        'bn2s': col(p['bn2_scale']), 'bn2t': col(p['bn2_shift']),
        'w5': conv_taps(p['w5']), 'b5': col(p['b5']),
        'w6': conv_taps(p['w6']), 'b6': col(p['b6']),
        'w8': p['w8'][:, :, 0, 0].astype(jnp.float32), 'b8': col(p['b8']),
        'spool': jnp.asarray(spool), 'sh29': jnp.asarray(sh29),
        'mask': jnp.asarray(mask),
    }


# ------------------------- pure-JAX reference (check) ----------------------- #

def _reference_forward(x, p):
    dn = ('NCHW', 'OIHW', 'NCHW')
    hp = jax.lax.Precision.HIGHEST

    def conv(v, w, b, pad=0):
        out = jax.lax.conv_general_dilated(
            v, w, window_strides=(1, 1), padding=((pad, pad), (pad, pad)),
            dimension_numbers=dn, precision=hp)
        return out + b.reshape(1, -1, 1, 1)

    def affine(v, s, t):
        return v * s.reshape(1, -1, 1, 1) + t.reshape(1, -1, 1, 1)

    relu = lambda v: jnp.maximum(v, 0.0)
    v = relu(conv(x, p['w1'], p['b1']))
    v = relu(conv(v, p['w2'], p['b2']))
    v = jax.lax.reduce_window(v, -jnp.inf, jax.lax.max,
                              (1, 1, 2, 2), (1, 1, 2, 2), 'VALID')
    v = affine(v, p['bn1_scale'], p['bn1_shift'])
    v = relu(conv(v, p['w3'], p['b3']))
    v = affine(relu(conv(v, p['w4'], p['b4'])), p['bn2_scale'], p['bn2_shift'])
    v = relu(conv(v, p['w5'], p['b5']))
    v = conv(v, p['w6'], p['b6'], pad=1)
    v = jnp.mean(v, axis=(2, 3), keepdims=True)
    v = conv(v, p['w8'], p['b8'])
    return jax.nn.log_softmax(v.reshape(v.shape[0], 10), axis=1)


# ----------------------------------- main ----------------------------------- #

if __name__ == "__main__":
    key = jax.random.PRNGKey(0)
    kparam, kx = jax.random.split(key)
    params = init_params(kparam)
    kp = prepare_params(params)

    # Net5 requires 28x28 single-channel input (so the GAP sees a 6x6 map).
    x = jax.random.normal(kx, (2, 1, 28, 28), jnp.float32)

    out = net5_forward(x, kp)
    out = jax.block_until_ready(out)

    assert out.shape == (2, 10), out.shape
    assert bool(jnp.all(jnp.isfinite(out)))
    row_sums = jnp.sum(jnp.exp(out), axis=1)
    assert bool(jnp.all(jnp.abs(row_sums - 1.0) < 1e-4)), row_sums

    # Cross-check the fused kernel against a pure-JAX eval-mode reference.
    ref = _reference_forward(x, params)
    err = float(jnp.max(jnp.abs(out - ref)))
    assert err < 5e-2, err

    print("KERNEL_OK")
</pallas_src>

<mosaic_0001>
module attributes {stable_mosaic.version = 11 : i64} {
  func.func @_net5_kernel(%arg0: i32, %arg1: memref<1x1x800xf32, #tpu.memory_space<vmem>>, %arg2: memref<16x9xf32, #tpu.memory_space<vmem>>, %arg3: memref<16x1xf32, #tpu.memory_space<vmem>>, %arg4: memref<9x10x16xf32, #tpu.memory_space<vmem>>, %arg5: memref<10x1xf32, #tpu.memory_space<vmem>>, %arg6: memref<10x1xf32, #tpu.memory_space<vmem>>, %arg7: memref<10x1xf32, #tpu.memory_space<vmem>>, %arg8: memref<9x10x10xf32, #tpu.memory_space<vmem>>, %arg9: memref<10x1xf32, #tpu.memory_space<vmem>>, %arg10: memref<9x16x10xf32, #tpu.memory_space<vmem>>, %arg11: memref<16x1xf32, #tpu.memory_space<vmem>>, %arg12: memref<16x1xf32, #tpu.memory_space<vmem>>, %arg13: memref<16x1xf32, #tpu.memory_space<vmem>>, %arg14: memref<9x16x16xf32, #tpu.memory_space<vmem>>, %arg15: memref<16x1xf32, #tpu.memory_space<vmem>>, %arg16: memref<9x16x16xf32, #tpu.memory_space<vmem>>, %arg17: memref<16x1xf32, #tpu.memory_space<vmem>>, %arg18: memref<10x16xf32, #tpu.memory_space<vmem>>, %arg19: memref<10x1xf32, #tpu.memory_space<vmem>>, %arg20: memref<640x368xf32, #tpu.memory_space<vmem>>, %arg21: memref<176x232xf32, #tpu.memory_space<vmem>>, %arg22: memref<1x176xf32, #tpu.memory_space<vmem>>, %arg23: memref<1x10x1xf32, #tpu.memory_space<vmem>>) attributes {dimension_semantics = [#tpu.dimension_semantics<parallel>], iteration_bounds = array<i64: 2>, scalar_prefetch = 0 : i64, scratch_operands = 0 : i64, tpu.core_type = #tpu.core_type<tc>, window_params = [{transform_indices = @transform_0, window_bounds = array<i64: 1, 1, 800>}, {pipeline_mode = #tpu.pipeline_mode<synchronous>, transform_indices = @transform_1, window_bounds = array<i64: 16, 9>}, {pipeline_mode = #tpu.pipeline_mode<synchronous>, transform_indices = @transform_2, window_bounds = array<i64: 16, 1>}, {pipeline_mode = #tpu.pipeline_mode<synchronous>, transform_indices = @transform_3, window_bounds = array<i64: 9, 10, 16>}, {pipeline_mode = #tpu.pipeline_mode<synchronous>, transform_indices = @transform_4, window_bounds = array<i64: 10, 1>}, {pipeline_mode = #tpu.pipeline_mode<synchronous>, transform_indices = @transform_5, window_bounds = array<i64: 10, 1>}, {pipeline_mode = #tpu.pipeline_mode<synchronous>, transform_indices = @transform_6, window_bounds = array<i64: 10, 1>}, {pipeline_mode = #tpu.pipeline_mode<synchronous>, transform_indices = @transform_7, window_bounds = array<i64: 9, 10, 10>}, {pipeline_mode = #tpu.pipeline_mode<synchronous>, transform_indices = @transform_8, window_bounds = array<i64: 10, 1>}, {pipeline_mode = #tpu.pipeline_mode<synchronous>, transform_indices = @transform_9, window_bounds = array<i64: 9, 16, 10>}, {pipeline_mode = #tpu.pipeline_mode<synchronous>, transform_indices = @transform_10, window_bounds = array<i64: 16, 1>}, {pipeline_mode = #tpu.pipeline_mode<synchronous>, transform_indices = @transform_11, window_bounds = array<i64: 16, 1>}, {pipeline_mode = #tpu.pipeline_mode<synchronous>, transform_indices = @transform_12, window_bounds = array<i64: 16, 1>}, {pipeline_mode = #tpu.pipeline_mode<synchronous>, transform_indices = @transform_13, window_bounds = array<i64: 9, 16, 16>}, {pipeline_mode = #tpu.pipeline_mode<synchronous>, transform_indices = @transform_14, window_bounds = array<i64: 16, 1>}, {pipeline_mode = #tpu.pipeline_mode<synchronous>, transform_indices = @transform_15, window_bounds = array<i64: 9, 16, 16>}, {pipeline_mode = #tpu.pipeline_mode<synchronous>, transform_indices = @transform_16, window_bounds = array<i64: 16, 1>}, {pipeline_mode = #tpu.pipeline_mode<synchronous>, transform_indices = @transform_17, window_bounds = array<i64: 10, 16>}, {pipeline_mode = #tpu.pipeline_mode<synchronous>, transform_indices = @transform_18, window_bounds = array<i64: 10, 1>}, {pipeline_mode = #tpu.pipeline_mode<synchronous>, transform_indices = @transform_19, window_bounds = array<i64: 640, 368>}, {pipeline_mode = #tpu.pipeline_mode<synchronous>, transform_indices = @transform_20, window_bounds = array<i64: 176, 232>}, {pipeline_mode = #tpu.pipeline_mode<synchronous>, transform_indices = @transform_21, window_bounds = array<i64: 1, 176>}, {transform_indices = @transform_22, window_bounds = array<i64: 1, 10, 1>}]} {
    %c0 = arith.constant 0 : index
    %c0_0 = arith.constant 0 : index
    %c0_1 = arith.constant 0 : index
    %0 = vector.load %arg1[%c0, %c0_0, %c0_1] : memref<1x1x800xf32, #tpu.memory_space<vmem>>, vector<1x1x800xf32>
    %1 = vector.shape_cast %0 : vector<1x1x800xf32> to vector<1x800xf32>
    %c0_2 = arith.constant 0 : index
    %c0_3 = arith.constant 0 : index
    %2 = vector.load %arg2[%c0_2, %c0_3] : memref<16x9xf32, #tpu.memory_space<vmem>>, vector<16x9xf32>
    %cst = arith.constant 0.000000e+00 : f32
    %3 = vector.broadcast %cst : f32 to vector<16x736xf32>
    %4 = vector.extract_strided_slice %2 {offsets = [0, 0], sizes = [16, 1], strides = [1, 1]} : vector<16x9xf32> to vector<16x1xf32>
    %5 = vector.extract_strided_slice %1 {offsets = [0, 0], sizes = [1, 736], strides = [1, 1]} : vector<1x800xf32> to vector<1x736xf32>
    %6 = vector.broadcast %4 : vector<16x1xf32> to vector<16x736xf32>
    %7 = vector.broadcast %5 : vector<1x736xf32> to vector<16x736xf32>
    %8 = arith.mulf %6, %7 : vector<16x736xf32>
    %9 = arith.addf %3, %8 : vector<16x736xf32>
    %10 = vector.extract_strided_slice %2 {offsets = [0, 1], sizes = [16, 1], strides = [1, 1]} : vector<16x9xf32> to vector<16x1xf32>
    %11 = vector.extract_strided_slice %1 {offsets = [0, 1], sizes = [1, 736], strides = [1, 1]} : vector<1x800xf32> to vector<1x736xf32>
    %12 = vector.broadcast %10 : vector<16x1xf32> to vector<16x736xf32>
    %13 = vector.broadcast %11 : vector<1x736xf32> to vector<16x736xf32>
    %14 = arith.mulf %12, %13 : vector<16x736xf32>
    %15 = arith.addf %9, %14 : vector<16x736xf32>
    %16 = vector.extract_strided_slice %2 {offsets = [0, 2], sizes = [16, 1], strides = [1, 1]} : vector<16x9xf32> to vector<16x1xf32>
    %17 = vector.extract_strided_slice %1 {offsets = [0, 2], sizes = [1, 736], strides = [1, 1]} : vector<1x800xf32> to vector<1x736xf32>
    %18 = vector.broadcast %16 : vector<16x1xf32> to vector<16x736xf32>
    %19 = vector.broadcast %17 : vector<1x736xf32> to vector<16x736xf32>
    %20 = arith.mulf %18, %19 : vector<16x736xf32>
    %21 = arith.addf %15, %20 : vector<16x736xf32>
    %22 = vector.extract_strided_slice %2 {offsets = [0, 3], sizes = [16, 1], strides = [1, 1]} : vector<16x9xf32> to vector<16x1xf32>
    %23 = vector.extract_strided_slice %1 {offsets = [0, 28], sizes = [1, 736], strides = [1, 1]} : vector<1x800xf32> to vector<1x736xf32>
    %24 = vector.broadcast %22 : vector<16x1xf32> to vector<16x736xf32>
    %25 = vector.broadcast %23 : vector<1x736xf32> to vector<16x736xf32>
    %26 = arith.mulf %24, %25 : vector<16x736xf32>
    %27 = arith.addf %21, %26 : vector<16x736xf32>
    %28 = vector.extract_strided_slice %2 {offsets = [0, 4], sizes = [16, 1], strides = [1, 1]} : vector<16x9xf32> to vector<16x1xf32>
    %29 = vector.extract_strided_slice %1 {offsets = [0, 29], sizes = [1, 736], strides = [1, 1]} : vector<1x800xf32> to vector<1x736xf32>
    %30 = vector.broadcast %28 : vector<16x1xf32> to vector<16x736xf32>
    %31 = vector.broadcast %29 : vector<1x736xf32> to vector<16x736xf32>
    %32 = arith.mulf %30, %31 : vector<16x736xf32>
    %33 = arith.addf %27, %32 : vector<16x736xf32>
    %34 = vector.extract_strided_slice %2 {offsets = [0, 5], sizes = [16, 1], strides = [1, 1]} : vector<16x9xf32> to vector<16x1xf32>
    %35 = vector.extract_strided_slice %1 {offsets = [0, 30], sizes = [1, 736], strides = [1, 1]} : vector<1x800xf32> to vector<1x736xf32>
    %36 = vector.broadcast %34 : vector<16x1xf32> to vector<16x736xf32>
    %37 = vector.broadcast %35 : vector<1x736xf32> to vector<16x736xf32>
    %38 = arith.mulf %36, %37 : vector<16x736xf32>
    %39 = arith.addf %33, %38 : vector<16x736xf32>
    %40 = vector.extract_strided_slice %2 {offsets = [0, 6], sizes = [16, 1], strides = [1, 1]} : vector<16x9xf32> to vector<16x1xf32>
    %41 = vector.extract_strided_slice %1 {offsets = [0, 56], sizes = [1, 736], strides = [1, 1]} : vector<1x800xf32> to vector<1x736xf32>
    %42 = vector.broadcast %40 : vector<16x1xf32> to vector<16x736xf32>
    %43 = vector.broadcast %41 : vector<1x736xf32> to vector<16x736xf32>
    %44 = arith.mulf %42, %43 : vector<16x736xf32>
    %45 = arith.addf %39, %44 : vector<16x736xf32>
    %46 = vector.extract_strided_slice %2 {offsets = [0, 7], sizes = [16, 1], strides = [1, 1]} : vector<16x9xf32> to vector<16x1xf32>
    %47 = vector.extract_strided_slice %1 {offsets = [0, 57], sizes = [1, 736], strides = [1, 1]} : vector<1x800xf32> to vector<1x736xf32>
    %48 = vector.broadcast %46 : vector<16x1xf32> to vector<16x736xf32>
    %49 = vector.broadcast %47 : vector<1x736xf32> to vector<16x736xf32>
    %50 = arith.mulf %48, %49 : vector<16x736xf32>
    %51 = arith.addf %45, %50 : vector<16x736xf32>
    %52 = vector.extract_strided_slice %2 {offsets = [0, 8], sizes = [16, 1], strides = [1, 1]} : vector<16x9xf32> to vector<16x1xf32>
    %53 = vector.extract_strided_slice %1 {offsets = [0, 58], sizes = [1, 736], strides = [1, 1]} : vector<1x800xf32> to vector<1x736xf32>
    %54 = vector.broadcast %52 : vector<16x1xf32> to vector<16x736xf32>
    %55 = vector.broadcast %53 : vector<1x736xf32> to vector<16x736xf32>
    %56 = arith.mulf %54, %55 : vector<16x736xf32>
    %57 = arith.addf %51, %56 : vector<16x736xf32>
    %c0_4 = arith.constant 0 : index
    %c0_5 = arith.constant 0 : index
    %58 = vector.load %arg3[%c0_4, %c0_5] : memref<16x1xf32, #tpu.memory_space<vmem>>, vector<16x1xf32>
    %59 = vector.broadcast %58 : vector<16x1xf32> to vector<16x736xf32>
    %60 = arith.addf %57, %59 : vector<16x736xf32>
    %cst_6 = arith.constant 0.000000e+00 : f32
    %61 = vector.broadcast %cst_6 : f32 to vector<16x736xf32>
    %62 = arith.maximumf %60, %61 : vector<16x736xf32>
    %cst_7 = arith.constant 0.000000e+00 : f32
    %63 = vector.broadcast %cst_7 : f32 to vector<10x672xf32>
    %c0_8 = arith.constant 0 : index
    %c0_9 = arith.constant 0 : index
    %c0_10 = arith.constant 0 : index
    %64 = vector.load %arg4[%c0_8, %c0_9, %c0_10] : memref<9x10x16xf32, #tpu.memory_space<vmem>>, vector<1x10x16xf32>
    %65 = vector.shape_cast %64 : vector<1x10x16xf32> to vector<10x16xf32>
    %66 = vector.extract_strided_slice %62 {offsets = [0, 0], sizes = [16, 672], strides = [1, 1]} : vector<16x736xf32> to vector<16x672xf32>
    %cst_11 = arith.constant dense<0.000000e+00> : vector<10x672xf32>
    %67 = tpu.matmul %65, %66, %cst_11 {dimension_numbers = #tpu.dot_dimension_numbers<[1], [0], [0], [1], [0, 0, 1, 1], [], []>} : vector<10x16xf32>, vector<16x672xf32>, vector<10x672xf32> -> vector<10x672xf32>
    %68 = arith.addf %63, %67 : vector<10x672xf32>
    %c1 = arith.constant 1 : index
    %c0_12 = arith.constant 0 : index
    %c0_13 = arith.constant 0 : index
    %69 = vector.load %arg4[%c1, %c0_12, %c0_13] : memref<9x10x16xf32, #tpu.memory_space<vmem>>, vector<1x10x16xf32>
    %70 = vector.shape_cast %69 : vector<1x10x16xf32> to vector<10x16xf32>
    %71 = vector.extract_strided_slice %62 {offsets = [0, 1], sizes = [16, 672], strides = [1, 1]} : vector<16x736xf32> to vector<16x672xf32>
    %cst_14 = arith.constant dense<0.000000e+00> : vector<10x672xf32>
    %72 = tpu.matmul %70, %71, %cst_14 {dimension_numbers = #tpu.dot_dimension_numbers<[1], [0], [0], [1], [0, 0, 1, 1], [], []>} : vector<10x16xf32>, vector<16x672xf32>, vector<10x672xf32> -> vector<10x672xf32>
    %73 = arith.addf %68, %72 : vector<10x672xf32>
    %c2 = arith.constant 2 : index
    %c0_15 = arith.constant 0 : index
    %c0_16 = arith.constant 0 : index
    %74 = vector.load %arg4[%c2, %c0_15, %c0_16] : memref<9x10x16xf32, #tpu.memory_space<vmem>>, vector<1x10x16xf32>
    %75 = vector.shape_cast %74 : vector<1x10x16xf32> to vector<10x16xf32>
    %76 = vector.extract_strided_slice %62 {offsets = [0, 2], sizes = [16, 672], strides = [1, 1]} : vector<16x736xf32> to vector<16x672xf32>
    %cst_17 = arith.constant dense<0.000000e+00> : vector<10x672xf32>
    %77 = tpu.matmul %75, %76, %cst_17 {dimension_numbers = #tpu.dot_dimension_numbers<[1], [0], [0], [1], [0, 0, 1, 1], [], []>} : vector<10x16xf32>, vector<16x672xf32>, vector<10x672xf32> -> vector<10x672xf32>
    %78 = arith.addf %73, %77 : vector<10x672xf32>
    %c3 = arith.constant 3 : index
    %c0_18 = arith.constant 0 : index
    %c0_19 = arith.constant 0 : index
    %79 = vector.load %arg4[%c3, %c0_18, %c0_19] : memref<9x10x16xf32, #tpu.memory_space<vmem>>, vector<1x10x16xf32>
    %80 = vector.shape_cast %79 : vector<1x10x16xf32> to vector<10x16xf32>
    %81 = vector.extract_strided_slice %62 {offsets = [0, 28], sizes = [16, 672], strides = [1, 1]} : vector<16x736xf32> to vector<16x672xf32>
    %cst_20 = arith.constant dense<0.000000e+00> : vector<10x672xf32>
    %82 = tpu.matmul %80, %81, %cst_20 {dimension_numbers = #tpu.dot_dimension_numbers<[1], [0], [0], [1], [0, 0, 1, 1], [], []>} : vector<10x16xf32>, vector<16x672xf32>, vector<10x672xf32> -> vector<10x672xf32>
    %83 = arith.addf %78, %82 : vector<10x672xf32>
    %c4 = arith.constant 4 : index
    %c0_21 = arith.constant 0 : index
    %c0_22 = arith.constant 0 : index
    %84 = vector.load %arg4[%c4, %c0_21, %c0_22] : memref<9x10x16xf32, #tpu.memory_space<vmem>>, vector<1x10x16xf32>
    %85 = vector.shape_cast %84 : vector<1x10x16xf32> to vector<10x16xf32>
    %86 = vector.extract_strided_slice %62 {offsets = [0, 29], sizes = [16, 672], strides = [1, 1]} : vector<16x736xf32> to vector<16x672xf32>
    %cst_23 = arith.constant dense<0.000000e+00> : vector<10x672xf32>
    %87 = tpu.matmul %85, %86, %cst_23 {dimension_numbers = #tpu.dot_dimension_numbers<[1], [0], [0], [1], [0, 0, 1, 1], [], []>} : vector<10x16xf32>, vector<16x672xf32>, vector<10x672xf32> -> vector<10x672xf32>
    %88 = arith.addf %83, %87 : vector<10x672xf32>
    %c5 = arith.constant 5 : index
    %c0_24 = arith.constant 0 : index
    %c0_25 = arith.constant 0 : index
    %89 = vector.load %arg4[%c5, %c0_24, %c0_25] : memref<9x10x16xf32, #tpu.memory_space<vmem>>, vector<1x10x16xf32>
    %90 = vector.shape_cast %89 : vector<1x10x16xf32> to vector<10x16xf32>
    %91 = vector.extract_strided_slice %62 {offsets = [0, 30], sizes = [16, 672], strides = [1, 1]} : vector<16x736xf32> to vector<16x672xf32>
    %cst_26 = arith.constant dense<0.000000e+00> : vector<10x672xf32>
    %92 = tpu.matmul %90, %91, %cst_26 {dimension_numbers = #tpu.dot_dimension_numbers<[1], [0], [0], [1], [0, 0, 1, 1], [], []>} : vector<10x16xf32>, vector<16x672xf32>, vector<10x672xf32> -> vector<10x672xf32>
    %93 = arith.addf %88, %92 : vector<10x672xf32>
    %c6 = arith.constant 6 : index
    %c0_27 = arith.constant 0 : index
    %c0_28 = arith.constant 0 : index
    %94 = vector.load %arg4[%c6, %c0_27, %c0_28] : memref<9x10x16xf32, #tpu.memory_space<vmem>>, vector<1x10x16xf32>
    %95 = vector.shape_cast %94 : vector<1x10x16xf32> to vector<10x16xf32>
    %96 = vector.extract_strided_slice %62 {offsets = [0, 56], sizes = [16, 672], strides = [1, 1]} : vector<16x736xf32> to vector<16x672xf32>
    %cst_29 = arith.constant dense<0.000000e+00> : vector<10x672xf32>
    %97 = tpu.matmul %95, %96, %cst_29 {dimension_numbers = #tpu.dot_dimension_numbers<[1], [0], [0], [1], [0, 0, 1, 1], [], []>} : vector<10x16xf32>, vector<16x672xf32>, vector<10x672xf32> -> vector<10x672xf32>
    %98 = arith.addf %93, %97 : vector<10x672xf32>
    %c7 = arith.constant 7 : index
    %c0_30 = arith.constant 0 : index
    %c0_31 = arith.constant 0 : index
    %99 = vector.load %arg4[%c7, %c0_30, %c0_31] : memref<9x10x16xf32, #tpu.memory_space<vmem>>, vector<1x10x16xf32>
    %100 = vector.shape_cast %99 : vector<1x10x16xf32> to vector<10x16xf32>
    %101 = vector.extract_strided_slice %62 {offsets = [0, 57], sizes = [16, 672], strides = [1, 1]} : vector<16x736xf32> to vector<16x672xf32>
    %cst_32 = arith.constant dense<0.000000e+00> : vector<10x672xf32>
    %102 = tpu.matmul %100, %101, %cst_32 {dimension_numbers = #tpu.dot_dimension_numbers<[1], [0], [0], [1], [0, 0, 1, 1], [], []>} : vector<10x16xf32>, vector<16x672xf32>, vector<10x672xf32> -> vector<10x672xf32>
    %103 = arith.addf %98, %102 : vector<10x672xf32>
    %c8 = arith.constant 8 : index
    %c0_33 = arith.constant 0 : index
    %c0_34 = arith.constant 0 : index
    %104 = vector.load %arg4[%c8, %c0_33, %c0_34] : memref<9x10x16xf32, #tpu.memory_space<vmem>>, vector<1x10x16xf32>
    %105 = vector.shape_cast %104 : vector<1x10x16xf32> to vector<10x16xf32>
    %106 = vector.extract_strided_slice %62 {offsets = [0, 58], sizes = [16, 672], strides = [1, 1]} : vector<16x736xf32> to vector<16x672xf32>
    %cst_35 = arith.constant dense<0.000000e+00> : vector<10x672xf32>
    %107 = tpu.matmul %105, %106, %cst_35 {dimension_numbers = #tpu.dot_dimension_numbers<[1], [0], [0], [1], [0, 0, 1, 1], [], []>} : vector<10x16xf32>, vector<16x672xf32>, vector<10x672xf32> -> vector<10x672xf32>
    %108 = arith.addf %103, %107 : vector<10x672xf32>
    %c0_36 = arith.constant 0 : index
    %c0_37 = arith.constant 0 : index
    %109 = vector.load %arg5[%c0_36, %c0_37] : memref<10x1xf32, #tpu.memory_space<vmem>>, vector<10x1xf32>
    %110 = vector.broadcast %109 : vector<10x1xf32> to vector<10x672xf32>
    %111 = arith.addf %108, %110 : vector<10x672xf32>
    %cst_38 = arith.constant 0.000000e+00 : f32
    %112 = vector.broadcast %cst_38 : f32 to vector<10x672xf32>
    %113 = arith.maximumf %111, %112 : vector<10x672xf32>
    %114 = vector.extract_strided_slice %113 {offsets = [0, 0], sizes = [10, 640], strides = [1, 1]} : vector<10x672xf32> to vector<10x640xf32>
    %115 = vector.extract_strided_slice %113 {offsets = [0, 1], sizes = [10, 640], strides = [1, 1]} : vector<10x672xf32> to vector<10x640xf32>
    %116 = arith.maximumf %114, %115 : vector<10x640xf32>
    %117 = vector.extract_strided_slice %113 {offsets = [0, 28], sizes = [10, 640], strides = [1, 1]} : vector<10x672xf32> to vector<10x640xf32>
    %118 = vector.extract_strided_slice %113 {offsets = [0, 29], sizes = [10, 640], strides = [1, 1]} : vector<10x672xf32> to vector<10x640xf32>
    %119 = arith.maximumf %117, %118 : vector<10x640xf32>
    %120 = arith.maximumf %116, %119 : vector<10x640xf32>
    %c0_39 = arith.constant 0 : index
    %c0_40 = arith.constant 0 : index
    %121 = vector.load %arg20[%c0_39, %c0_40] : memref<640x368xf32, #tpu.memory_space<vmem>>, vector<640x368xf32>
    %cst_41 = arith.constant dense<0.000000e+00> : vector<10x368xf32>
    %122 = tpu.matmul %120, %121, %cst_41 {dimension_numbers = #tpu.dot_dimension_numbers<[1], [0], [0], [1], [0, 0, 1, 1], [], []>} : vector<10x640xf32>, vector<640x368xf32>, vector<10x368xf32> -> vector<10x368xf32>
    %c0_42 = arith.constant 0 : index
    %c0_43 = arith.constant 0 : index
    %123 = vector.load %arg6[%c0_42, %c0_43] : memref<10x1xf32, #tpu.memory_space<vmem>>, vector<10x1xf32>
    %124 = vector.broadcast %123 : vector<10x1xf32> to vector<10x368xf32>
    %125 = arith.mulf %122, %124 : vector<10x368xf32>
    %c0_44 = arith.constant 0 : index
    %c0_45 = arith.constant 0 : index
    %126 = vector.load %arg7[%c0_44, %c0_45] : memref<10x1xf32, #tpu.memory_space<vmem>>, vector<10x1xf32>
    %127 = vector.broadcast %126 : vector<10x1xf32> to vector<10x368xf32>
    %128 = arith.addf %125, %127 : vector<10x368xf32>
    %cst_46 = arith.constant 0.000000e+00 : f32
    %129 = vector.broadcast %cst_46 : f32 to vector<10x304xf32>
    %c0_47 = arith.constant 0 : index
    %c0_48 = arith.constant 0 : index
    %c0_49 = arith.constant 0 : index
    %130 = vector.load %arg8[%c0_47, %c0_48, %c0_49] : memref<9x10x10xf32, #tpu.memory_space<vmem>>, vector<1x10x10xf32>
    %131 = vector.shape_cast %130 : vector<1x10x10xf32> to vector<10x10xf32>
    %132 = vector.extract_strided_slice %128 {offsets = [0, 0], sizes = [10, 304], strides = [1, 1]} : vector<10x368xf32> to vector<10x304xf32>
    %cst_50 = arith.constant dense<0.000000e+00> : vector<10x304xf32>
    %133 = tpu.matmul %131, %132, %cst_50 {dimension_numbers = #tpu.dot_dimension_numbers<[1], [0], [0], [1], [0, 0, 1, 1], [], []>} : vector<10x10xf32>, vector<10x304xf32>, vector<10x304xf32> -> vector<10x304xf32>
    %134 = arith.addf %129, %133 : vector<10x304xf32>
    %c1_51 = arith.constant 1 : index
    %c0_52 = arith.constant 0 : index
    %c0_53 = arith.constant 0 : index
    %135 = vector.load %arg8[%c1_51, %c0_52, %c0_53] : memref<9x10x10xf32, #tpu.memory_space<vmem>>, vector<1x10x10xf32>
    %136 = vector.shape_cast %135 : vector<1x10x10xf32> to vector<10x10xf32>
    %137 = vector.extract_strided_slice %128 {offsets = [0, 1], sizes = [10, 304], strides = [1, 1]} : vector<10x368xf32> to vector<10x304xf32>
    %cst_54 = arith.constant dense<0.000000e+00> : vector<10x304xf32>
    %138 = tpu.matmul %136, %137, %cst_54 {dimension_numbers = #tpu.dot_dimension_numbers<[1], [0], [0], [1], [0, 0, 1, 1], [], []>} : vector<10x10xf32>, vector<10x304xf32>, vector<10x304xf32> -> vector<10x304xf32>
    %139 = arith.addf %134, %138 : vector<10x304xf32>
    %c2_55 = arith.constant 2 : index
    %c0_56 = arith.constant 0 : index
    %c0_57 = arith.constant 0 : index
    %140 = vector.load %arg8[%c2_55, %c0_56, %c0_57] : memref<9x10x10xf32, #tpu.memory_space<vmem>>, vector<1x10x10xf32>
    %141 = vector.shape_cast %140 : vector<1x10x10xf32> to vector<10x10xf32>
    %142 = vector.extract_strided_slice %128 {offsets = [0, 2], sizes = [10, 304], strides = [1, 1]} : vector<10x368xf32> to vector<10x304xf32>
    %cst_58 = arith.constant dense<0.000000e+00> : vector<10x304xf32>
    %143 = tpu.matmul %141, %142, %cst_58 {dimension_numbers = #tpu.dot_dimension_numbers<[1], [0], [0], [1], [0, 0, 1, 1], [], []>} : vector<10x10xf32>, vector<10x304xf32>, vector<10x304xf32> -> vector<10x304xf32>
    %144 = arith.addf %139, %143 : vector<10x304xf32>
    %c3_59 = arith.constant 3 : index
    %c0_60 = arith.constant 0 : index
    %c0_61 = arith.constant 0 : index
    %145 = vector.load %arg8[%c3_59, %c0_60, %c0_61] : memref<9x10x10xf32, #tpu.memory_space<vmem>>, vector<1x10x10xf32>
    %146 = vector.shape_cast %145 : vector<1x10x10xf32> to vector<10x10xf32>
    %147 = vector.extract_strided_slice %128 {offsets = [0, 28], sizes = [10, 304], strides = [1, 1]} : vector<10x368xf32> to vector<10x304xf32>
    %cst_62 = arith.constant dense<0.000000e+00> : vector<10x304xf32>
    %148 = tpu.matmul %146, %147, %cst_62 {dimension_numbers = #tpu.dot_dimension_numbers<[1], [0], [0], [1], [0, 0, 1, 1], [], []>} : vector<10x10xf32>, vector<10x304xf32>, vector<10x304xf32> -> vector<10x304xf32>
    %149 = arith.addf %144, %148 : vector<10x304xf32>
    %c4_63 = arith.constant 4 : index
    %c0_64 = arith.constant 0 : index
    %c0_65 = arith.constant 0 : index
    %150 = vector.load %arg8[%c4_63, %c0_64, %c0_65] : memref<9x10x10xf32, #tpu.memory_space<vmem>>, vector<1x10x10xf32>
    %151 = vector.shape_cast %150 : vector<1x10x10xf32> to vector<10x10xf32>
    %152 = vector.extract_strided_slice %128 {offsets = [0, 29], sizes = [10, 304], strides = [1, 1]} : vector<10x368xf32> to vector<10x304xf32>
    %cst_66 = arith.constant dense<0.000000e+00> : vector<10x304xf32>
    %153 = tpu.matmul %151, %152, %cst_66 {dimension_numbers = #tpu.dot_dimension_numbers<[1], [0], [0], [1], [0, 0, 1, 1], [], []>} : vector<10x10xf32>, vector<10x304xf32>, vector<10x304xf32> -> vector<10x304xf32>
    %154 = arith.addf %149, %153 : vector<10x304xf32>
    %c5_67 = arith.constant 5 : index
    %c0_68 = arith.constant 0 : index
    %c0_69 = arith.constant 0 : index
    %155 = vector.load %arg8[%c5_67, %c0_68, %c0_69] : memref<9x10x10xf32, #tpu.memory_space<vmem>>, vector<1x10x10xf32>
    %156 = vector.shape_cast %155 : vector<1x10x10xf32> to vector<10x10xf32>
    %157 = vector.extract_strided_slice %128 {offsets = [0, 30], sizes = [10, 304], strides = [1, 1]} : vector<10x368xf32> to vector<10x304xf32>
    %cst_70 = arith.constant dense<0.000000e+00> : vector<10x304xf32>
    %158 = tpu.matmul %156, %157, %cst_70 {dimension_numbers = #tpu.dot_dimension_numbers<[1], [0], [0], [1], [0, 0, 1, 1], [], []>} : vector<10x10xf32>, vector<10x304xf32>, vector<10x304xf32> -> vector<10x304xf32>
    %159 = arith.addf %154, %158 : vector<10x304xf32>
    %c6_71 = arith.constant 6 : index
    %c0_72 = arith.constant 0 : index
    %c0_73 = arith.constant 0 : index
    %160 = vector.load %arg8[%c6_71, %c0_72, %c0_73] : memref<9x10x10xf32, #tpu.memory_space<vmem>>, vector<1x10x10xf32>
    %161 = vector.shape_cast %160 : vector<1x10x10xf32> to vector<10x10xf32>
    %162 = vector.extract_strided_slice %128 {offsets = [0, 56], sizes = [10, 304], strides = [1, 1]} : vector<10x368xf32> to vector<10x304xf32>
    %cst_74 = arith.constant dense<0.000000e+00> : vector<10x304xf32>
    %163 = tpu.matmul %161, %162, %cst_74 {dimension_numbers = #tpu.dot_dimension_numbers<[1], [0], [0], [1], [0, 0, 1, 1], [], []>} : vector<10x10xf32>, vector<10x304xf32>, vector<10x304xf32> -> vector<10x304xf32>
    %164 = arith.addf %159, %163 : vector<10x304xf32>
    %c7_75 = arith.constant 7 : index
    %c0_76 = arith.constant 0 : index
    %c0_77 = arith.constant 0 : index
    %165 = vector.load %arg8[%c7_75, %c0_76, %c0_77] : memref<9x10x10xf32, #tpu.memory_space<vmem>>, vector<1x10x10xf32>
    %166 = vector.shape_cast %165 : vector<1x10x10xf32> to vector<10x10xf32>
    %167 = vector.extract_strided_slice %128 {offsets = [0, 57], sizes = [10, 304], strides = [1, 1]} : vector<10x368xf32> to vector<10x304xf32>
    %cst_78 = arith.constant dense<0.000000e+00> : vector<10x304xf32>
    %168 = tpu.matmul %166, %167, %cst_78 {dimension_numbers = #tpu.dot_dimension_numbers<[1], [0], [0], [1], [0, 0, 1, 1], [], []>} : vector<10x10xf32>, vector<10x304xf32>, vector<10x304xf32> -> vector<10x304xf32>
    %169 = arith.addf %164, %168 : vector<10x304xf32>
    %c8_79 = arith.constant 8 : index
    %c0_80 = arith.constant 0 : index
    %c0_81 = arith.constant 0 : index
    %170 = vector.load %arg8[%c8_79, %c0_80, %c0_81] : memref<9x10x10xf32, #tpu.memory_space<vmem>>, vector<1x10x10xf32>
    %171 = vector.shape_cast %170 : vector<1x10x10xf32> to vector<10x10xf32>
    %172 = vector.extract_strided_slice %128 {offsets = [0, 58], sizes = [10, 304], strides = [1, 1]} : vector<10x368xf32> to vector<10x304xf32>
    %cst_82 = arith.constant dense<0.000000e+00> : vector<10x304xf32>
    %173 = tpu.matmul %171, %172, %cst_82 {dimension_numbers = #tpu.dot_dimension_numbers<[1], [0], [0], [1], [0, 0, 1, 1], [], []>} : vector<10x10xf32>, vector<10x304xf32>, vector<10x304xf32> -> vector<10x304xf32>
    %174 = arith.addf %169, %173 : vector<10x304xf32>
    %c0_83 = arith.constant 0 : index
    %c0_84 = arith.constant 0 : index
    %175 = vector.load %arg9[%c0_83, %c0_84] : memref<10x1xf32, #tpu.memory_space<vmem>>, vector<10x1xf32>
    %176 = vector.broadcast %175 : vector<10x1xf32> to vector<10x304xf32>
    %177 = arith.addf %174, %176 : vector<10x304xf32>
    %cst_85 = arith.constant 0.000000e+00 : f32
    %178 = vector.broadcast %cst_85 : f32 to vector<10x304xf32>
    %179 = arith.maximumf %177, %178 : vector<10x304xf32>
    %cst_86 = arith.constant 0.000000e+00 : f32
    %180 = vector.broadcast %cst_86 : f32 to vector<16x240xf32>
    %c0_87 = arith.constant 0 : index
    %c0_88 = arith.constant 0 : index
    %c0_89 = arith.constant 0 : index
    %181 = vector.load %arg10[%c0_87, %c0_88, %c0_89] : memref<9x16x10xf32, #tpu.memory_space<vmem>>, vector<1x16x10xf32>
    %182 = vector.shape_cast %181 : vector<1x16x10xf32> to vector<16x10xf32>
    %183 = vector.extract_strided_slice %179 {offsets = [0, 0], sizes = [10, 240], strides = [1, 1]} : vector<10x304xf32> to vector<10x240xf32>
    %cst_90 = arith.constant dense<0.000000e+00> : vector<16x240xf32>
    %184 = tpu.matmul %182, %183, %cst_90 {dimension_numbers = #tpu.dot_dimension_numbers<[1], [0], [0], [1], [0, 0, 1, 1], [], []>} : vector<16x10xf32>, vector<10x240xf32>, vector<16x240xf32> -> vector<16x240xf32>
    %185 = arith.addf %180, %184 : vector<16x240xf32>
    %c1_91 = arith.constant 1 : index
    %c0_92 = arith.constant 0 : index
    %c0_93 = arith.constant 0 : index
    %186 = vector.load %arg10[%c1_91, %c0_92, %c0_93] : memref<9x16x10xf32, #tpu.memory_space<vmem>>, vector<1x16x10xf32>
    %187 = vector.shape_cast %186 : vector<1x16x10xf32> to vector<16x10xf32>
    %188 = vector.extract_strided_slice %179 {offsets = [0, 1], sizes = [10, 240], strides = [1, 1]} : vector<10x304xf32> to vector<10x240xf32>
    %cst_94 = arith.constant dense<0.000000e+00> : vector<16x240xf32>
    %189 = tpu.matmul %187, %188, %cst_94 {dimension_numbers = #tpu.dot_dimension_numbers<[1], [0], [0], [1], [0, 0, 1, 1], [], []>} : vector<16x10xf32>, vector<10x240xf32>, vector<16x240xf32> -> vector<16x240xf32>
    %190 = arith.addf %185, %189 : vector<16x240xf32>
    %c2_95 = arith.constant 2 : index
    %c0_96 = arith.constant 0 : index
    %c0_97 = arith.constant 0 : index
    %191 = vector.load %arg10[%c2_95, %c0_96, %c0_97] : memref<9x16x10xf32, #tpu.memory_space<vmem>>, vector<1x16x10xf32>
    %192 = vector.shape_cast %191 : vector<1x16x10xf32> to vector<16x10xf32>
    %193 = vector.extract_strided_slice %179 {offsets = [0, 2], sizes = [10, 240], strides = [1, 1]} : vector<10x304xf32> to vector<10x240xf32>
    %cst_98 = arith.constant dense<0.000000e+00> : vector<16x240xf32>
    %194 = tpu.matmul %192, %193, %cst_98 {dimension_numbers = #tpu.dot_dimension_numbers<[1], [0], [0], [1], [0, 0, 1, 1], [], []>} : vector<16x10xf32>, vector<10x240xf32>, vector<16x240xf32> -> vector<16x240xf32>
    %195 = arith.addf %190, %194 : vector<16x240xf32>
    %c3_99 = arith.constant 3 : index
    %c0_100 = arith.constant 0 : index
    %c0_101 = arith.constant 0 : index
    %196 = vector.load %arg10[%c3_99, %c0_100, %c0_101] : memref<9x16x10xf32, #tpu.memory_space<vmem>>, vector<1x16x10xf32>
    %197 = vector.shape_cast %196 : vector<1x16x10xf32> to vector<16x10xf32>
    %198 = vector.extract_strided_slice %179 {offsets = [0, 28], sizes = [10, 240], strides = [1, 1]} : vector<10x304xf32> to vector<10x240xf32>
    %cst_102 = arith.constant dense<0.000000e+00> : vector<16x240xf32>
    %199 = tpu.matmul %197, %198, %cst_102 {dimension_numbers = #tpu.dot_dimension_numbers<[1], [0], [0], [1], [0, 0, 1, 1], [], []>} : vector<16x10xf32>, vector<10x240xf32>, vector<16x240xf32> -> vector<16x240xf32>
    %200 = arith.addf %195, %199 : vector<16x240xf32>
    %c4_103 = arith.constant 4 : index
    %c0_104 = arith.constant 0 : index
    %c0_105 = arith.constant 0 : index
    %201 = vector.load %arg10[%c4_103, %c0_104, %c0_105] : memref<9x16x10xf32, #tpu.memory_space<vmem>>, vector<1x16x10xf32>
    %202 = vector.shape_cast %201 : vector<1x16x10xf32> to vector<16x10xf32>
    %203 = vector.extract_strided_slice %179 {offsets = [0, 29], sizes = [10, 240], strides = [1, 1]} : vector<10x304xf32> to vector<10x240xf32>
    %cst_106 = arith.constant dense<0.000000e+00> : vector<16x240xf32>
    %204 = tpu.matmul %202, %203, %cst_106 {dimension_numbers = #tpu.dot_dimension_numbers<[1], [0], [0], [1], [0, 0, 1, 1], [], []>} : vector<16x10xf32>, vector<10x240xf32>, vector<16x240xf32> -> vector<16x240xf32>
    %205 = arith.addf %200, %204 : vector<16x240xf32>
    %c5_107 = arith.constant 5 : index
    %c0_108 = arith.constant 0 : index
    %c0_109 = arith.constant 0 : index
    %206 = vector.load %arg10[%c5_107, %c0_108, %c0_109] : memref<9x16x10xf32, #tpu.memory_space<vmem>>, vector<1x16x10xf32>
    %207 = vector.shape_cast %206 : vector<1x16x10xf32> to vector<16x10xf32>
    %208 = vector.extract_strided_slice %179 {offsets = [0, 30], sizes = [10, 240], strides = [1, 1]} : vector<10x304xf32> to vector<10x240xf32>
    %cst_110 = arith.constant dense<0.000000e+00> : vector<16x240xf32>
    %209 = tpu.matmul %207, %208, %cst_110 {dimension_numbers = #tpu.dot_dimension_numbers<[1], [0], [0], [1], [0, 0, 1, 1], [], []>} : vector<16x10xf32>, vector<10x240xf32>, vector<16x240xf32> -> vector<16x240xf32>
    %210 = arith.addf %205, %209 : vector<16x240xf32>
    %c6_111 = arith.constant 6 : index
    %c0_112 = arith.constant 0 : index
    %c0_113 = arith.constant 0 : index
    %211 = vector.load %arg10[%c6_111, %c0_112, %c0_113] : memref<9x16x10xf32, #tpu.memory_space<vmem>>, vector<1x16x10xf32>
    %212 = vector.shape_cast %211 : vector<1x16x10xf32> to vector<16x10xf32>
    %213 = vector.extract_strided_slice %179 {offsets = [0, 56], sizes = [10, 240], strides = [1, 1]} : vector<10x304xf32> to vector<10x240xf32>
    %cst_114 = arith.constant dense<0.000000e+00> : vector<16x240xf32>
    %214 = tpu.matmul %212, %213, %cst_114 {dimension_numbers = #tpu.dot_dimension_numbers<[1], [0], [0], [1], [0, 0, 1, 1], [], []>} : vector<16x10xf32>, vector<10x240xf32>, vector<16x240xf32> -> vector<16x240xf32>
    %215 = arith.addf %210, %214 : vector<16x240xf32>
    %c7_115 = arith.constant 7 : index
    %c0_116 = arith.constant 0 : index
    %c0_117 = arith.constant 0 : index
    %216 = vector.load %arg10[%c7_115, %c0_116, %c0_117] : memref<9x16x10xf32, #tpu.memory_space<vmem>>, vector<1x16x10xf32>
    %217 = vector.shape_cast %216 : vector<1x16x10xf32> to vector<16x10xf32>
    %218 = vector.extract_strided_slice %179 {offsets = [0, 57], sizes = [10, 240], strides = [1, 1]} : vector<10x304xf32> to vector<10x240xf32>
    %cst_118 = arith.constant dense<0.000000e+00> : vector<16x240xf32>
    %219 = tpu.matmul %217, %218, %cst_118 {dimension_numbers = #tpu.dot_dimension_numbers<[1], [0], [0], [1], [0, 0, 1, 1], [], []>} : vector<16x10xf32>, vector<10x240xf32>, vector<16x240xf32> -> vector<16x240xf32>
    %220 = arith.addf %215, %219 : vector<16x240xf32>
    %c8_119 = arith.constant 8 : index
    %c0_120 = arith.constant 0 : index
    %c0_121 = arith.constant 0 : index
    %221 = vector.load %arg10[%c8_119, %c0_120, %c0_121] : memref<9x16x10xf32, #tpu.memory_space<vmem>>, vector<1x16x10xf32>
    %222 = vector.shape_cast %221 : vector<1x16x10xf32> to vector<16x10xf32>
    %223 = vector.extract_strided_slice %179 {offsets = [0, 58], sizes = [10, 240], strides = [1, 1]} : vector<10x304xf32> to vector<10x240xf32>
    %cst_122 = arith.constant dense<0.000000e+00> : vector<16x240xf32>
    %224 = tpu.matmul %222, %223, %cst_122 {dimension_numbers = #tpu.dot_dimension_numbers<[1], [0], [0], [1], [0, 0, 1, 1], [], []>} : vector<16x10xf32>, vector<10x240xf32>, vector<16x240xf32> -> vector<16x240xf32>
    %225 = arith.addf %220, %224 : vector<16x240xf32>
    %c0_123 = arith.constant 0 : index
    %c0_124 = arith.constant 0 : index
    %226 = vector.load %arg11[%c0_123, %c0_124] : memref<16x1xf32, #tpu.memory_space<vmem>>, vector<16x1xf32>
    %227 = vector.broadcast %226 : vector<16x1xf32> to vector<16x240xf32>
    %228 = arith.addf %225, %227 : vector<16x240xf32>
    %cst_125 = arith.constant 0.000000e+00 : f32
    %229 = vector.broadcast %cst_125 : f32 to vector<16x240xf32>
    %230 = arith.maximumf %228, %229 : vector<16x240xf32>
    %c0_126 = arith.constant 0 : index
    %c0_127 = arith.constant 0 : index
    %231 = vector.load %arg12[%c0_126, %c0_127] : memref<16x1xf32, #tpu.memory_space<vmem>>, vector<16x1xf32>
    %232 = vector.broadcast %231 : vector<16x1xf32> to vector<16x240xf32>
    %233 = arith.mulf %230, %232 : vector<16x240xf32>
    %c0_128 = arith.constant 0 : index
    %c0_129 = arith.constant 0 : index
    %234 = vector.load %arg13[%c0_128, %c0_129] : memref<16x1xf32, #tpu.memory_space<vmem>>, vector<16x1xf32>
    %235 = vector.broadcast %234 : vector<16x1xf32> to vector<16x240xf32>
    %236 = arith.addf %233, %235 : vector<16x240xf32>
    %cst_130 = arith.constant 0.000000e+00 : f32
    %237 = vector.broadcast %cst_130 : f32 to vector<16x176xf32>
    %c0_131 = arith.constant 0 : index
    %c0_132 = arith.constant 0 : index
    %c0_133 = arith.constant 0 : index
    %238 = vector.load %arg14[%c0_131, %c0_132, %c0_133] : memref<9x16x16xf32, #tpu.memory_space<vmem>>, vector<1x16x16xf32>
    %239 = vector.shape_cast %238 : vector<1x16x16xf32> to vector<16x16xf32>
    %240 = vector.extract_strided_slice %236 {offsets = [0, 0], sizes = [16, 176], strides = [1, 1]} : vector<16x240xf32> to vector<16x176xf32>
    %cst_134 = arith.constant dense<0.000000e+00> : vector<16x176xf32>
    %241 = tpu.matmul %239, %240, %cst_134 {dimension_numbers = #tpu.dot_dimension_numbers<[1], [0], [0], [1], [0, 0, 1, 1], [], []>} : vector<16x16xf32>, vector<16x176xf32>, vector<16x176xf32> -> vector<16x176xf32>
    %242 = arith.addf %237, %241 : vector<16x176xf32>
    %c1_135 = arith.constant 1 : index
    %c0_136 = arith.constant 0 : index
    %c0_137 = arith.constant 0 : index
    %243 = vector.load %arg14[%c1_135, %c0_136, %c0_137] : memref<9x16x16xf32, #tpu.memory_space<vmem>>, vector<1x16x16xf32>
    %244 = vector.shape_cast %243 : vector<1x16x16xf32> to vector<16x16xf32>
    %245 = vector.extract_strided_slice %236 {offsets = [0, 1], sizes = [16, 176], strides = [1, 1]} : vector<16x240xf32> to vector<16x176xf32>
    %cst_138 = arith.constant dense<0.000000e+00> : vector<16x176xf32>
    %246 = tpu.matmul %244, %245, %cst_138 {dimension_numbers = #tpu.dot_dimension_numbers<[1], [0], [0], [1], [0, 0, 1, 1], [], []>} : vector<16x16xf32>, vector<16x176xf32>, vector<16x176xf32> -> vector<16x176xf32>
    %247 = arith.addf %242, %246 : vector<16x176xf32>
    %c2_139 = arith.constant 2 : index
    %c0_140 = arith.constant 0 : index
    %c0_141 = arith.constant 0 : index
    %248 = vector.load %arg14[%c2_139, %c0_140, %c0_141] : memref<9x16x16xf32, #tpu.memory_space<vmem>>, vector<1x16x16xf32>
    %249 = vector.shape_cast %248 : vector<1x16x16xf32> to vector<16x16xf32>
    %250 = vector.extract_strided_slice %236 {offsets = [0, 2], sizes = [16, 176], strides = [1, 1]} : vector<16x240xf32> to vector<16x176xf32>
    %cst_142 = arith.constant dense<0.000000e+00> : vector<16x176xf32>
    %251 = tpu.matmul %249, %250, %cst_142 {dimension_numbers = #tpu.dot_dimension_numbers<[1], [0], [0], [1], [0, 0, 1, 1], [], []>} : vector<16x16xf32>, vector<16x176xf32>, vector<16x176xf32> -> vector<16x176xf32>
    %252 = arith.addf %247, %251 : vector<16x176xf32>
    %c3_143 = arith.constant 3 : index
    %c0_144 = arith.constant 0 : index
    %c0_145 = arith.constant 0 : index
    %253 = vector.load %arg14[%c3_143, %c0_144, %c0_145] : memref<9x16x16xf32, #tpu.memory_space<vmem>>, vector<1x16x16xf32>
    %254 = vector.shape_cast %253 : vector<1x16x16xf32> to vector<16x16xf32>
    %255 = vector.extract_strided_slice %236 {offsets = [0, 28], sizes = [16, 176], strides = [1, 1]} : vector<16x240xf32> to vector<16x176xf32>
    %cst_146 = arith.constant dense<0.000000e+00> : vector<16x176xf32>
    %256 = tpu.matmul %254, %255, %cst_146 {dimension_numbers = #tpu.dot_dimension_numbers<[1], [0], [0], [1], [0, 0, 1, 1], [], []>} : vector<16x16xf32>, vector<16x176xf32>, vector<16x176xf32> -> vector<16x176xf32>
    %257 = arith.addf %252, %256 : vector<16x176xf32>
    %c4_147 = arith.constant 4 : index
    %c0_148 = arith.constant 0 : index
    %c0_149 = arith.constant 0 : index
    %258 = vector.load %arg14[%c4_147, %c0_148, %c0_149] : memref<9x16x16xf32, #tpu.memory_space<vmem>>, vector<1x16x16xf32>
    %259 = vector.shape_cast %258 : vector<1x16x16xf32> to vector<16x16xf32>
    %260 = vector.extract_strided_slice %236 {offsets = [0, 29], sizes = [16, 176], strides = [1, 1]} : vector<16x240xf32> to vector<16x176xf32>
    %cst_150 = arith.constant dense<0.000000e+00> : vector<16x176xf32>
    %261 = tpu.matmul %259, %260, %cst_150 {dimension_numbers = #tpu.dot_dimension_numbers<[1], [0], [0], [1], [0, 0, 1, 1], [], []>} : vector<16x16xf32>, vector<16x176xf32>, vector<16x176xf32> -> vector<16x176xf32>
    %262 = arith.addf %257, %261 : vector<16x176xf32>
    %c5_151 = arith.constant 5 : index
    %c0_152 = arith.constant 0 : index
    %c0_153 = arith.constant 0 : index
    %263 = vector.load %arg14[%c5_151, %c0_152, %c0_153] : memref<9x16x16xf32, #tpu.memory_space<vmem>>, vector<1x16x16xf32>
    %264 = vector.shape_cast %263 : vector<1x16x16xf32> to vector<16x16xf32>
    %265 = vector.extract_strided_slice %236 {offsets = [0, 30], sizes = [16, 176], strides = [1, 1]} : vector<16x240xf32> to vector<16x176xf32>
    %cst_154 = arith.constant dense<0.000000e+00> : vector<16x176xf32>
    %266 = tpu.matmul %264, %265, %cst_154 {dimension_numbers = #tpu.dot_dimension_numbers<[1], [0], [0], [1], [0, 0, 1, 1], [], []>} : vector<16x16xf32>, vector<16x176xf32>, vector<16x176xf32> -> vector<16x176xf32>
    %267 = arith.addf %262, %266 : vector<16x176xf32>
    %c6_155 = arith.constant 6 : index
    %c0_156 = arith.constant 0 : index
    %c0_157 = arith.constant 0 : index
    %268 = vector.load %arg14[%c6_155, %c0_156, %c0_157] : memref<9x16x16xf32, #tpu.memory_space<vmem>>, vector<1x16x16xf32>
    %269 = vector.shape_cast %268 : vector<1x16x16xf32> to vector<16x16xf32>
    %270 = vector.extract_strided_slice %236 {offsets = [0, 56], sizes = [16, 176], strides = [1, 1]} : vector<16x240xf32> to vector<16x176xf32>
    %cst_158 = arith.constant dense<0.000000e+00> : vector<16x176xf32>
    %271 = tpu.matmul %269, %270, %cst_158 {dimension_numbers = #tpu.dot_dimension_numbers<[1], [0], [0], [1], [0, 0, 1, 1], [], []>} : vector<16x16xf32>, vector<16x176xf32>, vector<16x176xf32> -> vector<16x176xf32>
    %272 = arith.addf %267, %271 : vector<16x176xf32>
    %c7_159 = arith.constant 7 : index
    %c0_160 = arith.constant 0 : index
    %c0_161 = arith.constant 0 : index
    %273 = vector.load %arg14[%c7_159, %c0_160, %c0_161] : memref<9x16x16xf32, #tpu.memory_space<vmem>>, vector<1x16x16xf32>
    %274 = vector.shape_cast %273 : vector<1x16x16xf32> to vector<16x16xf32>
    %275 = vector.extract_strided_slice %236 {offsets = [0, 57], sizes = [16, 176], strides = [1, 1]} : vector<16x240xf32> to vector<16x176xf32>
    %cst_162 = arith.constant dense<0.000000e+00> : vector<16x176xf32>
    %276 = tpu.matmul %274, %275, %cst_162 {dimension_numbers = #tpu.dot_dimension_numbers<[1], [0], [0], [1], [0, 0, 1, 1], [], []>} : vector<16x16xf32>, vector<16x176xf32>, vector<16x176xf32> -> vector<16x176xf32>
    %277 = arith.addf %272, %276 : vector<16x176xf32>
    %c8_163 = arith.constant 8 : index
    %c0_164 = arith.constant 0 : index
    %c0_165 = arith.constant 0 : index
    %278 = vector.load %arg14[%c8_163, %c0_164, %c0_165] : memref<9x16x16xf32, #tpu.memory_space<vmem>>, vector<1x16x16xf32>
    %279 = vector.shape_cast %278 : vector<1x16x16xf32> to vector<16x16xf32>
    %280 = vector.extract_strided_slice %236 {offsets = [0, 58], sizes = [16, 176], strides = [1, 1]} : vector<16x240xf32> to vector<16x176xf32>
    %cst_166 = arith.constant dense<0.000000e+00> : vector<16x176xf32>
    %281 = tpu.matmul %279, %280, %cst_166 {dimension_numbers = #tpu.dot_dimension_numbers<[1], [0], [0], [1], [0, 0, 1, 1], [], []>} : vector<16x16xf32>, vector<16x176xf32>, vector<16x176xf32> -> vector<16x176xf32>
    %282 = arith.addf %277, %281 : vector<16x176xf32>
    %c0_167 = arith.constant 0 : index
    %c0_168 = arith.constant 0 : index
    %283 = vector.load %arg15[%c0_167, %c0_168] : memref<16x1xf32, #tpu.memory_space<vmem>>, vector<16x1xf32>
    %284 = vector.broadcast %283 : vector<16x1xf32> to vector<16x176xf32>
    %285 = arith.addf %282, %284 : vector<16x176xf32>
    %cst_169 = arith.constant 0.000000e+00 : f32
    %286 = vector.broadcast %cst_169 : f32 to vector<16x176xf32>
    %287 = arith.maximumf %285, %286 : vector<16x176xf32>
    %c0_170 = arith.constant 0 : index
    %c0_171 = arith.constant 0 : index
    %288 = vector.load %arg22[%c0_170, %c0_171] : memref<1x176xf32, #tpu.memory_space<vmem>>, vector<1x176xf32>
    %289 = vector.broadcast %288 : vector<1x176xf32> to vector<16x176xf32>
    %290 = arith.mulf %287, %289 : vector<16x176xf32>
    %c0_172 = arith.constant 0 : index
    %c0_173 = arith.constant 0 : index
    %291 = vector.load %arg21[%c0_172, %c0_173] : memref<176x232xf32, #tpu.memory_space<vmem>>, vector<176x232xf32>
    %cst_174 = arith.constant dense<0.000000e+00> : vector<16x232xf32>
    %292 = tpu.matmul %290, %291, %cst_174 {dimension_numbers = #tpu.dot_dimension_numbers<[1], [0], [0], [1], [0, 0, 1, 1], [], []>} : vector<16x176xf32>, vector<176x232xf32>, vector<16x232xf32> -> vector<16x232xf32>
    %cst_175 = arith.constant 0.000000e+00 : f32
    %293 = vector.broadcast %cst_175 : f32 to vector<16x168xf32>
    %c0_176 = arith.constant 0 : index
    %c0_177 = arith.constant 0 : index
    %c0_178 = arith.constant 0 : index
    %294 = vector.load %arg16[%c0_176, %c0_177, %c0_178] : memref<9x16x16xf32, #tpu.memory_space<vmem>>, vector<1x16x16xf32>
    %295 = vector.shape_cast %294 : vector<1x16x16xf32> to vector<16x16xf32>
    %296 = vector.extract_strided_slice %292 {offsets = [0, 0], sizes = [16, 168], strides = [1, 1]} : vector<16x232xf32> to vector<16x168xf32>
    %cst_179 = arith.constant dense<0.000000e+00> : vector<16x168xf32>
    %297 = tpu.matmul %295, %296, %cst_179 {dimension_numbers = #tpu.dot_dimension_numbers<[1], [0], [0], [1], [0, 0, 1, 1], [], []>} : vector<16x16xf32>, vector<16x168xf32>, vector<16x168xf32> -> vector<16x168xf32>
    %298 = arith.addf %293, %297 : vector<16x168xf32>
    %c1_180 = arith.constant 1 : index
    %c0_181 = arith.constant 0 : index
    %c0_182 = arith.constant 0 : index
    %299 = vector.load %arg16[%c1_180, %c0_181, %c0_182] : memref<9x16x16xf32, #tpu.memory_space<vmem>>, vector<1x16x16xf32>
    %300 = vector.shape_cast %299 : vector<1x16x16xf32> to vector<16x16xf32>
    %301 = vector.extract_strided_slice %292 {offsets = [0, 1], sizes = [16, 168], strides = [1, 1]} : vector<16x232xf32> to vector<16x168xf32>
    %cst_183 = arith.constant dense<0.000000e+00> : vector<16x168xf32>
    %302 = tpu.matmul %300, %301, %cst_183 {dimension_numbers = #tpu.dot_dimension_numbers<[1], [0], [0], [1], [0, 0, 1, 1], [], []>} : vector<16x16xf32>, vector<16x168xf32>, vector<16x168xf32> -> vector<16x168xf32>
    %303 = arith.addf %298, %302 : vector<16x168xf32>
    %c2_184 = arith.constant 2 : index
    %c0_185 = arith.constant 0 : index
    %c0_186 = arith.constant 0 : index
    %304 = vector.load %arg16[%c2_184, %c0_185, %c0_186] : memref<9x16x16xf32, #tpu.memory_space<vmem>>, vector<1x16x16xf32>
    %305 = vector.shape_cast %304 : vector<1x16x16xf32> to vector<16x16xf32>
    %306 = vector.extract_strided_slice %292 {offsets = [0, 2], sizes = [16, 168], strides = [1, 1]} : vector<16x232xf32> to vector<16x168xf32>
    %cst_187 = arith.constant dense<0.000000e+00> : vector<16x168xf32>
    %307 = tpu.matmul %305, %306, %cst_187 {dimension_numbers = #tpu.dot_dimension_numbers<[1], [0], [0], [1], [0, 0, 1, 1], [], []>} : vector<16x16xf32>, vector<16x168xf32>, vector<16x168xf32> -> vector<16x168xf32>
    %308 = arith.addf %303, %307 : vector<16x168xf32>
    %c3_188 = arith.constant 3 : index
    %c0_189 = arith.constant 0 : index
    %c0_190 = arith.constant 0 : index
    %309 = vector.load %arg16[%c3_188, %c0_189, %c0_190] : memref<9x16x16xf32, #tpu.memory_space<vmem>>, vector<1x16x16xf32>
    %310 = vector.shape_cast %309 : vector<1x16x16xf32> to vector<16x16xf32>
    %311 = vector.extract_strided_slice %292 {offsets = [0, 28], sizes = [16, 168], strides = [1, 1]} : vector<16x232xf32> to vector<16x168xf32>
    %cst_191 = arith.constant dense<0.000000e+00> : vector<16x168xf32>
    %312 = tpu.matmul %310, %311, %cst_191 {dimension_numbers = #tpu.dot_dimension_numbers<[1], [0], [0], [1], [0, 0, 1, 1], [], []>} : vector<16x16xf32>, vector<16x168xf32>, vector<16x168xf32> -> vector<16x168xf32>
    %313 = arith.addf %308, %312 : vector<16x168xf32>
    %c4_192 = arith.constant 4 : index
    %c0_193 = arith.constant 0 : index
    %c0_194 = arith.constant 0 : index
    %314 = vector.load %arg16[%c4_192, %c0_193, %c0_194] : memref<9x16x16xf32, #tpu.memory_space<vmem>>, vector<1x16x16xf32>
    %315 = vector.shape_cast %314 : vector<1x16x16xf32> to vector<16x16xf32>
    %316 = vector.extract_strided_slice %292 {offsets = [0, 29], sizes = [16, 168], strides = [1, 1]} : vector<16x232xf32> to vector<16x168xf32>
    %cst_195 = arith.constant dense<0.000000e+00> : vector<16x168xf32>
    %317 = tpu.matmul %315, %316, %cst_195 {dimension_numbers = #tpu.dot_dimension_numbers<[1], [0], [0], [1], [0, 0, 1, 1], [], []>} : vector<16x16xf32>, vector<16x168xf32>, vector<16x168xf32> -> vector<16x168xf32>
    %318 = arith.addf %313, %317 : vector<16x168xf32>
    %c5_196 = arith.constant 5 : index
    %c0_197 = arith.constant 0 : index
    %c0_198 = arith.constant 0 : index
    %319 = vector.load %arg16[%c5_196, %c0_197, %c0_198] : memref<9x16x16xf32, #tpu.memory_space<vmem>>, vector<1x16x16xf32>
    %320 = vector.shape_cast %319 : vector<1x16x16xf32> to vector<16x16xf32>
    %321 = vector.extract_strided_slice %292 {offsets = [0, 30], sizes = [16, 168], strides = [1, 1]} : vector<16x232xf32> to vector<16x168xf32>
    %cst_199 = arith.constant dense<0.000000e+00> : vector<16x168xf32>
    %322 = tpu.matmul %320, %321, %cst_199 {dimension_numbers = #tpu.dot_dimension_numbers<[1], [0], [0], [1], [0, 0, 1, 1], [], []>} : vector<16x16xf32>, vector<16x168xf32>, vector<16x168xf32> -> vector<16x168xf32>
    %323 = arith.addf %318, %322 : vector<16x168xf32>
    %c6_200 = arith.constant 6 : index
    %c0_201 = arith.constant 0 : index
    %c0_202 = arith.constant 0 : index
    %324 = vector.load %arg16[%c6_200, %c0_201, %c0_202] : memref<9x16x16xf32, #tpu.memory_space<vmem>>, vector<1x16x16xf32>
    %325 = vector.shape_cast %324 : vector<1x16x16xf32> to vector<16x16xf32>
    %326 = vector.extract_strided_slice %292 {offsets = [0, 56], sizes = [16, 168], strides = [1, 1]} : vector<16x232xf32> to vector<16x168xf32>
    %cst_203 = arith.constant dense<0.000000e+00> : vector<16x168xf32>
    %327 = tpu.matmul %325, %326, %cst_203 {dimension_numbers = #tpu.dot_dimension_numbers<[1], [0], [0], [1], [0, 0, 1, 1], [], []>} : vector<16x16xf32>, vector<16x168xf32>, vector<16x168xf32> -> vector<16x168xf32>
    %328 = arith.addf %323, %327 : vector<16x168xf32>
    %c7_204 = arith.constant 7 : index
    %c0_205 = arith.constant 0 : index
    %c0_206 = arith.constant 0 : index
    %329 = vector.load %arg16[%c7_204, %c0_205, %c0_206] : memref<9x16x16xf32, #tpu.memory_space<vmem>>, vector<1x16x16xf32>
    %330 = vector.shape_cast %329 : vector<1x16x16xf32> to vector<16x16xf32>
    %331 = vector.extract_strided_slice %292 {offsets = [0, 57], sizes = [16, 168], strides = [1, 1]} : vector<16x232xf32> to vector<16x168xf32>
    %cst_207 = arith.constant dense<0.000000e+00> : vector<16x168xf32>
    %332 = tpu.matmul %330, %331, %cst_207 {dimension_numbers = #tpu.dot_dimension_numbers<[1], [0], [0], [1], [0, 0, 1, 1], [], []>} : vector<16x16xf32>, vector<16x168xf32>, vector<16x168xf32> -> vector<16x168xf32>
    %333 = arith.addf %328, %332 : vector<16x168xf32>
    %c8_208 = arith.constant 8 : index
    %c0_209 = arith.constant 0 : index
    %c0_210 = arith.constant 0 : index
    %334 = vector.load %arg16[%c8_208, %c0_209, %c0_210] : memref<9x16x16xf32, #tpu.memory_space<vmem>>, vector<1x16x16xf32>
    %335 = vector.shape_cast %334 : vector<1x16x16xf32> to vector<16x16xf32>
    %336 = vector.extract_strided_slice %292 {offsets = [0, 58], sizes = [16, 168], strides = [1, 1]} : vector<16x232xf32> to vector<16x168xf32>
    %cst_211 = arith.constant dense<0.000000e+00> : vector<16x168xf32>
    %337 = tpu.matmul %335, %336, %cst_211 {dimension_numbers = #tpu.dot_dimension_numbers<[1], [0], [0], [1], [0, 0, 1, 1], [], []>} : vector<16x16xf32>, vector<16x168xf32>, vector<16x168xf32> -> vector<16x168xf32>
    %338 = arith.addf %333, %337 : vector<16x168xf32>
    %c0_212 = arith.constant 0 : index
    %c0_213 = arith.constant 0 : index
    %339 = vector.load %arg17[%c0_212, %c0_213] : memref<16x1xf32, #tpu.memory_space<vmem>>, vector<16x1xf32>
    %340 = vector.broadcast %339 : vector<16x1xf32> to vector<16x168xf32>
    %341 = arith.addf %338, %340 : vector<16x168xf32>
    %c0_214 = arith.constant 0 : index
    %c0_215 = arith.constant 0 : index
    %342 = vector.load %arg22[%c0_214, %c0_215] : memref<1x176xf32, #tpu.memory_space<vmem>>, vector<1x168xf32>
    %343 = vector.broadcast %342 : vector<1x168xf32> to vector<16x168xf32>
    %344 = arith.mulf %341, %343 : vector<16x168xf32>
    %c0_216 = arith.constant 0 : index
    %c0_217 = arith.constant 0 : index
    %345 = vector.load %arg18[%c0_216, %c0_217] : memref<10x16xf32, #tpu.memory_space<vmem>>, vector<10x16xf32>
    %cst_218 = arith.constant dense<0.000000e+00> : vector<10x168xf32>
    %346 = tpu.matmul %345, %344, %cst_218 {dimension_numbers = #tpu.dot_dimension_numbers<[1], [0], [0], [1], [0, 0, 1, 1], [], []>} : vector<10x16xf32>, vector<16x168xf32>, vector<10x168xf32> -> vector<10x168xf32>
    %cst_219 = arith.constant dense<0.000000e+00> : vector<10xf32>
    %347 = vector.multi_reduction <add>, %346, %cst_219 [1] : vector<10x168xf32> to vector<10xf32>
    %348 = vector.shape_cast %347 : vector<10xf32> to vector<10x1xf32>
    %cst_220 = arith.constant 0.027777778 : f32
    %349 = vector.broadcast %cst_220 : f32 to vector<10x1xf32>
    %350 = arith.mulf %348, %349 : vector<10x1xf32>
    %c0_221 = arith.constant 0 : index
    %c0_222 = arith.constant 0 : index
    %351 = vector.load %arg19[%c0_221, %c0_222] : memref<10x1xf32, #tpu.memory_space<vmem>>, vector<10x1xf32>
    %352 = arith.addf %350, %351 : vector<10x1xf32>
    %cst_223 = arith.constant dense<0xFF800000> : vector<1xf32>
    %353 = vector.multi_reduction <maximumf>, %352, %cst_223 [0] : vector<10x1xf32> to vector<1xf32>
    %354 = vector.shape_cast %353 : vector<1xf32> to vector<1x1xf32>
    %355 = vector.broadcast %354 : vector<1x1xf32> to vector<10x1xf32>
    %356 = arith.subf %352, %355 : vector<10x1xf32>
    %357 = math.exp %356 : vector<10x1xf32>
    %cst_224 = arith.constant dense<0.000000e+00> : vector<1xf32>
    %358 = vector.multi_reduction <add>, %357, %cst_224 [0] : vector<10x1xf32> to vector<1xf32>
    %359 = vector.shape_cast %358 : vector<1xf32> to vector<1x1xf32>
    %360 = math.log %359 : vector<1x1xf32>
    %361 = vector.broadcast %360 : vector<1x1xf32> to vector<10x1xf32>
    %362 = arith.subf %356, %361 : vector<10x1xf32>
    %c0_225 = arith.constant 0 : index
    %c0_226 = arith.constant 0 : index
    %c0_227 = arith.constant 0 : index
    %363 = vector.load %arg23[%c0_225, %c0_226, %c0_227] : memref<1x10x1xf32, #tpu.memory_space<vmem>>, vector<1x10x1xf32>
    %364 = vector.shape_cast %363 : vector<1x10x1xf32> to vector<10x1xf32>
    %365 = vector.shape_cast %362 : vector<10x1xf32> to vector<1x10x1xf32>
    tpu.vector_store %arg23[%c0_225, %c0_226, %c0_227], %365 {strides = array<i32>} : memref<1x10x1xf32, #tpu.memory_space<vmem>>, vector<1x10x1xf32>,
    return
  }
  func.func @transform_0(%arg0: i32) -> (i32, i32, i32) {
    %c0_i32 = arith.constant 0 : i32
    %c0_i32_0 = arith.constant 0 : i32
    %c0_i32_1 = arith.constant 0 : i32
    return %arg0, %c0_i32, %c0_i32_0 : i32, i32, i32
  }
  func.func @transform_1(%arg0: i32) -> (i32, i32) {
    %c0_i32 = arith.constant 0 : i32
    %c0_i32_0 = arith.constant 0 : i32
    %c0_i32_1 = arith.constant 0 : i32
    return %c0_i32, %c0_i32_0 : i32, i32
  }
  func.func @transform_2(%arg0: i32) -> (i32, i32) {
    %c0_i32 = arith.constant 0 : i32
    %c0_i32_0 = arith.constant 0 : i32
    %c0_i32_1 = arith.constant 0 : i32
    return %c0_i32, %c0_i32_0 : i32, i32
  }
  func.func @transform_3(%arg0: i32) -> (i32, i32, i32) {
    %c0_i32 = arith.constant 0 : i32
    %c0_i32_0 = arith.constant 0 : i32
    %c0_i32_1 = arith.constant 0 : i32
    %c0_i32_2 = arith.constant 0 : i32
    return %c0_i32, %c0_i32_0, %c0_i32_1 : i32, i32, i32
  }
  func.func @transform_4(%arg0: i32) -> (i32, i32) {
    %c0_i32 = arith.constant 0 : i32
    %c0_i32_0 = arith.constant 0 : i32
    %c0_i32_1 = arith.constant 0 : i32
    return %c0_i32, %c0_i32_0 : i32, i32
  }
  func.func @transform_5(%arg0: i32) -> (i32, i32) {
    %c0_i32 = arith.constant 0 : i32
    %c0_i32_0 = arith.constant 0 : i32
    %c0_i32_1 = arith.constant 0 : i32
    return %c0_i32, %c0_i32_0 : i32, i32
  }
  func.func @transform_6(%arg0: i32) -> (i32, i32) {
    %c0_i32 = arith.constant 0 : i32
    %c0_i32_0 = arith.constant 0 : i32
    %c0_i32_1 = arith.constant 0 : i32
    return %c0_i32, %c0_i32_0 : i32, i32
  }
  func.func @transform_7(%arg0: i32) -> (i32, i32, i32) {
    %c0_i32 = arith.constant 0 : i32
    %c0_i32_0 = arith.constant 0 : i32
    %c0_i32_1 = arith.constant 0 : i32
    %c0_i32_2 = arith.constant 0 : i32
    return %c0_i32, %c0_i32_0, %c0_i32_1 : i32, i32, i32
  }
  func.func @transform_8(%arg0: i32) -> (i32, i32) {
    %c0_i32 = arith.constant 0 : i32
    %c0_i32_0 = arith.constant 0 : i32
    %c0_i32_1 = arith.constant 0 : i32
    return %c0_i32, %c0_i32_0 : i32, i32
  }
  func.func @transform_9(%arg0: i32) -> (i32, i32, i32) {
    %c0_i32 = arith.constant 0 : i32
    %c0_i32_0 = arith.constant 0 : i32
    %c0_i32_1 = arith.constant 0 : i32
    %c0_i32_2 = arith.constant 0 : i32
    return %c0_i32, %c0_i32_0, %c0_i32_1 : i32, i32, i32
  }
  func.func @transform_10(%arg0: i32) -> (i32, i32) {
    %c0_i32 = arith.constant 0 : i32
    %c0_i32_0 = arith.constant 0 : i32
    %c0_i32_1 = arith.constant 0 : i32
    return %c0_i32, %c0_i32_0 : i32, i32
  }
  func.func @transform_11(%arg0: i32) -> (i32, i32) {
    %c0_i32 = arith.constant 0 : i32
    %c0_i32_0 = arith.constant 0 : i32
    %c0_i32_1 = arith.constant 0 : i32
    return %c0_i32, %c0_i32_0 : i32, i32
  }
  func.func @transform_12(%arg0: i32) -> (i32, i32) {
    %c0_i32 = arith.constant 0 : i32
    %c0_i32_0 = arith.constant 0 : i32
    %c0_i32_1 = arith.constant 0 : i32
    return %c0_i32, %c0_i32_0 : i32, i32
  }
  func.func @transform_13(%arg0: i32) -> (i32, i32, i32) {
    %c0_i32 = arith.constant 0 : i32
    %c0_i32_0 = arith.constant 0 : i32
    %c0_i32_1 = arith.constant 0 : i32
    %c0_i32_2 = arith.constant 0 : i32
    return %c0_i32, %c0_i32_0, %c0_i32_1 : i32, i32, i32
  }
  func.func @transform_14(%arg0: i32) -> (i32, i32) {
    %c0_i32 = arith.constant 0 : i32
    %c0_i32_0 = arith.constant 0 : i32
    %c0_i32_1 = arith.constant 0 : i32
    return %c0_i32, %c0_i32_0 : i32, i32
  }
  func.func @transform_15(%arg0: i32) -> (i32, i32, i32) {
    %c0_i32 = arith.constant 0 : i32
    %c0_i32_0 = arith.constant 0 : i32
    %c0_i32_1 = arith.constant 0 : i32
    %c0_i32_2 = arith.constant 0 : i32
    return %c0_i32, %c0_i32_0, %c0_i32_1 : i32, i32, i32
  }
  func.func @transform_16(%arg0: i32) -> (i32, i32) {
    %c0_i32 = arith.constant 0 : i32
    %c0_i32_0 = arith.constant 0 : i32
    %c0_i32_1 = arith.constant 0 : i32
    return %c0_i32, %c0_i32_0 : i32, i32
  }
  func.func @transform_17(%arg0: i32) -> (i32, i32) {
    %c0_i32 = arith.constant 0 : i32
    %c0_i32_0 = arith.constant 0 : i32
    %c0_i32_1 = arith.constant 0 : i32
    return %c0_i32, %c0_i32_0 : i32, i32
  }
  func.func @transform_18(%arg0: i32) -> (i32, i32) {
    %c0_i32 = arith.constant 0 : i32
    %c0_i32_0 = arith.constant 0 : i32
    %c0_i32_1 = arith.constant 0 : i32
    return %c0_i32, %c0_i32_0 : i32, i32
  }
  func.func @transform_19(%arg0: i32) -> (i32, i32) {
    %c0_i32 = arith.constant 0 : i32
    %c0_i32_0 = arith.constant 0 : i32
    %c0_i32_1 = arith.constant 0 : i32
    return %c0_i32, %c0_i32_0 : i32, i32
  }
  func.func @transform_20(%arg0: i32) -> (i32, i32) {
    %c0_i32 = arith.constant 0 : i32
    %c0_i32_0 = arith.constant 0 : i32
    %c0_i32_1 = arith.constant 0 : i32
    return %c0_i32, %c0_i32_0 : i32, i32
  }
  func.func @transform_21(%arg0: i32) -> (i32, i32) {
    %c0_i32 = arith.constant 0 : i32
    %c0_i32_0 = arith.constant 0 : i32
    %c0_i32_1 = arith.constant 0 : i32
    return %c0_i32, %c0_i32_0 : i32, i32
  }
  func.func @transform_22(%arg0: i32) -> (i32, i32, i32) {
    %c0_i32 = arith.constant 0 : i32
    %c0_i32_0 = arith.constant 0 : i32
    %c0_i32_1 = arith.constant 0 : i32
    return %arg0, %c0_i32, %c0_i32_0 : i32, i32, i32
  }
}

</mosaic_0001>

<bundles_post_ra>
// kernel: net5_forward.1
= control target key start
LH: loop header
LB: loop body
LE: loop exit
PB: predicated region body
PF: predicated region fallthrough
CT: control target
= control target key end

     0   :  { %s15728_s0 = inlined_call_operand.vmem [shape: f32[2,1,800], index: 0, kind: input, shape index: {}]   ;;  %s15729_s1 = inlined_call_operand.vmem [shape: f32[16,9], index: 1, kind: input, shape index: {}]   ;;  %s15730_s2 = inlined_call_operand.vmem [shape: f32[16,1], index: 2, kind: input, shape index: {}]   ;;  %s15731_s3 = inlined_call_operand.vmem [shape: f32[9,10,16], index: 3, kind: input, shape index: {}]   ;;  %s15732_s4 = inlined_call_operand.vmem [shape: f32[10,1], index: 4, kind: input, shape index: {}]   ;;  %s15733_s5 = inlined_call_operand.vmem [shape: f32[10,1], index: 5, kind: input, shape index: {}]   ;;  %s15734_s6 = inlined_call_operand.vmem [shape: f32[10,1], index: 6, kind: input, shape index: {}]   ;;  %s15735_s7 = inlined_call_operand.vmem [shape: f32[9,10,10], index: 7, kind: input, shape index: {}]   ;;  %s15736_s8 = inlined_call_operand.vmem [shape: f32[10,1], index: 8, kind: input, shape index: {}]   ;;  %s15737_s9 = inlined_call_operand.vmem [shape: f32[9,16,10], index: 9, kind: input, shape index: {}]   ;;  %s15738_s10 = inlined_call_operand.vmem [shape: f32[16,1], index: 10, kind: input, shape index: {}]   ;;  %s15739_s11 = inlined_call_operand.vmem [shape: f32[16,1], index: 11, kind: input, shape index: {}]   ;;  %s15740_s12 = inlined_call_operand.vmem [shape: f32[16,1], index: 12, kind: input, shape index: {}]   ;;  %s15741_s13 = inlined_call_operand.vmem [shape: f32[9,16,16], index: 13, kind: input, shape index: {}]   ;;  %s15742_s14 = inlined_call_operand.vmem [shape: f32[16,1], index: 14, kind: input, shape index: {}]   ;;  %s15743_s15 = inlined_call_operand.vmem [shape: f32[9,16,16], index: 15, kind: input, shape index: {}]   ;;  %s15744_s16 = inlined_call_operand.vmem [shape: f32[16,1], index: 16, kind: input, shape index: {}]   ;;  %s15745_s17 = inlined_call_operand.vmem [shape: f32[10,16], index: 17, kind: input, shape index: {}]   ;;  %s15746_s18 = inlined_call_operand.vmem [shape: f32[10,1], index: 18, kind: input, shape index: {}]   ;;  %s15747_s19 = inlined_call_operand.vmem [shape: f32[640,368], index: 19, kind: input, shape index: {}]   ;;  %s15748_s20 = inlined_call_operand.vmem [shape: f32[176,232], index: 20, kind: input, shape index: {}]   ;;  %s15749_s21 = inlined_call_operand.vmem [shape: f32[1,176], index: 21, kind: input, shape index: {}]   ;;  %s15750_s22 = inlined_call_operand.vmem [shape: f32[2,10,1], index: 22, kind: output, shape index: {}]  }
   0x1   :  { %15816 = sst [smem:[#allocation31_spill]] %s15728_s0 }
   0x2   :  { %15817 = sst [smem:[#allocation32_spill]] %s15729_s1 }
   0x3   :  { %15818 = sst [smem:[#allocation33_spill]] %s15730_s2 }
   0x4   :  { %15819 = sst [smem:[#allocation34_spill]] %s15731_s3  ;;  %s12313_s3 = smov 0  }
   0x5   :  { %15820 = sst [smem:[#allocation35_spill]] %s15732_s4 }
   0x6   :  { %15821 = sst [smem:[#allocation36_spill]] %s15733_s5 }
   0x7   :  { %15822 = sst [smem:[#allocation37_spill]] %s15734_s6 }
   0x8   :  { %15823 = sst [smem:[#allocation38_spill]] %s15735_s7 }
   0x9   :  { %15824 = sst [smem:[#allocation39_spill]] %s15736_s8 }
   0xa   :  { %15825 = sst [smem:[#allocation40_spill]] %s15737_s9 }
   0xb   :  { %15826 = sst [smem:[#allocation41_spill]] %s15750_s22 }
   0xc LB: > { %15827 = sst [smem:[#allocation2_spill]] %s12177_s3  ;;  %s10038_s28 = sadd.s32 4294967295, %s12177_s3   ;;  %s12177_s3 = sphi %s12313_s3, %s32_s3  }
   0xd   : > { %p10042_p0 = scmp.ge.s32.totalorder %s12177_s3, 1  ;;  %p611_p1 = scmp.lt.s32.totalorder %s12177_s3, 3 }
   0xf   : > { %p612_p2 = pnand %p10042_p0, %p611_p1 }
  0x11   : > { %615 = sbr.rel (%p612_p2) target bundleno = 3789 (0xecd), region = 108 }
  0x18   : > { %s15828_s4 = sld [smem:[#allocation32_spill]]  ;;  %v12179_v1 = vmov 1   ;;  %v12180_v2 = vmov 2   ;;  %p672_p3 = scmp.lt.s32.totalorder %s10038_s28, 1  ;;  %v695_v3 = vlaneseq  ;;  %v12181_v9 = vmov 3  }
  0x19   : > { %11471 = vset.pattern.permute.xlu0 %v12179_v1  ;;  %11472 = vset.pattern.permute.xlu1 %v12180_v2  ;;  %s15831_s6 = sld [smem:[#allocation31_spill]]  ;;  %v12182_v12 = vmov 4   ;;  %v12183_v13 = vmov 5   ;;  %v12184_v14 = vmov 6   ;;  %v12185_v15 = vmov 7   ;;  %s15832_s27 = sld [smem:[#allocation33_spill]] }
  0x1a   : > { %s15915_s28 = smov (!%p672_p3, %s10038_s28), 1  ;;  %v12329_v5 = vshrl.u32 %v695_v3, 7  ;;  %v12186_v16 = vmov 0   ;;  %v12187_v18 = vmov 8   ;;  %s15793_s0 = smov 127   ;;  %vm805_vm0 = vcmask 1039360  }
  0x1b   : > { %15829 = sst [smem:[#allocation3_spill]] %s15915_s28  ;;  %s11443_s1 = smul.u32 7, %s15915_s28  ;;  %vm896_vm1 = vcmask 1031168   ;;  %vm987_vm2 = vcmask 818176   ;;  %vm1078_vm3 = vcmask 809984   ;;  %vm1169_vm4 = vcmask 801792  }
  0x1c   : > { %15830 = vst [vmem:[#allocation4_spill] sm:$0xff] %v12329_v5  ;;  %v705_v6 = vsub.s32 2, %v12329_v5  ;;  %v709_v7 = vsub.s32 3, %v12329_v5  ;;  %v717_v20 = vsub.s32 5, %v12329_v5  ;;  %v713_v21 = vsub.s32 4, %v12329_v5  ;;  %s15789_s23 = smov 126  }
  0x1d   : > { %s15795_s5 = smov 99   ;;  %s15806_s24 = smov 98   ;;  %v1214_v55 = vsub.s32 6, %v12329_v5  ;;  %vm1273_vm5 = vcmask 588800   ;;  %vm1374_vm6 = vcmask 580608   ;;  %vm1475_vm7 = vcmask 572416  }
  0x1e   : > { %v682_v0 = vld [vmem:[%s15828_s4] sm:$0xff]  ;;  %v683_v4 = vld [vmem:[%s15828_s4 + $0x8] sm:$0xff]  ;;  %s15787_s26 = smov 70   ;;  %s15882_s30 = sld [smem:[#allocation34_spill]]  ;;  %vm1611_vm8 = vcmask 130048   ;;  %vm5106_vm9 = vcmask 80896  }
  0x1f   : > { %750 = vperm.xlu0 %11471, %v682_v0   ;;  %841 = vperm.xlu1 %11472, %v682_v0   ;;  %s675_s25 = scalar_lea.vmem %s15831_s6, %s11443_s1  ;;  %v1513_v17 = vld [vmem:[%s15832_s27 + $0x8] sm:$0xff]  ;;  %v1512_v19 = vld [vmem:[%s15832_s27] sm:$0xff]  ;;  %s15791_s1 = smov 100   ;;  %vm5113_vm10 = vcmask 1041408   ;;  %vm12197_vm11 = vmmov 1   ;;  %vm8828_vm13 = vcmask 392192  }
  0x20   : > { %v12337_v8 = vld [vmem:[%s675_s25] sm:$0x7f]  ;;  %s15804_s6 = smov 72   ;;  %s15802_s25 = smov 71   ;;  %vm14835_vm12 = vmpackc.low %vm5113_vm10, %vm12197_vm11  ;;  %vm9934_vm14 = vcmask 326656   ;;  %vm9940_vm15 = vcmask 320512  }
  0x21   : > { %v12340_v10 = vrot.slane %v12337_v8, %v705_v6  ;;  %v12343_v11 = vrot.slane %v12337_v8, %v709_v7  ;;  %v12354_v22 = vrot.slane %v12337_v8, %v717_v20  ;;  %v12357_v23 = vrot.slane %v12337_v8, %v713_v21  ;;  %s15896_s3 = smov 100   ;;  %s15897_s29 = sld [smem:[#allocation36_spill]] }
  0x22   : > { %v1215_v59 = vrot.slane %v12337_v8, %v1214_v55  ;;  %s15899_s7 = sld [smem:[#allocation38_spill]]  ;;  %s15901_s2 = smov 98  }
  0x23   : > { %754 = vperm.xlu0 %11471, %v683_v4   ;;  %845 = vperm.xlu1 %11472, %v683_v4   ;;  %s15904_s8 = sld [smem:[#allocation39_spill]]  ;;  %s15907_s9 = sld [smem:[#allocation40_spill]] }
  0x27   : > { %11473 = vset.pattern.permute.xlu0 %v12181_v9  ;;  %11474 = vset.pattern.permute.xlu1 %v12181_v9 }
  0x28   : > { %932 = vperm.xlu0 %11473, %v682_v0   ;;  %936 = vperm.xlu1 %11474, %v683_v4  }
  0x2c   : > { %11475 = vset.pattern.permute.xlu1 %v12182_v12  ;;  %11476 = vset.pattern.permute.xlu0 %v12182_v12 }
  0x2d   : > { %1023 = vperm.xlu1 %11475, %v682_v0   ;;  %1027 = vperm.xlu0 %11476, %v683_v4  }
  0x31   : > { %11477 = vset.pattern.permute.xlu1 %v12183_v13  ;;  %11478 = vset.pattern.permute.xlu0 %v12184_v14 }
  0x32   : > { %1114 = vperm.xlu1 %11477, %v682_v0   ;;  %1205 = vperm.xlu0 %11478, %v682_v0  }
  0x36   : > { %1118 = vperm.xlu1 %11477, %v683_v4   ;;  %11481 = vset.pattern.permute.xlu0 %v12185_v15 }
  0x37   : > { %1315 = vperm.xlu0 %11481, %v683_v4  }
  0x3a   : > { %11479 = vset.pattern.permute.xlu1 %v12184_v14 }
  0x3b   : > { %1209 = vperm.xlu1 %11479, %v683_v4   ;;  %11483 = vset.pattern.permute.xlu0 %v12186_v16 }
  0x3c   : > { %686 = vperm.xlu0 %11483, %v682_v0  }
  0x3f   : > { %11480 = vset.pattern.permute.xlu1 %v12185_v15 }
  0x40   : > { %1311 = vperm.xlu1 %11480, %v682_v0   ;;  %1521 = vperm.xlu0 %11483, %v1513_v17  }
  0x44   : > { %11482 = vset.pattern.permute.xlu1 %v12187_v18  ;;  %v15758_v18 = vsub.s32 1, %v12329_v5 }
  0x45   : > { %1412 = vperm.xlu1 %11482, %v682_v0  }
  0x46   : > { %v12503_v21 = vrot.slane %v12337_v8, %v15758_v18 }
  0x49   : > { %1416 = vperm.xlu1 %11482, %v683_v4  }
  0x4d   : > { %11484 = vset.pattern.permute.xlu1 %v12186_v16 }
  0x4e   : > { %691 = vperm.xlu1 %11484, %v683_v4  }
  0x52   : > { %1516 = vperm.xlu1 %11484, %v1512_v19  }
  0x9e   : > { %v12359_v24 = vpop.permute.xlu0 %750  ;;  %v12367_v27 = vpop.permute.xlu1 %841 }
  0x9f   : > { %v762_v25 = vmul.f32 %v12359_v24, %v12354_v22  ;;  %v761_v26 = vmul.f32 %v12359_v24, %v12357_v23  ;;  %v853_v31 = vmul.f32 %v12367_v27, %v12354_v22  ;;  %v852_v32 = vmul.f32 %v12367_v27, %v12357_v23 }
  0xa1   : > { %791 = vrot.lane.b32.xlu0 %v762_v25, %s15793_s0  ;;  %789 = vrot.lane.b32.xlu1 %v761_v26, %s15793_s0  ;;  %v759_v25 = vmul.f32 %v12359_v24, %v12340_v10  ;;  %v758_v26 = vmul.f32 %v12359_v24, %v12503_v21 }
  0xa2   : > { %v12369_v28 = vpop.permute.xlu0 %754  ;;  %v12381_v33 = vpop.permute.xlu1 %845 }
  0xa3   : > { %v768_v29 = vmul.f32 %v12369_v28, %v12354_v22  ;;  %v767_v30 = vmul.f32 %v12369_v28, %v12357_v23  ;;  %v859_v35 = vmul.f32 %v12381_v33, %v12354_v22  ;;  %v858_v36 = vmul.f32 %v12381_v33, %v12357_v23 }
  0xa5   : > { %803 = vrot.lane.b32.xlu0 %v768_v29, %s15793_s0  ;;  %801 = vrot.lane.b32.xlu1 %v767_v30, %s15793_s0  ;;  %v764_v29 = vmul.f32 %v12369_v28, %v12503_v21  ;;  %v760_v30 = vmul.f32 %v12359_v24, %v12343_v11 }
  0xa7   : > { %v12385_v34 = vpop.permute.xlu0 %932  ;;  %v12391_v37 = vpop.permute.xlu1 %936 }
  0xa8   : > { %v944_v38 = vmul.f32 %v12385_v34, %v12354_v22  ;;  %v943_v39 = vmul.f32 %v12385_v34, %v12357_v23  ;;  %v950_v40 = vmul.f32 %v12391_v37, %v12354_v22  ;;  %v949_v41 = vmul.f32 %v12391_v37, %v12357_v23 }
  0xa9   : > { %882 = vrot.lane.b32.xlu0 %v853_v31, %s15789_s23  ;;  %880 = vrot.lane.b32.xlu1 %v852_v32, %s15789_s23  ;;  %v15757_v31 = vsub.s32 0, %v12329_v5  ;;  %v766_v32 = vmul.f32 %v12369_v28, %v12343_v11  ;;  %v942_v55 = vmul.f32 %v12385_v34, %v12343_v11 }
  0xac   : > { %v12405_v42 = vpop.permute.xlu1 %1023  ;;  %v12413_v45 = vpop.permute.xlu0 %1027 }
  0xad   : > { %894 = vrot.lane.b32.xlu0 %v859_v35, %s15789_s23  ;;  %892 = vrot.lane.b32.xlu1 %v858_v36, %s15789_s23  ;;  %v1035_v43 = vmul.f32 %v12405_v42, %v12354_v22  ;;  %v1034_v44 = vmul.f32 %v12405_v42, %v12357_v23  ;;  %v1041_v46 = vmul.f32 %v12413_v45, %v12354_v22 }
  0xae   : > { %v1040_v47 = vmul.f32 %v12413_v45, %v12357_v23  ;;  %v765_v35 = vmul.f32 %v12369_v28, %v12340_v10  ;;  %v12527_v36 = vrot.slane %v12337_v8, %v15757_v31  ;;  %v849_v8 = vmul.f32 %v12367_v27, %v12503_v21 }
  0xb1   : > { %973 = vrot.lane.b32.xlu0 %v944_v38, %s15791_s1  ;;  %971 = vrot.lane.b32.xlu1 %v943_v39, %s15791_s1  ;;  %v12421_v48 = vpop.permute.xlu1 %1114  ;;  %v12433_v52 = vpop.permute.xlu0 %1205  ;;  %v763_v38 = vmul.f32 %v12369_v28, %v12527_v36  ;;  %v757_v39 = vmul.f32 %v12359_v24, %v12527_v36  ;;  %v855_v28 = vmul.f32 %v12381_v33, %v12503_v21 }
  0xb2   : > { %v1126_v49 = vmul.f32 %v12421_v48, %v12354_v22  ;;  %v1125_v50 = vmul.f32 %v12421_v48, %v12357_v23  ;;  %v1222_v56 = vmul.f32 %v12433_v52, %v12354_v22  ;;  %v1221_v57 = vmul.f32 %v12433_v52, %v12357_v23 }
  0xb3   : > { %v1223_v61 = vmul.f32 %v1215_v59, %v12433_v52  ;;  %v851_v24 = vmul.f32 %v12367_v27, %v12343_v11 }
  0xb5   : > { %985 = vrot.lane.b32.xlu0 %v950_v40, %s15791_s1  ;;  %983 = vrot.lane.b32.xlu1 %v949_v41, %s15791_s1  ;;  %v12429_v51 = vpop.permute.xlu1 %1118  ;;  %v850_v40 = vmul.f32 %v12367_v27, %v12340_v10  ;;  %v857_v41 = vmul.f32 %v12381_v33, %v12343_v11 }
  0xb6   : > { %v1132_v53 = vmul.f32 %v12429_v51, %v12354_v22  ;;  %v1131_v54 = vmul.f32 %v12429_v51, %v12357_v23  ;;  %v12467_v3 = vpop.permute.xlu0 %1315 }
  0xb7   : > { %v1329_v4 = vmul.f32 %v12467_v3, %v12357_v23  ;;  %v1331_v9 = vmul.f32 %v12467_v3, %v1215_v59  ;;  %v1330_v12 = vmul.f32 %v12467_v3, %v12354_v22 }
  0xb9   : > { %1064 = vrot.lane.b32.xlu0 %v1035_v43, %s15795_s5  ;;  %1062 = vrot.lane.b32.xlu1 %v1034_v44, %s15795_s5  ;;  %v856_v43 = vmul.f32 %v12381_v33, %v12340_v10  ;;  %v854_v44 = vmul.f32 %v12381_v33, %v12527_v36 }
  0xba   : > { %v12446_v58 = vpop.permute.xlu1 %1209 }
  0xbb   : > { %v1228_v60 = vmul.f32 %v12446_v58, %v12357_v23  ;;  %v1230_v63 = vmul.f32 %v1215_v59, %v12446_v58  ;;  %v1229_v0 = vmul.f32 %v12446_v58, %v12354_v22 }
  0xbd   : > { %1076 = vrot.lane.b32.xlu0 %v1041_v46, %s15795_s5  ;;  %1074 = vrot.lane.b32.xlu1 %v1040_v47, %s15795_s5  ;;  %v848_v46 = vmul.f32 %v12367_v27, %v12527_v36 }
  0xbf   : > { %v12456_v62 = vpop.permute.xlu1 %1311 }
  0xc0   : > { %v1323_v1 = vmul.f32 %v12456_v62, %v12354_v22  ;;  %v1322_v2 = vmul.f32 %v12456_v62, %v12357_v23  ;;  %v1324_v6 = vmul.f32 %v12456_v62, %v1215_v59 }
  0xc1   : > { %1155 = vrot.lane.b32.xlu0 %v1126_v49, %s15806_s24  ;;  %1153 = vrot.lane.b32.xlu1 %v1125_v50, %s15806_s24  ;;  %v12561_v49 = vpop.permute.xlu0 %686  ;;  %v941_v50 = vmul.f32 %v12385_v34, %v12340_v10 }
  0xc4   : > { %v12476_v7 = vpop.permute.xlu1 %1412 }
  0xc5   : > { %1167 = vrot.lane.b32.xlu0 %v1132_v53, %s15806_s24  ;;  %1165 = vrot.lane.b32.xlu1 %v1131_v54, %s15806_s24  ;;  %v1424_v13 = vmul.f32 %v12476_v7, %v12354_v22  ;;  %v1423_v14 = vmul.f32 %v12476_v7, %v12357_v23  ;;  %v1425_v17 = vmul.f32 %v12476_v7, %v1215_v59  ;;  %v12573_v27 = vpop.permute.xlu0 %1521 }
  0xc6   : > { %v940_v53 = vmul.f32 %v12385_v34, %v12503_v21  ;;  %15834 = vst [vmem:[#allocation6_spill] sm:$0xff] %v12573_v27  ;;  %v946_v54 = vmul.f32 %v12391_v37, %v12503_v21 }
  0xc8   : > { %v12487_v15 = vpop.permute.xlu1 %1416 }
  0xc9   : > { %1255 = vrot.lane.b32.xlu0 %v1222_v56, %s15804_s6  ;;  %1253 = vrot.lane.b32.xlu1 %v1221_v57, %s15804_s6  ;;  %v1430_v16 = vmul.f32 %v12487_v15, %v12357_v23  ;;  %v1432_v19 = vmul.f32 %v12487_v15, %v1215_v59  ;;  %v1431_v20 = vmul.f32 %v12487_v15, %v12354_v22 }
  0xca   : > { %v948_v59 = vmul.f32 %v12391_v37, %v12343_v11 }
  0xcd   : > { %1267 = vrot.lane.b32.xlu0 %v1228_v60, %s15804_s6  ;;  %1257 = vrot.lane.b32.xlu1 %v1223_v61, %s15804_s6  ;;  %v12559_v47 = vpop.permute.xlu1 %691  ;;  %v947_v60 = vmul.f32 %v12391_v37, %v12340_v10 }
  0xd1   : > { %1271 = vrot.lane.b32.xlu0 %v1230_v63, %s15804_s6  ;;  %1269 = vrot.lane.b32.xlu1 %v1229_v0, %s15804_s6  ;;  %v12571_v33 = vpop.permute.xlu1 %1516  ;;  %v945_v0 = vmul.f32 %v12391_v37, %v12527_v36 }
  0xd2   : > { %15833 = vst [vmem:[#allocation5_spill] sm:$0xff] %v12571_v33 }
  0xd5   : > { %1356 = vrot.lane.b32.xlu0 %v1323_v1, %s15802_s25  ;;  %1354 = vrot.lane.b32.xlu1 %v1322_v2, %s15802_s25  ;;  %v939_v1 = vmul.f32 %v12385_v34, %v12527_v36 }
  0xd9   : > { %1368 = vrot.lane.b32.xlu0 %v1329_v4, %s15802_s25  ;;  %1358 = vrot.lane.b32.xlu1 %v1324_v6, %s15802_s25  ;;  %v1032_v6 = vmul.f32 %v12405_v42, %v12340_v10 }
  0xdd   : > { %1372 = vrot.lane.b32.xlu0 %v1331_v9, %s15802_s25  ;;  %1370 = vrot.lane.b32.xlu1 %v1330_v12, %s15802_s25  ;;  %v1031_v9 = vmul.f32 %v12405_v42, %v12503_v21  ;;  %v1037_v12 = vmul.f32 %v12413_v45, %v12503_v21 }
  0xe1   : > { %1457 = vrot.lane.b32.xlu0 %v1424_v13, %s15787_s26  ;;  %1455 = vrot.lane.b32.xlu1 %v1423_v14, %s15787_s26  ;;  %v1033_v13 = vmul.f32 %v12405_v42, %v12343_v11 }
  0xe5   : > { %1469 = vrot.lane.b32.xlu0 %v1430_v16, %s15787_s26  ;;  %1459 = vrot.lane.b32.xlu1 %v1425_v17, %s15787_s26  ;;  %v1039_v17 = vmul.f32 %v12413_v45, %v12343_v11 }
  0xe9   : > { %1473 = vrot.lane.b32.xlu0 %v1432_v19, %s15787_s26  ;;  %1471 = vrot.lane.b32.xlu1 %v1431_v20, %s15787_s26  ;;  %v1038_v19 = vmul.f32 %v12413_v45, %v12340_v10 }
  0xed   : > { %785 = vrot.lane.b32.xlu0 %v759_v25, %s15793_s0  ;;  %783 = vrot.lane.b32.xlu1 %v758_v26, %s15793_s0  ;;  %v1036_v26 = vmul.f32 %v12413_v45, %v12527_v36 }
  0xf1   : > { %795 = vrot.lane.b32.xlu0 %v764_v29, %s15793_s0  ;;  %787 = vrot.lane.b32.xlu1 %v760_v30, %s15793_s0  ;;  %v1030_v29 = vmul.f32 %v12405_v42, %v12527_v36 }
  0xf5   : > { %799 = vrot.lane.b32.xlu0 %v766_v32, %s15793_s0  ;;  %797 = vrot.lane.b32.xlu1 %v765_v35, %s15793_s0  ;;  %v1123_v35 = vmul.f32 %v12421_v48, %v12340_v10 }
  0xf9   : > { %793 = vrot.lane.b32.xlu0 %v763_v38, %s15793_s0  ;;  %781 = vrot.lane.b32.xlu1 %v757_v39, %s15793_s0  ;;  %v1122_v38 = vmul.f32 %v12421_v48, %v12503_v21  ;;  %v1128_v39 = vmul.f32 %v12429_v51, %v12503_v21 }
  0xfd   : > { %876 = vrot.lane.b32.xlu0 %v850_v40, %s15789_s23  ;;  %874 = vrot.lane.b32.xlu1 %v849_v8, %s15789_s23  ;;  %v1124_v40 = vmul.f32 %v12421_v48, %v12343_v11 }
 0x101   : > { %886 = vrot.lane.b32.xlu0 %v855_v28, %s15789_s23  ;;  %878 = vrot.lane.b32.xlu1 %v851_v24, %s15789_s23  ;;  %v1130_v24 = vmul.f32 %v12429_v51, %v12343_v11 }
 0x105   : > { %890 = vrot.lane.b32.xlu0 %v857_v41, %s15789_s23  ;;  %888 = vrot.lane.b32.xlu1 %v856_v43, %s15789_s23  ;;  %v1129_v41 = vmul.f32 %v12429_v51, %v12340_v10 }
 0x109   : > { %884 = vrot.lane.b32.xlu0 %v854_v44, %s15789_s23  ;;  %872 = vrot.lane.b32.xlu1 %v848_v46, %s15789_s23  ;;  %v1127_v46 = vmul.f32 %v12429_v51, %v12527_v36 }
 0x10d   : > { %967 = vrot.lane.b32.xlu0 %v941_v50, %s15791_s1  ;;  %965 = vrot.lane.b32.xlu1 %v940_v53, %s15791_s1  ;;  %v1121_v50 = vmul.f32 %v12421_v48, %v12527_v36 }
 0x111   : > { %977 = vrot.lane.b32.xlu0 %v946_v54, %s15791_s1  ;;  %969 = vrot.lane.b32.xlu1 %v942_v55, %s15791_s1  ;;  %v1219_v55 = vmul.f32 %v12433_v52, %v12340_v10 }
 0x113   : > { %v12581_v56 = vpop.permute.xlu0 %791  ;;  %v12583_v57 = vpop.permute.xlu1 %789 }
 0x115   : > { %981 = vrot.lane.b32.xlu0 %v948_v59, %s15791_s1  ;;  %979 = vrot.lane.b32.xlu1 %v947_v60, %s15791_s1  ;;  %v1218_v59 = vmul.f32 %v12433_v52, %v12503_v21  ;;  %v1225_v60 = vmul.f32 %v12446_v58, %v12503_v21 }
 0x117   : > { %v12591_v61 = vpop.permute.xlu0 %803  ;;  %v12593_v63 = vpop.permute.xlu1 %801 }
 0x119   : > { %975 = vrot.lane.b32.xlu0 %v945_v0, %s15791_s1  ;;  %963 = vrot.lane.b32.xlu1 %v939_v1, %s15791_s1  ;;  %v1220_v0 = vmul.f32 %v12433_v52, %v12343_v11 }
 0x11b   : > { %v12601_v2 = vpop.permute.xlu0 %882  ;;  %v12603_v4 = vpop.permute.xlu1 %880 }
 0x11d   : > { %1058 = vrot.lane.b32.xlu0 %v1032_v6, %s15795_s5  ;;  %1056 = vrot.lane.b32.xlu1 %v1031_v9, %s15795_s5  ;;  %v1227_v9 = vmul.f32 %v12446_v58, %v12343_v11 }
 0x11f   : > { %v12611_v37 = vpop.permute.xlu0 %894  ;;  %v12613_v34 = vpop.permute.xlu1 %892 }
 0x121   : > { %1068 = vrot.lane.b32.xlu0 %v1037_v12, %s15795_s5  ;;  %1060 = vrot.lane.b32.xlu1 %v1033_v13, %s15795_s5  ;;  %v1226_v12 = vmul.f32 %v12446_v58, %v12340_v10  ;;  %v810_v13 = vsel %vm805_vm0, %v12583_v57, %v12581_v56 }
 0x123   : > { %v12621_v14 = vpop.permute.xlu0 %973  ;;  %v12623_v16 = vpop.permute.xlu1 %971 }
 0x125   : > { %1072 = vrot.lane.b32.xlu0 %v1039_v17, %s15795_s5  ;;  %1070 = vrot.lane.b32.xlu1 %v1038_v19, %s15795_s5  ;;  %v729_v17 = vmul.f32 %v12357_v23, %v12561_v49  ;;  %v901_v19 = vsel %vm896_vm1, %v12603_v4, %v12601_v2 }
 0x127   : > { %v12631_v20 = vpop.permute.xlu0 %985  ;;  %v12633_v25 = vpop.permute.xlu1 %983 }
 0x129   : > { %1066 = vrot.lane.b32.xlu0 %v1036_v26, %s15795_s5  ;;  %1054 = vrot.lane.b32.xlu1 %v1030_v29, %s15795_s5  ;;  %v832_v26 = vadd.f32 %v810_v13, %v729_v17  ;;  %v906_v17 = vsel %vm896_vm1, %v12613_v34, %v12611_v37 }
 0x12b   : > { %v12641_v30 = vpop.permute.xlu0 %1064  ;;  %v12643_v32 = vpop.permute.xlu1 %1062 }
 0x12d   : > { %1149 = vrot.lane.b32.xlu0 %v1123_v35, %s15806_s24  ;;  %1147 = vrot.lane.b32.xlu1 %v1122_v38, %s15806_s24  ;;  %v1224_v38 = vmul.f32 %v12446_v58, %v12527_v36  ;;  %v1083_v58 = vsel %vm1078_vm3, %v12643_v32, %v12641_v30 }
 0x12f   : > { %v12651_v45 = vpop.permute.xlu0 %1076  ;;  %v12653_v42 = vpop.permute.xlu1 %1074 }
 0x131   : > { %1159 = vrot.lane.b32.xlu0 %v1128_v39, %s15806_s24  ;;  %1151 = vrot.lane.b32.xlu1 %v1124_v40, %s15806_s24  ;;  %v1217_v39 = vmul.f32 %v12433_v52, %v12527_v36  ;;  %v992_v40 = vsel %vm987_vm2, %v12623_v16, %v12621_v14  ;;  %v1320_v52 = vmul.f32 %v12456_v62, %v12340_v10 }
 0x133   : > { %v12661_v8 = vpop.permute.xlu0 %1155  ;;  %v12663_v28 = vpop.permute.xlu1 %1153 }
 0x134   : > { %15835 = vst [vmem:[#allocation7_spill] sm:$0xff] %v12663_v28 }
 0x135   : > { %1163 = vrot.lane.b32.xlu0 %v1130_v24, %s15806_s24  ;;  %1161 = vrot.lane.b32.xlu1 %v1129_v41, %s15806_s24  ;;  %v730_v24 = vmul.f32 %v12354_v22, %v12561_v49  ;;  %v923_v41 = vadd.f32 %v901_v19, %v832_v26 }
 0x137   : > { %v12671_v43 = vpop.permute.xlu0 %1167  ;;  %v12673_v44 = vpop.permute.xlu1 %1165 }
 0x138   : > { %15836 = vst [vmem:[#allocation8_spill] sm:$0xff] %v12673_v44 }
 0x139   : > { %1157 = vrot.lane.b32.xlu0 %v1127_v46, %s15806_s24  ;;  %1145 = vrot.lane.b32.xlu1 %v1121_v50, %s15806_s24  ;;  %v833_v46 = vadd.f32 %v12581_v56, %v730_v24  ;;  %v815_v50 = vsel %vm805_vm0, %v12593_v63, %v12591_v61  ;;  %v1174_v56 = vsel %vm1169_vm4, %v12663_v28, %v12661_v8 }
 0x13b   : > { %v12681_v53 = vpop.permute.xlu0 %1255  ;;  %v12683_v54 = vpop.permute.xlu1 %1253  ;;  %v924_v13 = vadd.f32 %v12601_v2, %v833_v46  ;;  %v1326_v2 = vmul.f32 %v12467_v3, %v12503_v21 }
 0x13c   : > { %15837 = vst [vmem:[#allocation9_spill] sm:$0xff] %v12683_v54 }
 0x13d   : > { %1249 = vrot.lane.b32.xlu0 %v1219_v55, %s15804_s6  ;;  %1247 = vrot.lane.b32.xlu1 %v1218_v59, %s15804_s6  ;;  %v1014_v55 = vadd.f32 %v992_v40, %v923_v41 }
 0x13f   : > { %v12691_v51 = vpop.permute.xlu0 %1267  ;;  %v12693_v48 = vpop.permute.xlu1 %1257  ;;  %v1105_v19 = vadd.f32 %v1083_v58, %v1014_v55 }
 0x140   : > { %15838 = vst [vmem:[#allocation10_spill] sm:$0xff] %v12691_v51 }
 0x141   : > { %1261 = vrot.lane.b32.xlu0 %v1225_v60, %s15804_s6  ;;  %1251 = vrot.lane.b32.xlu1 %v1220_v0, %s15804_s6  ;;  %v1319_v0 = vmul.f32 %v12456_v62, %v12503_v21  ;;  %v1196_v40 = vadd.f32 %v1174_v56, %v1105_v19  ;;  %v1179_v56 = vsel %vm1169_vm4, %v12673_v44, %v12671_v43 }
 0x143   : > { %v12701_v1 = vpop.permute.xlu0 %1271  ;;  %v12703_v6 = vpop.permute.xlu1 %1269 }
 0x145   : > { %1265 = vrot.lane.b32.xlu0 %v1227_v9, %s15804_s6  ;;  %1263 = vrot.lane.b32.xlu1 %v1226_v12, %s15804_s6  ;;  %v736_v9 = vmul.f32 %v12354_v22, %v12559_v47  ;;  %v735_v12 = vmul.f32 %v12357_v23, %v12559_v47  ;;  %v1278_v23 = vsel %vm1273_vm5, %v12683_v54, %v12681_v53 }
 0x146   : > { %v1302_v55 = vadd.f32 %v1278_v23, %v1196_v40  ;;  %v1284_v23 = vsel %vm1273_vm5, %v12691_v51, %v12703_v6  ;;  %v726_v51 = vmul.f32 %v12503_v21, %v12561_v49 }
 0x147   : > { %v1357_v29 = vpop.permute.xlu0 %1356  ;;  %v12719_v35 = vpop.permute.xlu1 %1354  ;;  %v839_v22 = vadd.f32 %v12591_v61, %v736_v9  ;;  %v838_v26 = vadd.f32 %v815_v50, %v735_v12  ;;  %v1321_v61 = vmul.f32 %v12456_v62, %v12343_v11 }
 0x148   : > { %15839 = vst [vmem:[#allocation11_spill] sm:$0xff] %v12719_v35  ;;  %v1379_v46 = vsel %vm1374_vm6, %v12719_v35, %v1357_v29 }
 0x149   : > { %1259 = vrot.lane.b32.xlu0 %v1224_v38, %s15804_s6  ;;  %1245 = vrot.lane.b32.xlu1 %v1217_v39, %s15804_s6  ;;  %v1015_v38 = vadd.f32 %v12621_v14, %v924_v13  ;;  %v997_v39 = vsel %vm987_vm2, %v12633_v25, %v12631_v20  ;;  %v930_v58 = vadd.f32 %v12611_v37, %v839_v22 }
 0x14a   : > { %v1088_v14 = vsel %vm1078_vm3, %v12653_v42, %v12651_v45  ;;  %v1279_v37 = vsel %vm1273_vm5, %v12681_v53, %v12693_v48  ;;  %v1403_v13 = vadd.f32 %v1379_v46, %v1302_v55 }
 0x14b   : > { %v12741_v59 = vpop.permute.xlu0 %1368  ;;  %v1359_v60 = vpop.permute.xlu1 %1358  ;;  %v1106_v50 = vadd.f32 %v12641_v30, %v1015_v38  ;;  %v1328_v30 = vmul.f32 %v12467_v3, %v12343_v11 }
 0x14c   : > { %15840 = vst [vmem:[#allocation12_spill] sm:$0xff] %v12741_v59  ;;  %v1380_v53 = vsel %vm1374_vm6, %v1357_v29, %v1359_v60 }
 0x14d   : > { %1350 = vrot.lane.b32.xlu0 %v1320_v52, %s15802_s25  ;;  %1348 = vrot.lane.b32.xlu1 %v1319_v0, %s15802_s25  ;;  %v929_v52 = vadd.f32 %v906_v17, %v838_v26  ;;  %v1021_v0 = vadd.f32 %v12631_v20, %v930_v58  ;;  %v1197_v12 = vadd.f32 %v12661_v8, %v1106_v50 }
 0x14e   : > { %v1327_v20 = vmul.f32 %v12467_v3, %v12340_v10  ;;  %v1318_v58 = vmul.f32 %v12456_v62, %v12527_v36 }
 0x14f   : > { %v1373_v24 = vpop.permute.xlu0 %1372  ;;  %v1371_v41 = vpop.permute.xlu1 %1370  ;;  %v1020_v9 = vadd.f32 %v997_v39, %v929_v52  ;;  %v1112_v22 = vadd.f32 %v12651_v45, %v1021_v0  ;;  %v1303_v8 = vadd.f32 %v1279_v37, %v1197_v12  ;;  %v1285_v45 = vsel %vm1273_vm5, %v12703_v6, %v12701_v1 }
 0x150   : > { %v1385_v46 = vsel %vm1374_vm6, %v12741_v59, %v1371_v41  ;;  %v1386_v50 = vsel %vm1374_vm6, %v1371_v41, %v1373_v24  ;;  %v1420_v24 = vmul.f32 %v12476_v7, %v12503_v21 }
 0x151   : > { %1362 = vrot.lane.b32.xlu0 %v1326_v2, %s15802_s25  ;;  %1352 = vrot.lane.b32.xlu1 %v1321_v61, %s15802_s25  ;;  %v1111_v26 = vadd.f32 %v1088_v14, %v1020_v9  ;;  %v1203_v29 = vadd.f32 %v12671_v43, %v1112_v22  ;;  %v1404_v60 = vadd.f32 %v1380_v53, %v1303_v8 }
 0x152   : > { %v1325_v61 = vmul.f32 %v12467_v3, %v12527_v36  ;;  %v1421_v3 = vmul.f32 %v12476_v7, %v12340_v10  ;;  %v1422_v22 = vmul.f32 %v12476_v7, %v12343_v11 }
 0x153   : > { %v1458_v17 = vpop.permute.xlu0 %1457  ;;  %v12789_v19 = vpop.permute.xlu1 %1455  ;;  %v1202_v38 = vadd.f32 %v1179_v56, %v1111_v26  ;;  %v1309_v6 = vadd.f32 %v1285_v45, %v1203_v29  ;;  %v1429_v45 = vmul.f32 %v12487_v15, %v12343_v11  ;;  %v1428_v29 = vmul.f32 %v12487_v15, %v12340_v10 }
 0x154   : > { %15841 = vst [vmem:[#allocation13_spill] sm:$0xff] %v12789_v19  ;;  %v1480_v48 = vsel %vm1475_vm7, %v12789_v19, %v1458_v17 }
 0x155   : > { %v1504_v2 = vadd.f32 %v1480_v48, %v1403_v13  ;;  %1366 = vrot.lane.b32.xlu0 %v1328_v30, %s15802_s25  ;;  %1364 = vrot.lane.b32.xlu1 %v1327_v20, %s15802_s25  ;;  %v1308_v52 = vadd.f32 %v1284_v23, %v1202_v38  ;;  %v1410_v55 = vadd.f32 %v1386_v50, %v1309_v6 }
 0x156   : > { %v1427_v20 = vmul.f32 %v12487_v15, %v12503_v21  ;;  %v1419_v6 = vmul.f32 %v12476_v7, %v12527_v36 }
 0x157   : > { %v12806_v39 = vpop.permute.xlu0 %1469  ;;  %v1460_v40 = vpop.permute.xlu1 %1459  ;;  %v1528_v43 = vadd.f32 %v12571_v33, %v1504_v2  ;;  %v1409_v62 = vadd.f32 %v1385_v46, %v1308_v52 }
 0x158   : > { %15842 = vst [vmem:[#allocation14_spill] sm:$0xff] %v12806_v39  ;;  %v1481_v1 = vsel %vm1475_vm7, %v1458_v17, %v1460_v40 }
 0x159   : > { %v1505_v14 = vadd.f32 %v1481_v1, %v1404_v60  ;;  %1360 = vrot.lane.b32.xlu0 %v1325_v61, %s15802_s25  ;;  %1346 = vrot.lane.b32.xlu1 %v1318_v58, %s15802_s25  ;;  %v1540_v12 = vmax.f32 %v1528_v43, 0.0  ;;  %v1426_v1 = vmul.f32 %v12487_v15, %v12527_v36  ;;  %v15759_v43 = vmov 0.0  }
 0x15a   : > { %1836 = vmatprep.mubr.f32.mxu0 %v15759_v43  ;;  %1682 = vmatprep.mubr.f32.mxu1 %v15759_v43 }
 0x15b   : > { %v1529_v0 = vadd.f32 %v12571_v33, %v1505_v14  ;;  %v1474_v9 = vpop.permute.xlu0 %1473  ;;  %v1472_v37 = vpop.permute.xlu1 %1471 }
 0x15c   : > { %v1486_v41 = vsel %vm1475_vm7, %v12806_v39, %v1472_v37  ;;  %v1487_v30 = vsel %vm1475_vm7, %v1472_v37, %v1474_v9 }
 0x15d   : > { %v1541_v56 = vmax.f32 %v1529_v0, 0.0  ;;  %v1510_v13 = vadd.f32 %v1486_v41, %v1409_v62  ;;  %v1511_v17 = vadd.f32 %v1487_v30, %v1410_v55  ;;  %1451 = vrot.lane.b32.xlu0 %v1421_v3, %s15787_s26  ;;  %1449 = vrot.lane.b32.xlu1 %v1420_v24, %s15787_s26 }
 0x15f   : > { %v1534_v26 = vadd.f32 %v12573_v27, %v1510_v13  ;;  %v1535_v53 = vadd.f32 %v12573_v27, %v1511_v17  ;;  %v12835_v48 = vpop.permute.xlu0 %785  ;;  %v12837_v8 = vpop.permute.xlu1 %783  ;;  %v12839_v23 = vpack.i.bf16 %v1541_v56, %v1540_v12 }
 0x160   : > { %v807_v54 = vsel %vm805_vm0, %v12837_v8, %v12835_v48 }
 0x161   : > { %15843 = vst [vmem:[#allocation15_spill] sm:$0xff] %v12839_v23  ;;  %v1546_v2 = vmax.f32 %v1534_v26, 0.0  ;;  %v1547_v38 = vmax.f32 %v1535_v53, 0.0  ;;  %1463 = vrot.lane.b32.xlu0 %v1427_v20, %s15787_s26  ;;  %1453 = vrot.lane.b32.xlu1 %v1422_v22, %s15787_s26 }
 0x163   : > { %v12847_v60 = vpop.permute.xlu0 %795  ;;  %v12849_v40 = vpop.permute.xlu1 %787  ;;  %v12851_v61 = vpack.i.bf16 %v1547_v38, %v1546_v2  ;;  %v12853_v58 = vpack.c.bf16 %v1547_v38, %v1541_v56  ;;  %v12855_v52 = vpack.c.bf16 %v1546_v2, %v1540_v12 }
 0x165   : > { %15844 = vst [vmem:[#allocation16_spill] sm:$0xff] %v12851_v61  ;;  %15845 = vst [vmem:[#allocation17_spill] sm:$0xff] %v12853_v58  ;;  %1467 = vrot.lane.b32.xlu0 %v1429_v45, %s15787_s26  ;;  %1465 = vrot.lane.b32.xlu1 %v1428_v29, %s15787_s26 }
 0x166   : > { %15846 = vst [vmem:[#allocation18_spill] sm:$0xff] %v12855_v52 }
 0x167   : > { %v12859_v46 = vpop.permute.xlu0 %799  ;;  %v12861_v50 = vpop.permute.xlu1 %797 }
 0x169   : > { %1461 = vrot.lane.b32.xlu0 %v1426_v1, %s15787_s26  ;;  %1447 = vrot.lane.b32.xlu1 %v1419_v6, %s15787_s26  ;;  %s15888_s26 = smov 70  }
 0x16b   : > { %v794_v14 = vpop.permute.xlu0 %793  ;;  %v782_v3 = vpop.permute.xlu1 %781 }
 0x16d   : > { %11491 = vrot.lane.b32.xlu0 %v12851_v61, %s15793_s0  ;;  %11486 = vrot.lane.b32.xlu1 %v12839_v23, %s15793_s0 }
 0x16f   : > { %v877_v15 = vpop.permute.xlu0 %876  ;;  %v12875_v62 = vpop.permute.xlu1 %874 }
 0x170   : > { %v898_v44 = vsel %vm896_vm1, %v12875_v62, %v877_v15 }
 0x173   : > { %v12877_v7 = vpop.permute.xlu0 %886  ;;  %v879_v55 = vpop.permute.xlu1 %878 }
 0x174   : > { %v899_v28 = vsel %vm896_vm1, %v877_v15, %v879_v55 }
 0x177   : > { %v12879_v0 = vpop.permute.xlu0 %890  ;;  %v12881_v9 = vpop.permute.xlu1 %888 }
 0x17b   : > { %v12883_v37 = vpop.permute.xlu0 %884  ;;  %v12885_v24 = vpop.permute.xlu1 %872 }
 0x17f   : > { %v12887_v41 = vpop.permute.xlu0 %967  ;;  %v12889_v30 = vpop.permute.xlu1 %965 }
 0x183   : > { %v12891_v12 = vpop.permute.xlu0 %977  ;;  %v12893_v56 = vpop.permute.xlu1 %969 }
 0x187   : > { %v12895_v13 = vpop.permute.xlu0 %981  ;;  %v12897_v17 = vpop.permute.xlu1 %979 }
 0x188   : > { %v996_v15 = vsel %vm987_vm2, %v12895_v13, %v12633_v25 }
 0x18b   : > { %v12899_v20 = vpop.permute.xlu0 %975  ;;  %v12901_v22 = vpop.permute.xlu1 %963 }
 0x18f   : > { %v12903_v26 = vpop.permute.xlu0 %1058  ;;  %v12905_v53 = vpop.permute.xlu1 %1056 }
 0x193   : > { %v12907_v2 = vpop.permute.xlu0 %1068  ;;  %v12909_v38 = vpop.permute.xlu1 %1060 }
 0x197   : > { %v12911_v45 = vpop.permute.xlu0 %1072  ;;  %v12913_v29 = vpop.permute.xlu1 %1070 }
 0x19b   : > { %v12915_v1 = vpop.permute.xlu0 %1066  ;;  %v12917_v6 = vpop.permute.xlu1 %1054 }
 0x19f   : > { %v12919_v31 = vpop.permute.xlu0 %1149  ;;  %v12921_v18 = vpop.permute.xlu1 %1147 }
 0x1a3   : > { %v12923_v43 = vpop.permute.xlu0 %1159  ;;  %v12925_v5 = vpop.permute.xlu1 %1151 }
 0x1a4   : > { %15847 = vst [vmem:[#allocation19_spill] sm:$0xff] %v12923_v43  ;;  %15848 = vst [vmem:[#allocation20_spill] sm:$0xff] %v12925_v5  ;;  %v725_v43 = vmul.f32 %v12527_v36, %v12561_v49 }
 0x1a7   : > { %v12927_v52 = vpop.permute.xlu0 %1163  ;;  %v12929_v58 = vpop.permute.xlu1 %1161 }
 0x1a8   : > { %15849 = vst [vmem:[#allocation21_spill] sm:$0xff] %v12927_v52  ;;  %15850 = vst [vmem:[#allocation22_spill] sm:$0xff] %v12929_v58 }
 0x1ab   : > { %v12931_v61 = vpop.permute.xlu0 %1157  ;;  %v12933_v23 = vpop.permute.xlu1 %1145 }
 0x1ac   : > { %15851 = vst [vmem:[#allocation23_spill] sm:$0xff] %v12931_v61  ;;  %15852 = vst [vmem:[#allocation24_spill] sm:$0xff] %v12933_v23  ;;  %v727_v23 = vmul.f32 %v12340_v10, %v12561_v49  ;;  %v728_v61 = vmul.f32 %v12343_v11, %v12561_v49 }
 0x1af   : > { %v12935_v27 = vpop.permute.xlu0 %1249  ;;  %v12937_v19 = vpop.permute.xlu1 %1247 }
 0x1b3   : > { %v12939_v39 = vpop.permute.xlu0 %1261  ;;  %v12941_v59 = vpop.permute.xlu1 %1251 }
 0x1b4   : > { %15853 = vst [vmem:[#allocation25_spill] sm:$0xff] %v12939_v39  ;;  %15854 = vst [vmem:[#allocation26_spill] sm:$0xff] %v12941_v59  ;;  %v808_v39 = vsel %vm805_vm0, %v12835_v48, %v12849_v40  ;;  %v733_v59 = vmul.f32 %v12340_v10, %v12559_v47  ;;  %v814_v48 = vsel %vm805_vm0, %v12859_v46, %v12593_v63 }
 0x1b5   : > { %v731_v10 = vmul.f32 %v12527_v36, %v12559_v47  ;;  %v830_v49 = vadd.f32 %v808_v39, %v727_v23  ;;  %v903_v23 = vsel %vm896_vm1, %v12877_v7, %v12881_v9 }
 0x1b7   : > { %v12943_v35 = vpop.permute.xlu0 %1265  ;;  %v12945_v33 = vpop.permute.xlu1 %1263 }
 0x1b8   : > { %15855 = vst [vmem:[#allocation27_spill] sm:$0xff] %v12943_v35  ;;  %15856 = vst [vmem:[#allocation28_spill] sm:$0xff] %v12945_v33  ;;  %v809_v33 = vsel %vm805_vm0, %v12849_v40, %v12583_v57  ;;  %v734_v35 = vmul.f32 %v12343_v11, %v12559_v47  ;;  %v732_v57 = vmul.f32 %v12503_v21, %v12559_v47 }
 0x1b9   : > { %v812_v11 = vsel %vm805_vm0, %v12847_v60, %v12861_v50  ;;  %v829_v40 = vadd.f32 %v807_v54, %v726_v51  ;;  %v831_v63 = vadd.f32 %v809_v33, %v728_v61  ;;  %v806_v21 = vsel %vm805_vm0, %v782_v3, %v12837_v8 }
 0x1ba   : > { %v837_v5 = vadd.f32 %v814_v48, %v734_v35  ;;  %v835_v36 = vadd.f32 %v812_v11, %v732_v57  ;;  %v900_v47 = vsel %vm896_vm1, %v879_v55, %v12603_v4  ;;  %v905_v54 = vsel %vm896_vm1, %v12879_v0, %v12613_v34 }
 0x1bb   : > { %v12968_v58 = vpop.permute.xlu0 %1259  ;;  %v12970_v52 = vpop.permute.xlu1 %1245  ;;  %v904_v35 = vsel %vm896_vm1, %v12881_v9, %v12879_v0  ;;  %v920_v4 = vadd.f32 %v898_v44, %v829_v40  ;;  %v921_v61 = vadd.f32 %v899_v28, %v830_v49  ;;  %v902_v34 = vsel %vm896_vm1, %v12883_v37, %v12877_v7 }
 0x1bc   : > { %15857 = vst [vmem:[#allocation29_spill] sm:$0xff] %v12968_v58  ;;  %15858 = vst [vmem:[#allocation30_spill] sm:$0xff] %v12970_v52  ;;  %v813_v52 = vsel %vm805_vm0, %v12861_v50, %v12859_v46  ;;  %v811_v58 = vsel %vm805_vm0, %v794_v14, %v12847_v60  ;;  %v828_v60 = vadd.f32 %v806_v21, %v725_v43 }
 0x1bd   : > { %v836_v39 = vadd.f32 %v813_v52, %v733_v59  ;;  %v834_v8 = vadd.f32 %v811_v58, %v731_v10  ;;  %v922_v46 = vadd.f32 %v900_v47, %v831_v63  ;;  %v928_v50 = vadd.f32 %v905_v54, %v837_v5  ;;  %v15859_v47 = vld [vmem:[#allocation20_spill] sm:$0xff] }
 0x1be   : > { %v897_v59 = vsel %vm896_vm1, %v12885_v24, %v12875_v62  ;;  %v989_v58 = vsel %vm987_vm2, %v12889_v30, %v12887_v41  ;;  %v926_v52 = vadd.f32 %v903_v23, %v835_v36  ;;  %v990_v28 = vsel %vm987_vm2, %v12887_v41, %v12893_v56  ;;  %v15861_v23 = vld [vmem:[#allocation8_spill] sm:$0xff] }
 0x1bf   : > { %v12997_v51 = vpop.permute.xlu0 %1350  ;;  %v12999_v33 = vpop.permute.xlu1 %1348  ;;  %v927_v14 = vadd.f32 %v904_v35, %v836_v39  ;;  %v991_v44 = vsel %vm987_vm2, %v12893_v56, %v12623_v16  ;;  %v925_v3 = vadd.f32 %v902_v34, %v834_v8  ;;  %v994_v62 = vsel %vm987_vm2, %v12891_v12, %v12897_v17 }
 0x1c0   : > { %v995_v7 = vsel %vm987_vm2, %v12897_v17, %v12895_v13  ;;  %v919_v55 = vadd.f32 %v897_v59, %v828_v60  ;;  %v1011_v0 = vadd.f32 %v989_v58, %v920_v4  ;;  %v993_v16 = vsel %vm987_vm2, %v12899_v20, %v12891_v12 }
 0x1c1   : > { %v988_v9 = vsel %vm987_vm2, %v12901_v22, %v12889_v30  ;;  %v1012_v37 = vadd.f32 %v990_v28, %v921_v61  ;;  %v1013_v25 = vadd.f32 %v991_v44, %v922_v46  ;;  %v1080_v24 = vsel %vm1078_vm3, %v12905_v53, %v12903_v26  ;;  %v15863_v61 = vld [vmem:[#allocation22_spill] sm:$0xff]  ;;  %v15866_v44 = vld [vmem:[#allocation23_spill] sm:$0xff] }
 0x1c2   : > { %v1081_v41 = vsel %vm1078_vm3, %v12903_v26, %v12909_v38  ;;  %v1019_v56 = vadd.f32 %v996_v15, %v928_v50  ;;  %v1017_v13 = vadd.f32 %v994_v62, %v926_v52  ;;  %v1018_v17 = vadd.f32 %v995_v7, %v927_v14  ;;  %v15865_v52 = vld [vmem:[#allocation26_spill] sm:$0xff]  ;;  %v15867_v15 = vld [vmem:[#allocation24_spill] sm:$0xff] }
 0x1c3   : > { %v13022_v43 = vpop.permute.xlu0 %1362  ;;  %v13024_v5 = vpop.permute.xlu1 %1352  ;;  %v1082_v12 = vsel %vm1078_vm3, %v12909_v38, %v12643_v32  ;;  %v1016_v22 = vadd.f32 %v993_v16, %v925_v3  ;;  %v1010_v48 = vadd.f32 %v988_v9, %v919_v55  ;;  %v1087_v57 = vsel %vm1078_vm3, %v12911_v45, %v12653_v42  ;;  %v15868_v9 = vld [vmem:[#allocation9_spill] sm:$0xff] }
 0x1c4   : > { %v1171_v26 = vsel %vm1169_vm4, %v12921_v18, %v12919_v31  ;;  %v1102_v11 = vadd.f32 %v1080_v24, %v1011_v0  ;;  %v1103_v10 = vadd.f32 %v1081_v41, %v1012_v37  ;;  %v1085_v40 = vsel %vm1078_vm3, %v12907_v2, %v12913_v29  ;;  %v15869_v41 = vld [vmem:[#allocation10_spill] sm:$0xff] }
 0x1c5   : > { %v1086_v32 = vsel %vm1078_vm3, %v12913_v29, %v12911_v45  ;;  %v1104_v38 = vadd.f32 %v1082_v12, %v1013_v25  ;;  %v1084_v49 = vsel %vm1078_vm3, %v12915_v1, %v12907_v2  ;;  %v1079_v42 = vsel %vm1078_vm3, %v12917_v6, %v12905_v53  ;;  %v15860_v45 = vld [vmem:[#allocation7_spill] sm:$0xff]  ;;  %v15862_v53 = vld [vmem:[#allocation21_spill] sm:$0xff] }
 0x1c6   : > { %v1275_v63 = vsel %vm1273_vm5, %v12937_v19, %v12935_v27  ;;  %v1110_v21 = vadd.f32 %v1087_v57, %v1019_v56  ;;  %v1193_v36 = vadd.f32 %v1171_v26, %v1102_v11  ;;  %v1172_v54 = vsel %vm1169_vm4, %v12919_v31, %v15859_v47  ;;  %v15864_v31 = vld [vmem:[#allocation19_spill] sm:$0xff] }
 0x1c7   : > { %v13050_v20 = vpop.permute.xlu0 %1366  ;;  %v1365_v30 = vpop.permute.xlu1 %1364  ;;  %v1173_v29 = vsel %vm1169_vm4, %v15859_v47, %v15860_v45  ;;  %v1108_v1 = vadd.f32 %v1085_v40, %v1017_v13  ;;  %v1109_v8 = vadd.f32 %v1086_v32, %v1018_v17  ;;  %v1178_v6 = vsel %vm1169_vm4, %v15862_v53, %v15861_v23  ;;  %v15870_v56 = vld [vmem:[#allocation27_spill] sm:$0xff]  ;;  %v15872_v17 = vld [vmem:[#allocation25_spill] sm:$0xff]  ;;  %v15874_v32 = vld [vmem:[#allocation30_spill] sm:$0xff] }
 0x1c8   : > { %v1376_v35 = vsel %vm1374_vm6, %v12999_v33, %v12997_v51  ;;  %v1107_v60 = vadd.f32 %v1084_v49, %v1016_v22  ;;  %v1101_v4 = vadd.f32 %v1079_v42, %v1010_v48  ;;  %v1176_v34 = vsel %vm1169_vm4, %v15864_v31, %v15863_v61 }
 0x1c9   : > { %v1299_v46 = vadd.f32 %v1275_v63, %v1193_v36  ;;  %v1194_v50 = vadd.f32 %v1172_v54, %v1103_v10  ;;  %v1195_v59 = vadd.f32 %v1173_v29, %v1104_v38  ;;  %v1177_v58 = vsel %vm1169_vm4, %v15863_v61, %v15862_v53  ;;  %v15873_v10 = vld [vmem:[#allocation29_spill] sm:$0xff] }
 0x1ca   : > { %v1276_v14 = vsel %vm1273_vm5, %v12935_v27, %v15865_v52  ;;  %v1201_v28 = vadd.f32 %v1178_v6, %v1110_v21  ;;  %v1175_v3 = vsel %vm1169_vm4, %v15866_v44, %v15864_v31  ;;  %v1170_v62 = vsel %vm1169_vm4, %v15867_v15, %v12921_v18  ;;  %v15871_v18 = vld [vmem:[#allocation28_spill] sm:$0xff] }
 0x1cb   : > { %v1361_v39 = vpop.permute.xlu0 %1360  ;;  %v1347_v2 = vpop.permute.xlu1 %1346  ;;  %v1400_v7 = vadd.f32 %v1376_v35, %v1299_v46  ;;  %v1199_v16 = vadd.f32 %v1176_v34, %v1108_v1  ;;  %v1277_v37 = vsel %vm1273_vm5, %v15865_v52, %v15868_v9  ;;  %v1377_v27 = vsel %vm1374_vm6, %v12997_v51, %v13024_v5  ;;  %v15875_v1 = vld [vmem:[#allocation5_spill] sm:$0xff] }
 0x1cc   : > { %v1300_v24 = vadd.f32 %v1276_v14, %v1194_v50  ;;  %v1283_v13 = vsel %vm1273_vm5, %v15870_v56, %v15869_v41  ;;  %v1281_v12 = vsel %vm1273_vm5, %v15872_v17, %v15871_v18  ;;  %v1200_v48 = vadd.f32 %v1177_v58, %v1109_v8  ;;  %v15878_v58 = vld [vmem:[#allocation14_spill] sm:$0xff] }
 0x1cd   : > { %v1198_v57 = vadd.f32 %v1175_v3, %v1107_v60  ;;  %v1192_v26 = vadd.f32 %v1170_v62, %v1101_v4  ;;  %v1282_v11 = vsel %vm1273_vm5, %v15871_v18, %v15870_v56  ;;  %v1301_v51 = vadd.f32 %v1277_v37, %v1195_v59  ;;  %v15877_v60 = vld [vmem:[#allocation12_spill] sm:$0xff] }
 0x1ce   : > { %v1280_v40 = vsel %vm1273_vm5, %v15873_v10, %v15872_v17  ;;  %v1274_v38 = vsel %vm1273_vm5, %v15874_v32, %v12937_v19  ;;  %v1401_v49 = vadd.f32 %v1377_v27, %v1300_v24  ;;  %v1307_v21 = vadd.f32 %v1283_v13, %v1201_v28  ;;  %v15876_v19 = vld [vmem:[#allocation11_spill] sm:$0xff] }
 0x1cf   : > { %v1452_v55 = vpop.permute.xlu0 %1451  ;;  %v1450_v0 = vpop.permute.xlu1 %1449  ;;  %v1305_v36 = vadd.f32 %v1281_v12, %v1199_v16  ;;  %v1382_v47 = vsel %vm1374_vm6, %v13022_v43, %v1365_v30  ;;  %v1306_v45 = vadd.f32 %v1282_v11, %v1200_v48  ;;  %v1383_v29 = vsel %vm1374_vm6, %v1365_v30, %v13050_v20 }
 0x1d0   : > { %v1477_v25 = vsel %vm1475_vm7, %v1450_v0, %v1452_v55  ;;  %v1304_v53 = vadd.f32 %v1280_v40, %v1198_v57  ;;  %v1298_v6 = vadd.f32 %v1274_v38, %v1192_v26  ;;  %v1378_v35 = vsel %vm1374_vm6, %v13024_v5, %v15876_v19 }
 0x1d1   : > { %v1501_v22 = vadd.f32 %v1477_v25, %v1400_v7  ;;  %v1384_v4 = vsel %vm1374_vm6, %v13050_v20, %v15877_v60  ;;  %v1406_v61 = vadd.f32 %v1382_v47, %v1305_v36  ;;  %v1381_v31 = vsel %vm1374_vm6, %v1361_v39, %v13022_v43  ;;  %v15880_v7 = vld [vmem:[#allocation6_spill] sm:$0xff] }
 0x1d2   : > { %v1375_v30 = vsel %vm1374_vm6, %v1347_v2, %v12999_v33  ;;  %v1407_v59 = vadd.f32 %v1383_v29, %v1306_v45  ;;  %v1408_v14 = vadd.f32 %v1384_v4, %v1307_v21  ;;  %v1405_v44 = vadd.f32 %v1381_v31, %v1304_v53  ;;  %v15879_v2 = vld [vmem:[#allocation13_spill] sm:$0xff]  ;;  %v13219_v31 = vld [vmem:[%s15882_s30] sm:$0xff] }
 0x1d3   : > { %v1464_v42 = vpop.permute.xlu0 %1463  ;;  %v1454_v63 = vpop.permute.xlu1 %1453  ;;  %v1525_v8 = vadd.f32 %v15875_v1, %v1501_v22  ;;  %v1399_v33 = vadd.f32 %v1375_v30, %v1298_v6  ;;  %v1402_v41 = vadd.f32 %v1378_v35, %v1301_v51  ;;  %v15883_v6 = vld [vmem:[#allocation16_spill] sm:$0xff]  ;;  %v13203_v35 = vld [vmem:[%s15882_s30 + $0x18] sm:$0x3]  ;;  %v15884_v4 = vld [vmem:[#allocation17_spill] sm:$0xff] }
 0x1d4   : > { %v1478_v54 = vsel %vm1475_vm7, %v1452_v55, %v1454_v63  ;;  %v1479_v3 = vsel %vm1475_vm7, %v1454_v63, %v15879_v2  ;;  %v15886_v30 = vld [vmem:[#allocation18_spill] sm:$0xff] }
 0x1d5   : > { %v1502_v23 = vadd.f32 %v1478_v54, %v1401_v49  ;;  %v1537_v28 = vmax.f32 %v1525_v8, 0.0  ;;  %v1503_v12 = vadd.f32 %v1479_v3, %v1402_v41  ;;  %v15881_v8 = vld [vmem:[#allocation15_spill] sm:$0xff] }
 0x1d7   : > { %v13139_v34 = vadd.f32 %v15875_v1, %v1502_v23  ;;  %v1468_v46 = vpop.permute.xlu0 %1467  ;;  %v1466_v50 = vpop.permute.xlu1 %1465  ;;  %v1527_v63 = vadd.f32 %v15875_v1, %v1503_v12 }
 0x1d8   : > { %v1485_v5 = vsel %vm1475_vm7, %v1468_v46, %v15878_v58  ;;  %v1483_v52 = vsel %vm1475_vm7, %v1464_v42, %v1466_v50  ;;  %v1484_v20 = vsel %vm1475_vm7, %v1466_v50, %v1468_v46 }
 0x1d9   : > { %v1538_v43 = vmax.f32 %v13139_v34, 0.0  ;;  %v1507_v39 = vadd.f32 %v1483_v52, %v1406_v61  ;;  %v1508_v15 = vadd.f32 %v1484_v20, %v1407_v59  ;;  %v1509_v62 = vadd.f32 %v1485_v5, %v1408_v14  ;;  %v13231_v34 = vld [vmem:[%s15882_s30 + $0x8] sm:$0x3] }
 0x1da   : > { %v1539_v23 = vmax.f32 %v1527_v63, 0.0  ;;  %v15885_v61 = vmov 0.0  }
 0x1db   : > { %v1531_v55 = vadd.f32 %v15880_v7, %v1507_v39  ;;  %v1462_v16 = vpop.permute.xlu0 %1461  ;;  %v1448_v9 = vpop.permute.xlu1 %1447  ;;  %v13149_v37 = vpack.i.bf16 %v1538_v43, %v1537_v28  ;;  %v1532_v27 = vadd.f32 %v15880_v7, %v1508_v15  ;;  %v13157_v22 = vadd.f32 %v15880_v7, %v1509_v62 }
 0x1dc   : > { %v1482_v25 = vsel %vm1475_vm7, %v1462_v16, %v1464_v42  ;;  %v1476_v24 = vsel %vm1475_vm7, %v1448_v9, %v1450_v0 }
 0x1dd   : > { %v1543_v56 = vmax.f32 %v1531_v55, 0.0  ;;  %v1506_v13 = vadd.f32 %v1482_v25, %v1405_v44  ;;  %v1500_v18 = vadd.f32 %v1476_v24, %v1399_v33  ;;  %11496 = vrot.lane.b32.xlu1 %v13149_v37, %s15789_s23  ;;  %v1544_v17 = vmax.f32 %v1532_v27, 0.0 }
 0x1de   : > { %v1545_v45 = vmax.f32 %v13157_v22, 0.0 }
 0x1df   : > { %v1530_v48 = vadd.f32 %v15880_v7, %v1506_v13  ;;  %v1524_v57 = vadd.f32 %v15875_v1, %v1500_v18  ;;  %v13161_v26 = vpop.permute.xlu0 %11491  ;;  %v13163_v11 = vpop.permute.xlu1 %11486  ;;  %v13167_v10 = vpack.i.bf16 %v1544_v17, %v1543_v56  ;;  %v10561_v29 = vpack.c.bf16 %v1543_v56, %v1537_v28  ;;  %v13190_v1 = vld [vmem:[%s15882_s30 + $0x10] sm:$0xff]  ;;  %v13345_v56 = vld [vmem:[%s15882_s30 + $0x20] sm:$0xff] }
 0x1e0   : > { %v11493_v0 = vunpack.i.l.bf16 %v13161_v26  ;;  %v11488_v51 = vunpack.i.l.bf16 %v13163_v11  ;;  %v11494_v40 = vunpack.i.h.bf16 %v13161_v26  ;;  %v11489_v49 = vunpack.i.h.bf16 %v13163_v11 }
 0x1e1   : > { %v1542_v32 = vmax.f32 %v1530_v48, 0.0  ;;  %v1536_v38 = vmax.f32 %v1524_v57, 0.0  ;;  %11501 = vrot.lane.b32.xlu0 %v13167_v10, %s15789_s23  ;;  %v13196_v19 = vpack.c.bf16 %v1545_v45, %v1539_v23  ;;  %v13205_v60 = vpack.c.bf16 %v1544_v17, %v1538_v43 }
 0x1e2   : > { %v1598_v42 = vsel %vm805_vm0, %v11493_v0, %v11494_v40  ;;  %v10557_v21 = vpack.c.bf16 %v11494_v40, %v11489_v49  ;;  %v1593_v36 = vsel %vm805_vm0, %v11488_v51, %v11489_v49  ;;  %v11625_v46 = vpack.i.bf16 %v1545_v45, %v1539_v23  ;;  %v13362_v49 = vld [vmem:[%s15882_s30 + $0x28] sm:$0x3] }
 0x1e3   : > { %v13180_v47 = vpack.i.bf16 %v1542_v32, %v1536_v38  ;;  %v10559_v54 = vpack.c.bf16 %v1598_v42, %v1593_v36  ;;  %v10563_v53 = vpack.c.bf16 %v1542_v32, %v1536_v38 }
 0x1e4   : > { %10558 = vmatprep.subr.bf16.mxu0 %v10557_v21 }
 0x1e5   : > { %11506 = vrot.lane.b32.xlu1 %v13180_v47, %s15789_s23  ;;  %11511 = vrot.lane.b32.xlu0 %v15881_v8, %s15789_s23 }
 0x1e6   : > { %10560 = vmatpush1.bf16.msra.mxu0 %v10559_v54 }
 0x1e7   : > { %10562 = vmatprep.subr.bf16.mxu0 %v10561_v29 }
 0x1e9   : > { %10051 = vmatmul.mubr.msk.f32.vlgmr.msra.gmra.mrb[0].mxu0 %vm1611_vm8, %v13190_v1  ;;  %11516 = vrot.lane.b32.xlu1 %v15883_v6, %s15789_s23  ;;  %s15887_s23 = smov 126  }
 0x1ea   : > { %11521 = vrot.lane.b32.xlu0 %v13149_v37, %s15791_s1  ;;  %10564 = vmatpush1.bf16.msra.mxu0 %v10563_v53 }
 0x1eb   : > { %10570 = vmatprep.subr.bf16.mxu0 %v15884_v4  ;;  %1842 = vmatprep.mubr.f32.mxu0 %v15885_v61 }
 0x1ed   : > { %10052 = vmatmul.mubr.msk.f32.gmra.mrb[2].mxu0 %vm1611_vm8, %v13203_v35  ;;  %11526 = vrot.lane.b32.xlu1 %v13167_v10, %s15791_s1 }
 0x1ee   : > { %11531 = vrot.lane.b32.xlu0 %v13180_v47, %s15791_s1  ;;  %1919 = vmatprep.mubr.f32.mxu0 %v15885_v61 }
 0x1f1   : > { %10053 = vmatmul.mubr.msk.f32.vlgmr.msra.gmra.mrb[4].mxu0 %vm1611_vm8, %v13219_v31  ;;  %11536 = vrot.lane.b32.xlu1 %v15881_v8, %s15791_s1 }
 0x1f2   : > { %10572 = vmatpush1.bf16.msra.mxu0 %v15886_v30  ;;  %11541 = vrot.lane.b32.xlu0 %v15883_v6, %s15791_s1 }
 0x1f3   : > { %1925 = vmatprep.mubr.f32.mxu0 %v15885_v61 }
 0x1f5   : > { %11546 = vrot.lane.b32.xlu1 %v13149_v37, %s15795_s5  ;;  %10054 = vmatmul.mubr.msk.f32.gmra.mrb[6].mxu0 %vm1611_vm8, %v13231_v34 }
 0x1f6   : > { %11551 = vrot.lane.b32.xlu0 %v13167_v10, %s15795_s5  ;;  %2073 = vmatprep.mubr.f32.mxu0 %v15885_v61 }
 0x1f9   : > { %11556 = vrot.lane.b32.xlu1 %v13180_v47, %s15795_s5  ;;  %10057 = vmatmul.mubr.msk.f32.vlgmr.msra.gmra.mrb[0].mxu0 %vm1611_vm8, %v13219_v31 }
 0x1fa   : > { %11561 = vrot.lane.b32.xlu0 %v15881_v8, %s15795_s5  ;;  %2079 = vmatprep.mubr.f32.mxu0 %v15885_v61 }
 0x1fd   : > { %11566 = vrot.lane.b32.xlu1 %v15883_v6, %s15795_s5  ;;  %10058 = vmatmul.mubr.msk.f32.gmra.mrb[2].mxu0 %vm1611_vm8, %v13231_v34 }
 0x1fe   : > { %11571 = vrot.lane.b32.xlu0 %v13149_v37, %s15806_s24  ;;  %2205 = vmatprep.mubr.f32.mxu0 %v15885_v61 }
 0x201   : > { %11576 = vrot.lane.b32.xlu1 %v13167_v10, %s15806_s24 }
 0x202   : > { %11581 = vrot.lane.b32.xlu0 %v13180_v47, %s15806_s24 }
 0x205   : > { %11586 = vrot.lane.b32.xlu1 %v15881_v8, %s15806_s24 }
 0x206   : > { %11591 = vrot.lane.b32.xlu0 %v15883_v6, %s15806_s24 }
 0x209   : > { %11596 = vrot.lane.b32.xlu1 %v13149_v37, %s15793_s0 }
 0x20a   : > { %11601 = vrot.lane.b32.xlu0 %v13167_v10, %s15793_s0 }
 0x20d   : > { %11606 = vrot.lane.b32.xlu1 %v13180_v47, %s15793_s0 }
 0x20e   : > { %11611 = vrot.lane.b32.xlu0 %v13149_v37, %s15804_s6 }
 0x211   : > { %11616 = vrot.lane.b32.xlu1 %v13167_v10, %s15804_s6 }
 0x212   : > { %11621 = vrot.lane.b32.xlu0 %v13180_v47, %s15804_s6 }
 0x215   : > { %11626 = vrot.lane.b32.xlu1 %v11625_v46, %s15793_s0  ;;  %s15895_s0 = smov 127  }
 0x216   : > { %11631 = vrot.lane.b32.xlu0 %v15881_v8, %s15804_s6 }
 0x219   : > { %11636 = vrot.lane.b32.xlu1 %v15883_v6, %s15804_s6 }
 0x21a   : > { %11641 = vrot.lane.b32.xlu0 %v13149_v37, %s15802_s25 }
 0x21d   : > { %11646 = vrot.lane.b32.xlu1 %v13167_v10, %s15802_s25 }
 0x21e   : > { %11651 = vrot.lane.b32.xlu0 %v13180_v47, %s15802_s25 }
 0x221   : > { %11656 = vrot.lane.b32.xlu1 %v11625_v46, %s15887_s23 }
 0x222   : > { %11661 = vrot.lane.b32.xlu0 %v15881_v8, %s15802_s25 }
 0x225   : > { %11666 = vrot.lane.b32.xlu1 %v15883_v6, %s15802_s25 }
 0x226   : > { %11671 = vrot.lane.b32.xlu0 %v11625_v46, %s15791_s1  ;;  %s15889_s1 = sld [smem:[#allocation35_spill]] }
 0x229   : > { %11676 = vrot.lane.b32.xlu1 %v13149_v37, %s15888_s26 }
 0x22a   : > { %11681 = vrot.lane.b32.xlu0 %v13167_v10, %s15888_s26 }
 0x22c   : > { %v4172_v50 = vld [vmem:[%s15889_s1] sm:$0xff]  ;;  %v4173_v59 = vld [vmem:[%s15889_s1 + $0x8] sm:$0x3]  ;;  %s15898_s1 = sld [smem:[#allocation37_spill]] }
 0x22d   : > { %11686 = vrot.lane.b32.xlu1 %v13180_v47, %s15888_s26 }
 0x22e   : > { %11691 = vrot.lane.b32.xlu0 %v11625_v46, %s15795_s5  ;;  %s15903_s5 = smov 71  }
 0x231   : > { %11696 = vrot.lane.b32.xlu1 %v15881_v8, %s15888_s26 }
 0x232   : > { %11701 = vrot.lane.b32.xlu0 %v15883_v6, %s15888_s26 }
 0x235   : > { %11706 = vrot.lane.b32.xlu1 %v11625_v46, %s15806_s24 }
 0x236   : > { %11711 = vrot.lane.b32.xlu0 %v11625_v46, %s15804_s6 }
 0x239   : > { %11716 = vrot.lane.b32.xlu1 %v11625_v46, %s15802_s25 }
 0x23a   : > { %11721 = vrot.lane.b32.xlu0 %v11625_v46, %s15888_s26 }
 0x23d   : > { %4176 = vperm.xlu1 %11484, %v4172_v50  }
 0x23e   : > { %4181 = vperm.xlu0 %11483, %v4173_v59  }
 0x24f   : > { %v13313_v58 = vpop.permute.xlu1 %11496 }
 0x250   : > { %v11499_v5 = vunpack.i.h.bf16 %v13313_v58  ;;  %v11498_v52 = vunpack.i.l.bf16 %v13313_v58 }
 0x252   : > { %v2114_v39 = vsel %vm896_vm1, %v11498_v52, %v11499_v5 }
 0x253   : > { %v13317_v20 = vpop.permute.xlu0 %11501 }
 0x254   : > { %v11504_v14 = vunpack.i.h.bf16 %v13317_v20  ;;  %v11503_v28 = vunpack.i.l.bf16 %v13317_v20 }
 0x256   : > { %v2119_v44 = vsel %vm896_vm1, %v11503_v28, %v11504_v14 }
 0x257   : > { %v11507_v43 = vpop.permute.xlu1 %11506  ;;  %v13327_v33 = vpop.permute.xlu0 %11511  ;;  %v10573_v15 = vpack.c.bf16 %v2119_v44, %v2114_v39 }
 0x258   : > { %v11509_v2 = vunpack.i.h.bf16 %v11507_v43  ;;  %v11508_v3 = vunpack.i.l.bf16 %v11507_v43  ;;  %v11514_v62 = vunpack.i.h.bf16 %v13327_v33  ;;  %v11513_v7 = vunpack.i.l.bf16 %v13327_v33 }
 0x259   : > { %10574 = vmatprep.subr.bf16.mxu0 %v10573_v15 }
 0x25a   : > { %v2118_v55 = vsel %vm896_vm1, %v11509_v2, %v11503_v28  ;;  %v2113_v16 = vsel %vm896_vm1, %v11508_v3, %v11498_v52  ;;  %v2117_v41 = vsel %vm896_vm1, %v11513_v7, %v11514_v62  ;;  %v13408_v3 = vld [vmem:[%s15882_s30 + $0x30] sm:$0xff] }
 0x25b   : > { %v13333_v9 = vpop.permute.xlu1 %11516  ;;  %v10575_v37 = vpack.c.bf16 %v2118_v55, %v2113_v16 }
 0x25c   : > { %v13335_v27 = vpop.permute.xlu0 %11521  ;;  %v11519_v25 = vunpack.i.h.bf16 %v13333_v9  ;;  %v11518_v24 = vunpack.i.l.bf16 %v13333_v9 }
 0x25d   : > { %10576 = vmatpush1.bf16.msra.mxu0 %v10575_v37  ;;  %v11524_v13 = vunpack.i.h.bf16 %v13335_v27  ;;  %v11523_v18 = vunpack.i.l.bf16 %v13335_v27 }
 0x25e   : > { %v2122_v17 = vsel %vm896_vm1, %v11518_v24, %v11519_v25  ;;  %v10581_v12 = vpack.c.bf16 %v11519_v25, %v11514_v62 }
 0x25f   : > { %v13352_v22 = vpop.permute.xlu1 %11526  ;;  %v10583_v48 = vpack.c.bf16 %v2122_v17, %v2117_v41  ;;  %v2412_v42 = vsel %vm987_vm2, %v11523_v18, %v11524_v13  ;;  %v13426_v17 = vld [vmem:[%s15882_s30 + $0x38] sm:$0x3] }
 0x260   : > { %v11532_v57 = vpop.permute.xlu0 %11531  ;;  %v11529_v10 = vunpack.i.h.bf16 %v13352_v22  ;;  %v11528_v40 = vunpack.i.l.bf16 %v13352_v22  ;;  %10061 = vmatmul.mubr.msk.f32.vlgmr.msra.gmra.mrb[4].mxu0 %vm1611_vm8, %v13345_v56  ;;  %10582 = vmatprep.subr.bf16.mxu0 %v10581_v12 }
 0x261   : > { %v11534_v32 = vunpack.i.h.bf16 %v11532_v57  ;;  %v11533_v38 = vunpack.i.l.bf16 %v11532_v57  ;;  %10584 = vmatpush1.bf16.msra.mxu0 %v10583_v48  ;;  %2211 = vmatprep.mubr.f32.mxu0 %v15885_v61 }
 0x262   : > { %v2417_v63 = vsel %vm987_vm2, %v11528_v40, %v11529_v10 }
 0x263   : > { %v13370_v21 = vpop.permute.xlu1 %11536  ;;  %v10585_v36 = vpack.c.bf16 %v2417_v63, %v2412_v42  ;;  %v2411_v47 = vsel %vm987_vm2, %v11533_v38, %v11523_v18  ;;  %v2416_v54 = vsel %vm987_vm2, %v11534_v32, %v11528_v40 }
 0x264   : > { %v13374_v45 = vpop.permute.xlu0 %11541  ;;  %v11539_v29 = vunpack.i.h.bf16 %v13370_v21  ;;  %10062 = vmatmul.mubr.msk.f32.gmra.mrb[6].mxu0 %vm1611_vm8, %v13362_v49  ;;  %v10587_v53 = vpack.c.bf16 %v2416_v54, %v2411_v47  ;;  %v11538_v30 = vunpack.i.l.bf16 %v13370_v21  ;;  %v13616_v21 = vld [vmem:[%s15882_s30 + $0x60] sm:$0xff] }
 0x265   : > { %v11544_v8 = vunpack.i.h.bf16 %v13374_v45  ;;  %10586 = vmatprep.subr.bf16.mxu0 %v10585_v36  ;;  %2359 = vmatprep.mubr.f32.mxu0 %v15885_v61  ;;  %v11543_v4 = vunpack.i.l.bf16 %v13374_v45 }
 0x266   : > { %v2415_v44 = vsel %vm987_vm2, %v11538_v30, %v11539_v29 }
 0x267   : > { %v13381_v23 = vpop.permute.xlu1 %11546  ;;  %v10593_v6 = vpack.c.bf16 %v11544_v8, %v11539_v29  ;;  %v2420_v39 = vsel %vm987_vm2, %v11543_v4, %v11544_v8 }
 0x268   : > { %v13385_v46 = vpop.permute.xlu0 %11551  ;;  %10065 = vmatmul.mubr.msk.f32.vlgmr.msra.gmra.mrb[0].mxu0 %vm1611_vm8, %v13345_v56  ;;  %v15798_v52 = vunpack.i.h.bf16 %v13381_v23  ;;  %v11548_v28 = vunpack.i.l.bf16 %v13381_v23  ;;  %v10595_v16 = vpack.c.bf16 %v2420_v39, %v2415_v44 }
 0x269   : > { %v15797_v50 = vunpack.i.h.bf16 %v13385_v46  ;;  %v11553_v59 = vunpack.i.l.bf16 %v13385_v46  ;;  %10588 = vmatpush1.bf16.msra.mxu0 %v10587_v53  ;;  %2365 = vmatprep.mubr.f32.mxu0 %v15885_v61 }
 0x26a   : > { %10594 = vmatprep.subr.bf16.mxu0 %v10593_v6  ;;  %v2710_v15 = vsel %vm1078_vm3, %v11548_v28, %v15798_v52 }
 0x26b   : > { %v11557_v43 = vpop.permute.xlu1 %11556  ;;  %v2715_v62 = vsel %vm1078_vm3, %v11553_v59, %v15797_v50 }
 0x26c   : > { %v13400_v2 = vpop.permute.xlu0 %11561  ;;  %10066 = vmatmul.mubr.msk.f32.gmra.mrb[2].mxu0 %vm1611_vm8, %v13362_v49  ;;  %v11559_v37 = vunpack.i.h.bf16 %v11557_v43  ;;  %v11558_v25 = vunpack.i.l.bf16 %v11557_v43  ;;  %v10597_v18 = vpack.c.bf16 %v2715_v62, %v2710_v15 }
 0x26d   : > { %2503 = vmatprep.mubr.f32.mxu0 %v15885_v61  ;;  %v11564_v38 = vunpack.i.h.bf16 %v13400_v2  ;;  %v11563_v29 = vunpack.i.l.bf16 %v13400_v2 }
 0x26e   : > { %v2714_v48 = vsel %vm1078_vm3, %v11559_v37, %v11553_v59  ;;  %v2709_v57 = vsel %vm1078_vm3, %v11558_v25, %v11548_v28  ;;  %v13462_v25 = vld [vmem:[%s15882_s30 + $0x40] sm:$0xff] }
 0x26f   : > { %v13416_v55 = vpop.permute.xlu1 %11566  ;;  %v10599_v36 = vpack.c.bf16 %v2714_v48, %v2709_v57  ;;  %v2713_v62 = vsel %vm1078_vm3, %v11563_v29, %v11564_v38 }
 0x270   : > { %v13418_v41 = vpop.permute.xlu0 %11571  ;;  %10069 = vmatmul.mubr.msk.f32.vlgmr.msra.gmra.mrb[4].mxu0 %vm1611_vm8, %v13408_v3  ;;  %v11569_v40 = vunpack.i.h.bf16 %v13416_v55  ;;  %v15801_v42 = vunpack.i.l.bf16 %v13416_v55 }
 0x271   : > { %10596 = vmatpush1.bf16.msra.mxu0 %v10595_v16  ;;  %2509 = vmatprep.mubr.f32.mxu0 %v15885_v61  ;;  %v15800_v6 = vunpack.i.h.bf16 %v13418_v41  ;;  %v11573_v59 = vunpack.i.l.bf16 %v13418_v41 }
 0x272   : > { %10598 = vmatprep.subr.bf16.mxu0 %v10597_v18  ;;  %v10605_v54 = vpack.c.bf16 %v11569_v40, %v11564_v38  ;;  %v2718_v28 = vsel %vm1078_vm3, %v15801_v42, %v11569_v40 }
 0x273   : > { %v13428_v12 = vpop.permute.xlu1 %11576  ;;  %v10607_v48 = vpack.c.bf16 %v2718_v28, %v2713_v62 }
 0x274   : > { %v11582_v32 = vpop.permute.xlu0 %11581  ;;  %10070 = vmatmul.mubr.msk.f32.gmra.mrb[6].mxu0 %vm1611_vm8, %v13426_v17  ;;  %v15799_v8 = vunpack.i.h.bf16 %v13428_v12  ;;  %v11578_v53 = vunpack.i.l.bf16 %v13428_v12 }
 0x275   : > { %2657 = vmatprep.mubr.f32.mxu0 %v15885_v61  ;;  %v11584_v40 = vunpack.i.h.bf16 %v11582_v32 }
 0x276   : > { %v3013_v18 = vsel %vm1169_vm4, %v11578_v53, %v15799_v8 }
 0x277   : > { %v13438_v63 = vpop.permute.xlu1 %11586 }
 0x278   : > { %v13440_v47 = vpop.permute.xlu0 %11591  ;;  %10073 = vmatmul.mubr.msk.f32.vlgmr.msra.gmra.mrb[0].mxu0 %vm1611_vm8, %v13408_v3 }
 0x279   : > { %10600 = vmatpush1.bf16.msra.mxu0 %v10599_v36  ;;  %2663 = vmatprep.mubr.f32.mxu0 %v15885_v61  ;;  %v11583_v36 = vunpack.i.l.bf16 %v11582_v32  ;;  %v13480_v32 = vld [vmem:[%s15882_s30 + $0x48] sm:$0x3] }
 0x27a   : > { %10606 = vmatprep.subr.bf16.mxu0 %v10605_v54 }
 0x27b   : > { %v11597_v43 = vpop.permute.xlu1 %11596 }
 0x27c   : > { %v11602_v39 = vpop.permute.xlu0 %11601  ;;  %v11599_v44 = vunpack.i.h.bf16 %v11597_v43  ;;  %v11598_v15 = vunpack.i.l.bf16 %v11597_v43  ;;  %10074 = vmatmul.mubr.msk.f32.gmra.mrb[2].mxu0 %vm1611_vm8, %v13426_v17  ;;  %v3008_v43 = vsel %vm1169_vm4, %v11573_v59, %v15800_v6 }
 0x27d   : > { %v11604_v16 = vunpack.i.h.bf16 %v11602_v39  ;;  %v11603_v37 = vunpack.i.l.bf16 %v11602_v39  ;;  %2801 = vmatprep.mubr.f32.mxu0 %v15885_v61  ;;  %v10609_v28 = vpack.c.bf16 %v3013_v18, %v3008_v43  ;;  %v3012_v18 = vsel %vm1169_vm4, %v11584_v40, %v11578_v53 }
 0x27e   : > { %v1590_v57 = vsel %vm805_vm0, %v11598_v15, %v11599_v44 }
 0x27f   : > { %v11607_v54 = vpop.permute.xlu1 %11606  ;;  %v1595_v38 = vsel %vm805_vm0, %v11603_v37, %v11604_v16 }
 0x280   : > { %v13472_v39 = vpop.permute.xlu0 %11611  ;;  %v11609_v50 = vunpack.i.h.bf16 %v11607_v54  ;;  %v11608_v52 = vunpack.i.l.bf16 %v11607_v54  ;;  %10077 = vmatmul.mubr.msk.f32.vlgmr.msra.gmra.mrb[4].mxu0 %vm1611_vm8, %v13462_v25  ;;  %v10549_v8 = vpack.c.bf16 %v1595_v38, %v1590_v57  ;;  %v3007_v57 = vsel %vm1169_vm4, %v11583_v36, %v11573_v59 }
 0x281   : > { %10608 = vmatpush1.bf16.msra.mxu0 %v10607_v48  ;;  %2807 = vmatprep.mubr.f32.mxu0 %v15885_v61  ;;  %v11594_v48 = vunpack.i.h.bf16 %v13440_v47  ;;  %v11589_v38 = vunpack.i.h.bf16 %v13438_v63 }
 0x282   : > { %10550 = vmatprep.subr.bf16.mxu1 %v10549_v8  ;;  %10610 = vmatprep.subr.bf16.mxu0 %v10609_v28  ;;  %v1589_v62 = vsel %vm805_vm0, %v11608_v52, %v11598_v15  ;;  %v1594_v6 = vsel %vm805_vm0, %v11609_v50, %v11603_v37  ;;  %v11588_v50 = vunpack.i.l.bf16 %v13438_v63  ;;  %v10611_v8 = vpack.c.bf16 %v3012_v18, %v3007_v57  ;;  %v13704_v63 = vld [vmem:[%s15882_s30 + $0x70] sm:$0xff] }
 0x283   : > { %v13484_v54 = vpop.permute.xlu1 %11616  ;;  %v10551_v42 = vpack.c.bf16 %v1594_v6, %v1589_v62  ;;  %v11593_v6 = vunpack.i.l.bf16 %v13440_v47  ;;  %v10617_v37 = vpack.c.bf16 %v11594_v48, %v11589_v38  ;;  %v11614_v57 = vunpack.i.h.bf16 %v13472_v39 }
 0x284   : > { %v11622_v43 = vpop.permute.xlu0 %11621  ;;  %10078 = vmatmul.mubr.msk.f32.gmra.mrb[6].mxu0 %vm1611_vm8, %v13480_v32  ;;  %v11618_v40 = vunpack.i.l.bf16 %v13484_v54  ;;  %v11613_v18 = vunpack.i.l.bf16 %v13472_v39  ;;  %v3011_v11 = vsel %vm1169_vm4, %v11588_v50, %v11589_v38 }
 0x285   : > { %10552 = vmatpush1.bf16.msra.mxu1 %v10551_v42  ;;  %2955 = vmatprep.mubr.f32.mxu0 %v15885_v61  ;;  %v11619_v42 = vunpack.i.h.bf16 %v13484_v54  ;;  %v11623_v38 = vunpack.i.l.bf16 %v11622_v43 }
 0x287   : > { %v11627_v52 = vpop.permute.xlu1 %11626 }
 0x288   : > { %v13495_v59 = vpop.permute.xlu0 %11631  ;;  %v11629_v53 = vunpack.i.h.bf16 %v11627_v52  ;;  %v11628_v15 = vunpack.i.l.bf16 %v11627_v52  ;;  %10081 = vmatmul.mubr.msk.f32.vlgmr.msra.gmra.mrb[0].mxu0 %vm1611_vm8, %v13462_v25  ;;  %10047 = vmatmul.mubr.msk.f32.vlgmr.msra.gmra.mrb[0].mxu1 %vm1611_vm8, %v13190_v1 }
 0x289   : > { %10612 = vmatpush1.bf16.msra.mxu0 %v10611_v8  ;;  %2961 = vmatprep.mubr.f32.mxu0 %v15885_v61 }
 0x28a   : > { %v1596_v36 = vsel %vm805_vm0, %v11604_v16, %v11629_v53  ;;  %v1591_v28 = vsel %vm805_vm0, %v11599_v44, %v11628_v15  ;;  %10618 = vmatprep.subr.bf16.mxu0 %v10617_v37  ;;  %1688 = vmatprep.mubr.f32.mxu1 %v15885_v61  ;;  %v1592_v62 = vsel %vm805_vm0, %v11628_v15, %v11488_v51 }
 0x28b   : > { %v13512_v52 = vpop.permute.xlu1 %11636  ;;  %v1597_v8 = vsel %vm805_vm0, %v11629_v53, %v11493_v0  ;;  %v10555_v16 = vpack.c.bf16 %v1596_v36, %v1591_v28  ;;  %v3016_v44 = vsel %vm1169_vm4, %v11593_v6, %v11594_v48  ;;  %v13534_v0 = vld [vmem:[%s15882_s30 + $0x50] sm:$0xff]  ;;  %v3311_v48 = vsel %vm1273_vm5, %v11618_v40, %v11619_v42 }
 0x28c   : > { %v13523_v51 = vpop.permute.xlu0 %11641  ;;  %10082 = vmatmul.mubr.msk.f32.gmra.mrb[2].mxu0 %vm1611_vm8, %v13480_v32  ;;  %10048 = vmatmul.mubr.msk.f32.gmra.mrb[2].mxu1 %vm1611_vm8, %v13203_v35  ;;  %v10553_v26 = vpack.c.bf16 %v1597_v8, %v1592_v62  ;;  %v10619_v15 = vpack.c.bf16 %v3016_v44, %v3011_v11  ;;  %v3306_v37 = vsel %vm1273_vm5, %v11613_v18, %v11614_v57  ;;  %v11624_v36 = vunpack.i.h.bf16 %v11622_v43  ;;  %v13553_v8 = vld [vmem:[%s15882_s30 + $0x58] sm:$0x3] }
 0x28d   : > { %3099 = vmatprep.mubr.f32.mxu0 %v15885_v61  ;;  %1759 = vmatprep.mubr.f32.mxu1 %v15885_v61  ;;  %v10621_v62 = vpack.c.bf16 %v3311_v48, %v3306_v37  ;;  %v3305_v43 = vsel %vm1273_vm5, %v11623_v38, %v11613_v18  ;;  %v11639_v44 = vunpack.i.h.bf16 %v13512_v52 }
 0x28e   : > { %10554 = vmatprep.subr.bf16.mxu1 %v10553_v26 }
 0x28f   : > { %10556 = vmatpush1.bf16.msra.mxu1 %v10555_v16  ;;  %v13539_v53 = vpop.permute.xlu1 %11646  ;;  %v3310_v16 = vsel %vm1273_vm5, %v11624_v36, %v11618_v40  ;;  %v11633_v36 = vunpack.i.l.bf16 %v13495_v59 }
 0x290   : > { %v13544_v28 = vpop.permute.xlu0 %11651  ;;  %10566 = vmatprep.subr.bf16.mxu1 %v13196_v19  ;;  %10085 = vmatmul.mubr.msk.f32.vlgmr.msra.gmra.mrb[4].mxu0 %vm1611_vm8, %v13534_v0  ;;  %v10623_v20 = vpack.c.bf16 %v3310_v16, %v3305_v43  ;;  %v11649_v33 = vunpack.i.h.bf16 %v13539_v53  ;;  %v11643_v43 = vunpack.i.l.bf16 %v13523_v51 }
 0x291   : > { %10620 = vmatpush1.bf16.msra.mxu0 %v10619_v15  ;;  %3105 = vmatprep.mubr.f32.mxu0 %v15885_v61  ;;  %v11654_v27 = vunpack.i.h.bf16 %v13544_v28 }
 0x292   : > { %10049 = vmatmul.mubr.msk.f32.vlgmr.msra.gmra.mrb[4].mxu1 %vm1611_vm8, %v13190_v1  ;;  %10622 = vmatprep.subr.bf16.mxu0 %v10621_v62  ;;  %v11634_v1 = vunpack.i.h.bf16 %v13495_v59  ;;  %v11644_v62 = vunpack.i.h.bf16 %v13523_v51  ;;  %v13736_v59 = vld [vmem:[%s15882_s30 + $0x78] sm:$0x3] }
 0x293   : > { %10568 = vmatpush1.bf16.msra.mxu1 %v13205_v60  ;;  %v11657_v19 = vpop.permute.xlu1 %11656  ;;  %1765 = vmatprep.mubr.f32.mxu1 %v15885_v61 }
 0x294   : > { %v13562_v11 = vpop.permute.xlu0 %11661  ;;  %v11659_v26 = vunpack.i.h.bf16 %v11657_v19  ;;  %v11658_v48 = vunpack.i.l.bf16 %v11657_v19  ;;  %10086 = vmatmul.mubr.msk.f32.gmra.mrb[6].mxu0 %vm1611_vm8, %v13553_v8 }
 0x295   : > { %3253 = vmatprep.mubr.f32.mxu0 %v15885_v61  ;;  %v11664_v2 = vunpack.i.h.bf16 %v13562_v11 }
 0x296   : > { %v2120_v60 = vsel %vm896_vm1, %v11504_v14, %v11659_v26  ;;  %v2115_v40 = vsel %vm896_vm1, %v11499_v5, %v11658_v48  ;;  %10050 = vmatmul.mubr.msk.f32.gmra.mrb[6].mxu1 %vm1611_vm8, %v13203_v35  ;;  %v2116_v18 = vsel %vm896_vm1, %v11658_v48, %v11513_v7  ;;  %v2121_v38 = vsel %vm896_vm1, %v11659_v26, %v11518_v24 }
 0x297   : > { %v13582_v15 = vpop.permute.xlu1 %11666  ;;  %1996 = vmatprep.mubr.f32.mxu1 %v15885_v61  ;;  %v10577_v14 = vpack.c.bf16 %v2121_v38, %v2116_v18  ;;  %v10579_v58 = vpack.c.bf16 %v2120_v60, %v2115_v40  ;;  %v11638_v5 = vunpack.i.l.bf16 %v13512_v52  ;;  %v10629_v35 = vpack.c.bf16 %v11639_v44, %v11634_v1 }
 0x298   : > { %v11672_v37 = vpop.permute.xlu0 %11671  ;;  %10089 = vmatmul.mubr.msk.f32.vlgmr.msra.gmra.mrb[0].mxu0 %vm1611_vm8, %v13534_v0  ;;  %v11648_v7 = vunpack.i.l.bf16 %v13539_v53  ;;  %v10108_v53 = vld [vmem:[%s15882_s30 + $0x88] sm:$0x3] }
 0x299   : > { %v11674_v9 = vunpack.i.h.bf16 %v11672_v37  ;;  %v11673_v24 = vunpack.i.l.bf16 %v11672_v37  ;;  %10624 = vmatpush1.bf16.msra.mxu0 %v10623_v20  ;;  %10578 = vmatprep.subr.bf16.mxu1 %v10577_v14  ;;  %v3314_v26 = vsel %vm1273_vm5, %v11638_v5, %v11639_v44  ;;  %v3309_v44 = vsel %vm1273_vm5, %v11633_v36, %v11634_v1  ;;  %v13646_v14 = vld [vmem:[%s15882_s30 + $0x68] sm:$0x3] }
 0x29a   : > { %10055 = vmatmul.mubr.msk.f32.vlgmr.msra.gmra.mrb[4].mxu1 %vm1611_vm8, %v13219_v31  ;;  %10630 = vmatprep.subr.bf16.mxu0 %v10629_v35  ;;  %v10631_v18 = vpack.c.bf16 %v3314_v26, %v3309_v44  ;;  %v3604_v1 = vsel %vm1374_vm6, %v11643_v43, %v11644_v62  ;;  %v3608_v35 = vsel %vm1374_vm6, %v11654_v27, %v11648_v7 }
 0x29b   : > { %10580 = vmatpush1.bf16.msra.mxu1 %v10579_v58  ;;  %v13595_v19 = vpop.permute.xlu1 %11676  ;;  %3259 = vmatprep.mubr.f32.mxu0 %v15885_v61  ;;  %v2414_v16 = vsel %vm987_vm2, %v11673_v24, %v11538_v30  ;;  %v2419_v31 = vsel %vm987_vm2, %v11674_v9, %v11543_v4  ;;  %v3609_v30 = vsel %vm1374_vm6, %v11648_v7, %v11649_v33 }
 0x29c   : > { %v13604_v48 = vpop.permute.xlu0 %11681  ;;  %2002 = vmatprep.mubr.f32.mxu1 %v15885_v61  ;;  %10090 = vmatmul.mubr.msk.f32.gmra.mrb[2].mxu0 %vm1611_vm8, %v13553_v8  ;;  %v10589_v60 = vpack.c.bf16 %v2419_v31, %v2414_v16  ;;  %v2413_v45 = vsel %vm987_vm2, %v11524_v13, %v11673_v24  ;;  %v2418_v4 = vsel %vm987_vm2, %v11529_v10, %v11674_v9  ;;  %v11653_v13 = vunpack.i.l.bf16 %v13544_v28 }
 0x29d   : > { %3397 = vmatprep.mubr.f32.mxu0 %v15885_v61  ;;  %v10633_v10 = vpack.c.bf16 %v3609_v30, %v3604_v1  ;;  %v10591_v20 = vpack.c.bf16 %v2418_v4, %v2413_v45  ;;  %v11669_v9 = vunpack.i.h.bf16 %v13582_v15  ;;  %v11679_v44 = vunpack.i.h.bf16 %v13595_v19 }
 0x29e   : > { %10056 = vmatmul.mubr.msk.f32.gmra.mrb[6].mxu1 %vm1611_vm8, %v13231_v34  ;;  %10590 = vmatprep.subr.bf16.mxu1 %v10589_v60  ;;  %v3603_v37 = vsel %vm1374_vm6, %v11653_v13, %v11643_v43  ;;  %v15892_v43 = vunpack.i.h.bf16 %v13385_v46  ;;  %v11678_v1 = vunpack.i.l.bf16 %v13595_v19  ;;  %v11663_v13 = vunpack.i.l.bf16 %v13562_v11 }
 0x29f   : > { %v13632_v40 = vpop.permute.xlu1 %11686  ;;  %2282 = vmatprep.mubr.f32.mxu1 %v15885_v61  ;;  %v10635_v30 = vpack.c.bf16 %v3608_v35, %v3603_v37  ;;  %v10641_v46 = vpack.c.bf16 %v11669_v9, %v11664_v2  ;;  %v15894_v37 = vunpack.i.h.bf16 %v13428_v12 }
 0x2a0   : > { %v11692_v22 = vpop.permute.xlu0 %11691  ;;  %10093 = vmatmul.mubr.msk.f32.vlgmr.msra.gmra.mrb[4].mxu0 %vm1611_vm8, %v13616_v21  ;;  %v3902_v47 = vsel %vm1475_vm7, %v11678_v1, %v11679_v44  ;;  %v11688_v12 = vunpack.i.l.bf16 %v13632_v40 }
 0x2a1   : > { %v11694_v34 = vunpack.i.h.bf16 %v11692_v22  ;;  %v11693_v38 = vunpack.i.l.bf16 %v11692_v22  ;;  %10632 = vmatpush1.bf16.msra.mxu0 %v10631_v18  ;;  %3403 = vmatprep.mubr.f32.mxu0 %v15885_v61  ;;  %v11684_v18 = vunpack.i.h.bf16 %v13604_v48 }
 0x2a2   : > { %10063 = vmatmul.mubr.msk.f32.vlgmr.msra.gmra.mrb[4].mxu1 %vm1611_vm8, %v13345_v56  ;;  %10634 = vmatprep.subr.bf16.mxu0 %v10633_v10  ;;  %v15890_v56 = vunpack.i.l.bf16 %v13416_v55  ;;  %v11668_v55 = vunpack.i.l.bf16 %v13582_v15 }
 0x2a3   : > { %10592 = vmatpush1.bf16.msra.mxu1 %v10591_v20  ;;  %v13650_v28 = vpop.permute.xlu1 %11696  ;;  %2288 = vmatprep.mubr.f32.mxu1 %v15885_v61  ;;  %v2712_v58 = vsel %vm1078_vm3, %v11693_v38, %v11563_v29  ;;  %v15891_v29 = vunpack.i.h.bf16 %v13381_v23  ;;  %v2716_v31 = vsel %vm1078_vm3, %v15892_v43, %v11694_v34  ;;  %v15893_v20 = vunpack.i.h.bf16 %v13418_v41 }
 0x2a4   : > { %v13659_v24 = vpop.permute.xlu0 %11701  ;;  %10094 = vmatmul.mubr.msk.f32.gmra.mrb[6].mxu0 %vm1611_vm8, %v13646_v14  ;;  %v2717_v16 = vsel %vm1078_vm3, %v11694_v34, %v15890_v56  ;;  %v3612_v11 = vsel %vm1374_vm6, %v11668_v55, %v11669_v9  ;;  %v11699_v43 = vunpack.i.h.bf16 %v13650_v28 }
 0x2a5   : > { %v10601_v26 = vpack.c.bf16 %v2717_v16, %v2712_v58  ;;  %3551 = vmatprep.mubr.f32.mxu0 %v15885_v61  ;;  %v2711_v7 = vsel %vm1078_vm3, %v15891_v29, %v11693_v38  ;;  %v11689_v16 = vunpack.i.h.bf16 %v13632_v40  ;;  %v3901_v29 = vsel %vm1475_vm7, %v11688_v12, %v11678_v1 }
 0x2a6   : > { %10064 = vmatmul.mubr.msk.f32.gmra.mrb[6].mxu1 %vm1611_vm8, %v13362_v49  ;;  %v11683_v49 = vunpack.i.l.bf16 %v13604_v48  ;;  %v10603_v27 = vpack.c.bf16 %v2716_v31, %v2711_v7  ;;  %v11704_v7 = vunpack.i.h.bf16 %v13659_v24  ;;  %v11703_v39 = vunpack.i.l.bf16 %v13659_v24 }
 0x2a7   : > { %10602 = vmatprep.subr.bf16.mxu1 %v10601_v26  ;;  %v11707_v60 = vpop.permute.xlu1 %11706  ;;  %2580 = vmatprep.mubr.f32.mxu1 %v15885_v61 }
 0x2a8   : > { %v11712_v45 = vpop.permute.xlu0 %11711  ;;  %v11709_v23 = vunpack.i.h.bf16 %v11707_v60  ;;  %v11708_v4 = vunpack.i.l.bf16 %v11707_v60  ;;  %10097 = vmatmul.mubr.msk.f32.vlgmr.msra.gmra.mrb[0].mxu0 %vm1611_vm8, %v13616_v21  ;;  %v3906_v40 = vsel %vm1475_vm7, %v11689_v16, %v11683_v49  ;;  %v10653_v54 = vpack.c.bf16 %v11704_v7, %v11699_v43 }
 0x2a9   : > { %10636 = vmatpush1.bf16.msra.mxu0 %v10635_v30  ;;  %3557 = vmatprep.mubr.f32.mxu0 %v15885_v61  ;;  %v11714_v10 = vunpack.i.h.bf16 %v11712_v45  ;;  %v11713_v34 = vunpack.i.l.bf16 %v11712_v45  ;;  %v10647_v60 = vpack.c.bf16 %v3906_v40, %v3901_v29 }
 0x2aa   : > { %10071 = vmatmul.mubr.msk.f32.vlgmr.msra.gmra.mrb[4].mxu1 %vm1611_vm8, %v13408_v3  ;;  %10642 = vmatprep.subr.bf16.mxu0 %v10641_v46  ;;  %v3010_v22 = vsel %vm1169_vm4, %v11708_v4, %v11588_v50  ;;  %v3015_v38 = vsel %vm1169_vm4, %v11709_v23, %v11593_v6  ;;  %v3907_v50 = vsel %vm1475_vm7, %v11683_v49, %v11684_v18 }
 0x2ab   : > { %10604 = vmatpush1.bf16.msra.mxu1 %v10603_v27  ;;  %2586 = vmatprep.mubr.f32.mxu1 %v15885_v61  ;;  %v10613_v3 = vpack.c.bf16 %v3015_v38, %v3010_v22  ;;  %v3607_v6 = vsel %vm1374_vm6, %v11663_v13, %v11664_v2  ;;  %v3009_v58 = vsel %vm1169_vm4, %v15893_v20, %v11708_v4  ;;  %v11717_v26 = vpop.permute.xlu1 %11716 }
 0x2ac   : > { %10098 = vmatmul.mubr.msk.f32.gmra.mrb[2].mxu0 %vm1611_vm8, %v13646_v14  ;;  %v3014_v35 = vsel %vm1169_vm4, %v15894_v37, %v11709_v23  ;;  %v10643_v9 = vpack.c.bf16 %v3612_v11, %v3607_v6  ;;  %v3308_v56 = vsel %vm1273_vm5, %v11713_v34, %v11633_v36  ;;  %v3313_v41 = vsel %vm1273_vm5, %v11714_v10, %v11638_v5  ;;  %v11722_v23 = vpop.permute.xlu0 %11721 }
 0x2ad   : > { %3695 = vmatprep.mubr.f32.mxu0 %v15885_v61  ;;  %10614 = vmatprep.subr.bf16.mxu1 %v10613_v3  ;;  %v10615_v2 = vpack.c.bf16 %v3014_v35, %v3009_v58  ;;  %v10625_v52 = vpack.c.bf16 %v3313_v41, %v3308_v56  ;;  %v11719_v5 = vunpack.i.h.bf16 %v11717_v26  ;;  %v11718_v36 = vunpack.i.l.bf16 %v11717_v26 }
 0x2ae   : > { %10072 = vmatmul.mubr.msk.f32.gmra.mrb[6].mxu1 %vm1611_vm8, %v13426_v17  ;;  %v10645_v17 = vpack.c.bf16 %v3907_v50, %v3902_v47  ;;  %v3312_v31 = vsel %vm1273_vm5, %v11619_v42, %v11714_v10  ;;  %v11724_v15 = vunpack.i.h.bf16 %v11722_v23 }
 0x2af   : > { %2878 = vmatprep.mubr.f32.mxu1 %v15885_v61  ;;  %v3606_v30 = vsel %vm1374_vm6, %v11718_v36, %v11663_v13  ;;  %v3611_v45 = vsel %vm1374_vm6, %v11719_v5, %v11668_v55  ;;  %v11723_v55 = vunpack.i.l.bf16 %v11722_v23  ;;  %v3605_v4 = vsel %vm1374_vm6, %v11644_v62, %v11718_v36 }
 0x2b0   : > { %10101 = vmatmul.mubr.msk.f32.vlgmr.msra.gmra.mrb[4].mxu0 %vm1611_vm8, %v13704_v63  ;;  %v10637_v42 = vpack.c.bf16 %v3611_v45, %v3606_v30  ;;  %v3610_v46 = vsel %vm1374_vm6, %v11649_v33, %v11719_v5  ;;  %v3909_v27 = vsel %vm1475_vm7, %v11724_v15, %v11703_v39  ;;  %v3908_v62 = vsel %vm1475_vm7, %v11684_v18, %v11724_v15 }
 0x2b1   : > { %10644 = vmatpush1.bf16.msra.mxu0 %v10643_v9  ;;  %3701 = vmatprep.mubr.f32.mxu0 %v15885_v61  ;;  %v10639_v51 = vpack.c.bf16 %v3610_v46, %v3605_v4  ;;  %v3903_v33 = vsel %vm1475_vm7, %v11679_v44, %v11723_v55  ;;  %v4345_v4 = vld [vmem:[%s15747_s19 + $0x8] sm:$0xff]  ;;  %v4348_v46 = vld [vmem:[%s15747_s19 + $0x20] sm:$0xff] }
 0x2b2   : > { %10079 = vmatmul.mubr.msk.f32.vlgmr.msra.gmra.mrb[4].mxu1 %vm1611_vm8, %v13462_v25  ;;  %10646 = vmatprep.subr.bf16.mxu0 %v10645_v17  ;;  %v3307_v25 = vsel %vm1273_vm5, %v11614_v57, %v11713_v34  ;;  %v11698_v57 = vunpack.i.l.bf16 %v13650_v28  ;;  %v3910_v28 = vsel %vm1475_vm7, %v11703_v39, %v11704_v7 }
 0x2b3   : > { %10616 = vmatpush1.bf16.msra.mxu1 %v10615_v2  ;;  %2884 = vmatprep.mubr.f32.mxu1 %v15885_v61 }
 0x2b4   : > { %10626 = vmatprep.subr.bf16.mxu1 %v10625_v52  ;;  %10102 = vmatmul.mubr.msk.f32.gmra.mrb[6].mxu0 %vm1611_vm8, %v13736_v59  ;;  %v3905_v24 = vsel %vm1475_vm7, %v11698_v57, %v11699_v43  ;;  %v3904_v1 = vsel %vm1475_vm7, %v11723_v55, %v11698_v57 }
 0x2b5   : > { %3849 = vmatprep.mubr.f32.mxu0 %v15885_v61  ;;  %v10655_v49 = vpack.c.bf16 %v3910_v28, %v3905_v24 }
 0x2b6   : > { %10080 = vmatmul.mubr.msk.f32.gmra.mrb[6].mxu1 %vm1611_vm8, %v13480_v32  ;;  %v10627_v32 = vpack.c.bf16 %v3312_v31, %v3307_v25 }
 0x2b7   : > { %3176 = vmatprep.mubr.f32.mxu1 %v15885_v61 }
 0x2b8   : > { %10105 = vmatmul.mubr.msk.f32.vlgmr.msra.gmra.mrb[0].mxu0 %vm1611_vm8, %v13704_v63 }
 0x2b9   : > { %10648 = vmatpush1.bf16.msra.mxu0 %v10647_v60  ;;  %3855 = vmatprep.mubr.f32.mxu0 %v15885_v61 }
 0x2ba   : > { %10087 = vmatmul.mubr.msk.f32.vlgmr.msra.gmra.mrb[4].mxu1 %vm1611_vm8, %v13534_v0  ;;  %10654 = vmatprep.subr.bf16.mxu0 %v10653_v54  ;;  %v10107_v0 = vld [vmem:[%s15882_s30 + $0x80] sm:$0xff]  ;;  %s15900_s30 = smov 99  }
 0x2bb   : > { %10628 = vmatpush1.bf16.msra.mxu1 %v10627_v32  ;;  %3182 = vmatprep.mubr.f32.mxu1 %v15885_v61 }
 0x2bc   : > { %10638 = vmatprep.subr.bf16.mxu1 %v10637_v42  ;;  %10106 = vmatmul.mubr.msk.f32.gmra.mrb[2].mxu0 %vm1611_vm8, %v13736_v59 }
 0x2bd   : > { %3993 = vmatprep.mubr.f32.mxu0 %v15885_v61  ;;  %v4182_v16 = vpop.permute.xlu0 %4181 }
 0x2be   : > { %10088 = vmatmul.mubr.msk.f32.gmra.mrb[6].mxu1 %vm1611_vm8, %v13553_v8  ;;  %v10649_v8 = vpack.c.bf16 %v3909_v27, %v3904_v1  ;;  %v10657_v1 = vpack.c.bf16 %v4348_v46, %v4345_v4  ;;  %v4347_v27 = vld [vmem:[%s15747_s19 + $0x18] sm:$0xff]  ;;  %v4549_v4 = vld [vmem:[%s15747_s19 + $0x668] sm:$0xff] }
 0x2bf   : > { %3474 = vmatprep.mubr.f32.mxu1 %v15885_v61 }
 0x2c0   : > { %10109 = vmatmul.mubr.msk.f32.vlgmr.msra.gmra.mrb[4].mxu0 %vm1611_vm8, %v10107_v0 }
 0x2c1   : > { %10656 = vmatpush1.bf16.msra.mxu0 %v10655_v49  ;;  %3999 = vmatprep.mubr.f32.mxu0 %v15885_v61  ;;  %v4344_v49 = vld [vmem:[%s15747_s19] sm:$0xff] }
 0x2c2   : > { %10095 = vmatmul.mubr.msk.f32.vlgmr.msra.gmra.mrb[4].mxu1 %vm1611_vm8, %v13616_v21  ;;  %v10651_v21 = vpack.c.bf16 %v3908_v62, %v3903_v33  ;;  %v4350_v62 = vld [vmem:[%s15747_s19 + $0x30] sm:$0xff] }
 0x2c3   : > { %10640 = vmatpush1.bf16.msra.mxu1 %v10639_v51  ;;  %3480 = vmatprep.mubr.f32.mxu1 %v15885_v61  ;;  %v4351_v51 = vld [vmem:[%s15747_s19 + $0x38] sm:$0xff] }
 0x2c4   : > { %10650 = vmatprep.subr.bf16.mxu1 %v10649_v8  ;;  %10110 = vmatmul.mubr.msk.f32.gmra.mrb[6].mxu0 %vm1611_vm8, %v10108_v53  ;;  %v10659_v8 = vpack.c.bf16 %v4347_v27, %v4344_v49  ;;  %v4371_v49 = vld [vmem:[%s15747_s19 + $0xd8] sm:$0xff]  ;;  %v4552_v27 = vld [vmem:[%s15747_s19 + $0x680] sm:$0xff] }
 0x2c5   : > { %4147 = vmatprep.mubr.f32.mxu0 %v15885_v61 }
 0x2c6   : > { %10096 = vmatmul.mubr.msk.f32.gmra.mrb[6].mxu1 %vm1611_vm8, %v13646_v14 }
 0x2c7   : > { %3772 = vmatprep.mubr.f32.mxu1 %v15885_v61 }
 0x2c8   : > { %10113 = vmatmul.mubr.msk.f32.vlgmr.msra.gmra.mrb[0].mxu0 %vm1611_vm8, %v10107_v0 }
 0x2c9   : > { %4153 = vmatprep.mubr.f32.mxu0 %v15885_v61 }
 0x2ca   : > { %10103 = vmatmul.mubr.msk.f32.vlgmr.msra.gmra.mrb[4].mxu1 %vm1611_vm8, %v13704_v63  ;;  %v4177_v63 = vpop.permute.xlu1 %4176 }
 0x2cb   : > { %10652 = vmatpush1.bf16.msra.mxu1 %v10651_v21  ;;  %3778 = vmatprep.mubr.f32.mxu1 %v15885_v61  ;;  %v4353_v21 = vld [vmem:[%s15747_s19 + $0x48] sm:$0xff] }
 0x2cc   : > { %10114 = vmatmul.mubr.msk.f32.gmra.mrb[2].mxu0 %vm1611_vm8, %v10108_v53  ;;  %10658 = vmatprep.subr.bf16.mxu1 %v10657_v1  ;;  %v4375_v1 = vld [vmem:[%s15747_s19 + $0xf8] sm:$0xff] }
 0x2cd   : > { %4802 = vmatprep.mubr.f32.mxu0 %v15885_v61 }
 0x2ce   : > { %10104 = vmatmul.mubr.msk.f32.gmra.mrb[6].mxu1 %vm1611_vm8, %v13736_v59 }
 0x2cf   : > { %4070 = vmatprep.mubr.f32.mxu1 %v15885_v61 }
 0x2d2   : > { %10111 = vmatmul.mubr.msk.f32.vlgmr.msra.gmra.mrb[4].mxu1 %vm1611_vm8, %v10107_v0 }
 0x2d3   : > { %4076 = vmatprep.mubr.f32.mxu1 %v15885_v61  ;;  %10660 = vmatpush1.bf16.msra.mxu1 %v10659_v8  ;;  %v4548_v8 = vld [vmem:[%s15747_s19 + $0x660] sm:$0xff] }
 0x2d6   : > { %10112 = vmatmul.mubr.msk.f32.gmra.mrb[6].mxu1 %vm1611_vm8, %v10108_v53  ;;  %v4354_v53 = vld [vmem:[%s15747_s19 + $0x50] sm:$0xff] }
 0x2d7   : > { %v10661_v33 = vpack.c.bf16 %v4354_v53, %v4351_v51  ;;  %v4378_v51 = vld [vmem:[%s15747_s19 + $0x110] sm:$0xff]  ;;  %v10793_v53 = vpack.c.bf16 %v4552_v27, %v4549_v4  ;;  %v4569_v27 = vld [vmem:[%s15747_s19 + $0x708] sm:$0xff] }
 0x2d9   : > { %10662 = vmatprep.subr.bf16.mxu1 %v10661_v33  ;;  %v4551_v33 = vld [vmem:[%s15747_s19 + $0x678] sm:$0xff] }
 0x35b   : > { %v1684_v19 = vpop.f32.mrb[0].mxu1 }
 0x35c   : > { %v1686_v48 = vpop.f32.mrb[1].mxu1 }
 0x35f   : > { %v1690_v14 = vpop.f32.mrb[2].mxu1 }
 0x360   : > { %v1692_v44 = vpop.f32.mrb[3].mxu1 }
 0x393   : > { %v3995_v18 = vpop.f32.mrb[4].mxu0 }
 0x394   : > { %v11195_v13 = vadd.f32 %v3995_v18, %v1684_v19  ;;  %v3997_v22 = vpop.f32.mrb[5].mxu0  ;;  %v4357_v19 = vld [vmem:[%s15747_s19 + $0x68] sm:$0xff]  ;;  %v4356_v18 = vld [vmem:[%s15747_s19 + $0x60] sm:$0xff] }
 0x395   : > { %v11196_v10 = vadd.f32 %v3997_v22, %v1686_v48  ;;  %v4360_v48 = vld [vmem:[%s15747_s19 + $0x80] sm:$0xff]  ;;  %v4363_v22 = vld [vmem:[%s15747_s19 + $0x98] sm:$0xff] }
 0x396   : > { %v13833_v12 = vadd.f32 %v11195_v13, %v4177_v63  ;;  %v4359_v13 = vld [vmem:[%s15747_s19 + $0x78] sm:$0xff] }
 0x397   : > { %v4001_v34 = vpop.f32.mrb[6].mxu0  ;;  %v13831_v41 = vadd.f32 %v11196_v10, %v4177_v63  ;;  %v4366_v10 = vld [vmem:[%s15747_s19 + $0xb0] sm:$0xff] }
 0x398   : > { %v11197_v38 = vadd.f32 %v4001_v34, %v1690_v14  ;;  %v4003_v11 = vpop.f32.mrb[7].mxu0  ;;  %v4196_v7 = vmax.f32 %v13833_v12, 0.0  ;;  %v10663_v14 = vpack.c.bf16 %v4353_v21, %v4350_v62  ;;  %v4537_v34 = vld [vmem:[%s15747_s19 + $0x608] sm:$0xff]  ;;  %v4555_v62 = vld [vmem:[%s15747_s19 + $0x698] sm:$0xff]  ;;  %v4558_v21 = vld [vmem:[%s15747_s19 + $0x6b0] sm:$0xff] }
 0x399   : > { %v11198_v3 = vadd.f32 %v4003_v11, %v1692_v44  ;;  %v4197_v36 = vmax.f32 %v13831_v41, 0.0  ;;  %v10665_v44 = vpack.c.bf16 %v4360_v48, %v4357_v19  ;;  %v10667_v11 = vpack.c.bf16 %v4359_v13, %v4356_v18  ;;  %v4374_v48 = vld [vmem:[%s15747_s19 + $0xf0] sm:$0xff]  ;;  %v4381_v13 = vld [vmem:[%s15747_s19 + $0x128] sm:$0xff] }
 0x39a   : > { %v13863_v54 = vadd.f32 %v11197_v38, %v4182_v16  ;;  %v4540_v38 = vld [vmem:[%s15747_s19 + $0x620] sm:$0xff]  ;;  %10664 = vmatpush1.bf16.msra.mxu1 %v10663_v14  ;;  %v4377_v14 = vld [vmem:[%s15747_s19 + $0x108] sm:$0xff]  ;;  %v10677_v18 = vpack.c.bf16 %v4378_v51, %v4375_v1  ;;  %v4566_v1 = vld [vmem:[%s15747_s19 + $0x6f0] sm:$0xff] }
 0x39b   : > { %v4149_v47 = vpop.f32.mrb[0].mxu0  ;;  %v13844_v40 = vadd.f32 %v11198_v3, %v4182_v16  ;;  %v4362_v3 = vld [vmem:[%s15747_s19 + $0x90] sm:$0xff]  ;;  %10666 = vmatprep.subr.bf16.mxu1 %v10665_v44  ;;  %v10795_v44 = vpack.c.bf16 %v4551_v33, %v4548_v8  ;;  %v4396_v51 = vld [vmem:[%s15747_s19 + $0x1a0] sm:$0xff] }
 0x39c   : > { %v13820_v50 = vadd.f32 %v4177_v63, %v4149_v47  ;;  %v4151_v6 = vpop.f32.mrb[1].mxu0  ;;  %v4202_v24 = vmax.f32 %v13863_v54, 0.0  ;;  %v4536_v47 = vld [vmem:[%s15747_s19 + $0x600] sm:$0xff] }
 0x39d   : > { %v13822_v20 = vadd.f32 %v4177_v63, %v4151_v6  ;;  %v4203_v32 = vmax.f32 %v13844_v40, 0.0  ;;  %v10669_v6 = vpack.c.bf16 %v4366_v10, %v4363_v22  ;;  %v10797_v22 = vpack.c.bf16 %v4558_v21, %v4555_v62  ;;  %v4554_v10 = vld [vmem:[%s15747_s19 + $0x690] sm:$0xff]  ;;  %v4576_v8 = vld [vmem:[%s15747_s19 + $0x740] sm:$0xff] }
 0x39e   : > { %v4200_v58 = vmax.f32 %v13820_v50, 0.0  ;;  %10668 = vmatpush1.bf16.msra.mxu1 %v10667_v11  ;;  %v4561_v11 = vld [vmem:[%s15747_s19 + $0x6c8] sm:$0xff]  ;;  %v4392_v62 = vld [vmem:[%s15747_s19 + $0x180] sm:$0xff]  ;;  %v10807_v21 = vpack.c.bf16 %v4569_v27, %v4566_v1  ;;  %v4419_v1 = vld [vmem:[%s15747_s19 + $0x258] sm:$0xff] }
 0x39f   : > { %v4201_v37 = vmax.f32 %v13822_v20, 0.0  ;;  %v4155_v35 = vpop.f32.mrb[2].mxu0  ;;  %10670 = vmatprep.subr.bf16.mxu1 %v10669_v6  ;;  %v4383_v6 = vld [vmem:[%s15747_s19 + $0x138] sm:$0xff]  ;;  %v5040_v54 = vld [vmem:[%s15897_s29] sm:$0xff] }
 0x3a0   : > { %v4157_v9 = vpop.f32.mrb[3].mxu0  ;;  %v13835_v17 = vadd.f32 %v4182_v16, %v4155_v35  ;;  %v4365_v35 = vld [vmem:[%s15747_s19 + $0xa8] sm:$0xff] }
 0x3a1   : > { %v11725_v56 = vpack.i.bf16 %v4201_v37, %v4200_v58  ;;  %v13837_v2 = vadd.f32 %v4182_v16, %v4157_v9  ;;  %v4369_v9 = vld [vmem:[%s15747_s19 + $0xc8] sm:$0xff] }
 0x3a2   : > { %v4206_v31 = vmax.f32 %v13835_v17, 0.0 }
 0x3a3   : > { %11726 = vrot.lane.b32.xlu1 %v11725_v56, %s15895_s0  ;;  %v4207_v60 = vmax.f32 %v13837_v2, 0.0  ;;  %v4539_v56 = vld [vmem:[%s15747_s19 + $0x618] sm:$0xff] }
 0x3a5   : > { %v4072_v26 = vpop.f32.mrb[4].mxu1  ;;  %v11740_v15 = vpack.i.bf16 %v4207_v60, %v4206_v31 }
 0x3a6   : > { %v13839_v59 = vadd.f32 %v4177_v63, %v4072_v26  ;;  %v4074_v52 = vpop.f32.mrb[5].mxu1  ;;  %v10787_v26 = vpack.c.bf16 %v4539_v56, %v4536_v47  ;;  %v4380_v47 = vld [vmem:[%s15747_s19 + $0x120] sm:$0xff]  ;;  %v4387_v56 = vld [vmem:[%s15747_s19 + $0x158] sm:$0xff] }
 0x3a7   : > { %v13841_v5 = vadd.f32 %v4177_v63, %v4074_v52  ;;  %v10785_v63 = vpack.c.bf16 %v4540_v38, %v4537_v34  ;;  %v4543_v52 = vld [vmem:[%s15747_s19 + $0x638] sm:$0xff]  ;;  %v4557_v34 = vld [vmem:[%s15747_s19 + $0x6a8] sm:$0xff]  ;;  %v4384_v38 = vld [vmem:[%s15747_s19 + $0x140] sm:$0xff] }
 0x3a8   : > { %v4198_v29 = vmax.f32 %v13839_v59, 0.0 }
 0x3a9   : > { %v4199_v43 = vmax.f32 %v13841_v5, 0.0  ;;  %v4078_v25 = vpop.f32.mrb[6].mxu1  ;;  %10786 = vmatprep.subr.bf16.mxu0 %v10785_v63  ;;  %v10679_v63 = vpack.c.bf16 %v4377_v14, %v4374_v48  ;;  %v4395_v48 = vld [vmem:[%s15747_s19 + $0x198] sm:$0xff]  ;;  %v5041_v5 = vld [vmem:[%s15897_s29 + $0x8] sm:$0x3]  ;;  %s15911_s29 = sld [smem:[#allocation3_spill]] }
 0x3aa   : > { %v11730_v30 = vpack.i.bf16 %v4198_v29, %v4197_v36  ;;  %v13855_v45 = vadd.f32 %v4182_v16, %v4078_v25  ;;  %v4080_v39 = vpop.f32.mrb[7].mxu1  ;;  %v4546_v25 = vld [vmem:[%s15747_s19 + $0x650] sm:$0xff]  ;;  %10788 = vmatpush1.bf16.msra.mxu0 %v10787_v26  ;;  %v4560_v26 = vld [vmem:[%s15747_s19 + $0x6c0] sm:$0xff] }
 0x3ab   : > { %v11735_v57 = vpack.i.bf16 %v4196_v7, %v4199_v43  ;;  %v13861_v23 = vadd.f32 %v4182_v16, %v4080_v39  ;;  %v4372_v16 = vld [vmem:[%s15747_s19 + $0xe0] sm:$0xff]  ;;  %v4542_v39 = vld [vmem:[%s15747_s19 + $0x630] sm:$0xff] }
 0x3ac   : > { %v4204_v42 = vmax.f32 %v13855_v45, 0.0  ;;  %11731 = vrot.lane.b32.xlu0 %v11730_v30, %s15895_s0  ;;  %v10789_v30 = vpack.c.bf16 %v4546_v25, %v4543_v52  ;;  %v10673_v46 = vpack.c.bf16 %v4372_v16, %v4369_v9  ;;  %v10681_v9 = vpack.c.bf16 %v4384_v38, %v4381_v13  ;;  %v4563_v52 = vld [vmem:[%s15747_s19 + $0x6d8] sm:$0xff]  ;;  %v4390_v25 = vld [vmem:[%s15747_s19 + $0x170] sm:$0xff] }
 0x3ad   : > { %11736 = vrot.lane.b32.xlu1 %v11735_v57, %s15895_s0  ;;  %v4205_v28 = vmax.f32 %v13861_v23, 0.0  ;;  %v4545_v57 = vld [vmem:[%s15747_s19 + $0x648] sm:$0xff]  ;;  %v10685_v4 = vpack.c.bf16 %v4390_v25, %v4387_v56  ;;  %v4399_v13 = vld [vmem:[%s15747_s19 + $0x1b8] sm:$0xff] }
 0x3ae   : > { %v11745_v55 = vpack.i.bf16 %v4204_v42, %v4203_v32  ;;  %10790 = vmatprep.subr.bf16.mxu0 %v10789_v30  ;;  %v4567_v30 = vld [vmem:[%s15747_s19 + $0x6f8] sm:$0xff]  ;;  %v5059_v23 = vld [vmem:[%s15898_s1 + $0x8] sm:$0x3] }
 0x3af   : > { %v11750_v0 = vpack.i.bf16 %v4202_v24, %v4205_v28  ;;  %v4407_v56 = vld [vmem:[%s15747_s19 + $0x1f8] sm:$0xff]  ;;  %s10320_s4 = sshll.u32 %s15911_s29, 4 }
 0x3b0   : > { %11741 = vrot.lane.b32.xlu0 %v11740_v15, %s15895_s0  ;;  %v10671_v15 = vpack.c.bf16 %v4365_v35, %v4362_v3  ;;  %v4564_v3 = vld [vmem:[%s15747_s19 + $0x6e0] sm:$0xff]  ;;  %v10799_v35 = vpack.c.bf16 %v4557_v34, %v4554_v10  ;;  %v10691_v10 = vpack.c.bf16 %v4395_v48, %v4392_v62  ;;  %v4423_v62 = vld [vmem:[%s15747_s19 + $0x278] sm:$0xff] }
 0x3b1   : > { %11746 = vrot.lane.b32.xlu1 %v11745_v55, %s15895_s0  ;;  %v4368_v55 = vld [vmem:[%s15747_s19 + $0xc0] sm:$0xff]  ;;  %v10801_v16 = vpack.c.bf16 %v4564_v3, %v4561_v11  ;;  %v4398_v11 = vld [vmem:[%s15747_s19 + $0x1b0] sm:$0xff]  ;;  %v4401_v3 = vld [vmem:[%s15747_s19 + $0x1c8] sm:$0xff] }
 0x3b2   : > { %10672 = vmatpush1.bf16.msra.mxu1 %v10671_v15  ;;  %v10675_v19 = vpack.c.bf16 %v4371_v49, %v4368_v55  ;;  %v4386_v15 = vld [vmem:[%s15747_s19 + $0x150] sm:$0xff]  ;;  %v4389_v55 = vld [vmem:[%s15747_s19 + $0x168] sm:$0xff] }
 0x3b3   : > { %10674 = vmatprep.subr.bf16.mxu1 %v10673_v46  ;;  %v4393_v46 = vld [vmem:[%s15747_s19 + $0x188] sm:$0xff]  ;;  %v10687_v33 = vpack.c.bf16 %v4389_v55, %v4386_v15  ;;  %v4420_v55 = vld [vmem:[%s15747_s19 + $0x260] sm:$0xff] }
 0x3b4   : > { %11751 = vrot.lane.b32.xlu0 %v11750_v0, %s15895_s0  ;;  %v10791_v0 = vpack.c.bf16 %v4545_v57, %v4542_v39  ;;  %v4570_v39 = vld [vmem:[%s15747_s19 + $0x710] sm:$0xff]  ;;  %v10683_v57 = vpack.c.bf16 %v4383_v6, %v4380_v47  ;;  %v4408_v47 = vld [vmem:[%s15747_s19 + $0x200] sm:$0xff]  ;;  %v10695_v6 = vpack.c.bf16 %v4401_v3, %v4398_v11  ;;  %v4417_v15 = vld [vmem:[%s15747_s19 + $0x248] sm:$0xff] }
 0x3b5   : > { %v10805_v49 = vpack.c.bf16 %v4570_v39, %v4567_v30  ;;  %v4410_v30 = vld [vmem:[%s15747_s19 + $0x210] sm:$0xff]  ;;  %v4413_v39 = vld [vmem:[%s15747_s19 + $0x228] sm:$0xff] }
 0x3b6   : > { %10792 = vmatpush1.bf16.msra.mxu0 %v10791_v0  ;;  %10676 = vmatpush1.bf16.msra.mxu1 %v10675_v19  ;;  %v10803_v0 = vpack.c.bf16 %v4563_v52, %v4560_v26  ;;  %v10689_v19 = vpack.c.bf16 %v4396_v51, %v4393_v46  ;;  %v4414_v26 = vld [vmem:[%s15747_s19 + $0x230] sm:$0xff] }
 0x3b7   : > { %10794 = vmatprep.subr.bf16.mxu0 %v10793_v53  ;;  %10678 = vmatprep.subr.bf16.mxu1 %v10677_v18  ;;  %v4573_v53 = vld [vmem:[%s15747_s19 + $0x728] sm:$0xff]  ;;  %v4575_v18 = vld [vmem:[%s15747_s19 + $0x738] sm:$0xff]  ;;  %v4582_v46 = vld [vmem:[%s15747_s19 + $0x770] sm:$0xff] }
 0x3b8   : > { %v10809_v14 = vpack.c.bf16 %v4576_v8, %v4573_v53  ;;  %v4578_v8 = vld [vmem:[%s15747_s19 + $0x750] sm:$0xff] }
 0x3ba   : > { %10796 = vmatpush1.bf16.msra.mxu0 %v10795_v44  ;;  %10680 = vmatpush1.bf16.msra.mxu1 %v10679_v63  ;;  %v4572_v44 = vld [vmem:[%s15747_s19 + $0x720] sm:$0xff]  ;;  %v4405_v63 = vld [vmem:[%s15747_s19 + $0x1e8] sm:$0xff] }
 0x3bb   : > { %10798 = vmatprep.subr.bf16.mxu0 %v10797_v22  ;;  %10682 = vmatprep.subr.bf16.mxu1 %v10681_v9  ;;  %v4402_v22 = vld [vmem:[%s15747_s19 + $0x1d0] sm:$0xff]  ;;  %v10811_v34 = vpack.c.bf16 %v4575_v18, %v4572_v44  ;;  %v4404_v9 = vld [vmem:[%s15747_s19 + $0x1e0] sm:$0xff]  ;;  %v4397_v18 = vld [vmem:[%s15747_s19 + $0x1a8] sm:$0xff] }
 0x3bc   : > { %v10693_v38 = vpack.c.bf16 %v4402_v22, %v4399_v13  ;;  %v10699_v52 = vpack.c.bf16 %v4407_v56, %v4404_v9  ;;  %v4394_v44 = vld [vmem:[%s15747_s19 + $0x190] sm:$0xff] }
 0x3bd   : > { %v10817_v22 = vpack.c.bf16 %v4397_v18, %v4394_v44 }
 0x3be   : > { %10800 = vmatpush1.bf16.msra.mxu0 %v10799_v35  ;;  %10684 = vmatpush1.bf16.msra.mxu1 %v10683_v57  ;;  %v10697_v35 = vpack.c.bf16 %v4408_v47, %v4405_v63  ;;  %v10703_v57 = vpack.c.bf16 %v4413_v39, %v4410_v30  ;;  %v4429_v63 = vld [vmem:[%s15747_s19 + $0x2a8] sm:$0xff]  ;;  %v4432_v47 = vld [vmem:[%s15747_s19 + $0x2c0] sm:$0xff]  ;;  %v4435_v30 = vld [vmem:[%s15747_s19 + $0x2d8] sm:$0xff] }
 0x3bf   : > { %10802 = vmatprep.subr.bf16.mxu0 %v10801_v16  ;;  %10686 = vmatprep.subr.bf16.mxu1 %v10685_v4  ;;  %v4411_v16 = vld [vmem:[%s15747_s19 + $0x218] sm:$0xff]  ;;  %v10705_v4 = vpack.c.bf16 %v4420_v55, %v4417_v15  ;;  %v10713_v20 = vpack.c.bf16 %v4432_v47, %v4429_v63  ;;  %v4438_v39 = vld [vmem:[%s15747_s19 + $0x2f0] sm:$0xff]  ;;  %v4400_v63 = vld [vmem:[%s15747_s19 + $0x1c0] sm:$0xff] }
 0x3c0   : > { %v10701_v25 = vpack.c.bf16 %v4414_v26, %v4411_v16  ;;  %v10717_v15 = vpack.c.bf16 %v4438_v39, %v4435_v30  ;;  %v4403_v47 = vld [vmem:[%s15747_s19 + $0x1d8] sm:$0xff]  ;;  %v4412_v30 = vld [vmem:[%s15747_s19 + $0x220] sm:$0xff] }
 0x3c1   : > { %v4415_v39 = vld [vmem:[%s15747_s19 + $0x238] sm:$0xff] }
 0x3c2   : > { %10804 = vmatpush1.bf16.msra.mxu0 %v10803_v0  ;;  %10688 = vmatpush1.bf16.msra.mxu1 %v10687_v33  ;;  %v4579_v0 = vld [vmem:[%s15747_s19 + $0x758] sm:$0xff]  ;;  %v4581_v33 = vld [vmem:[%s15747_s19 + $0x768] sm:$0xff] }
 0x3c3   : > { %10806 = vmatprep.subr.bf16.mxu0 %v10805_v49  ;;  %10690 = vmatprep.subr.bf16.mxu1 %v10689_v19  ;;  %v4416_v49 = vld [vmem:[%s15747_s19 + $0x240] sm:$0xff]  ;;  %v10813_v51 = vpack.c.bf16 %v4582_v46, %v4579_v0  ;;  %v10815_v48 = vpack.c.bf16 %v4581_v33, %v4578_v8  ;;  %v4434_v46 = vld [vmem:[%s15747_s19 + $0x2d0] sm:$0xff]  ;;  %v4441_v8 = vld [vmem:[%s15747_s19 + $0x308] sm:$0xff] }
 0x3c4   : > { %v10707_v53 = vpack.c.bf16 %v4419_v1, %v4416_v49  ;;  %v4437_v49 = vld [vmem:[%s15747_s19 + $0x2e8] sm:$0xff]  ;;  %v4444_v33 = vld [vmem:[%s15747_s19 + $0x320] sm:$0xff] }
 0x3c6   : > { %10808 = vmatpush1.bf16.msra.mxu0 %v10807_v21  ;;  %10692 = vmatpush1.bf16.msra.mxu1 %v10691_v10  ;;  %v4422_v10 = vld [vmem:[%s15747_s19 + $0x270] sm:$0xff] }
 0x3c7   : > { %10810 = vmatprep.subr.bf16.mxu0 %v10809_v14  ;;  %10694 = vmatprep.subr.bf16.mxu1 %v10693_v38  ;;  %v4426_v14 = vld [vmem:[%s15747_s19 + $0x290] sm:$0xff] }
 0x3c8   : > { %v10709_v13 = vpack.c.bf16 %v4426_v14, %v4423_v62 }
 0x3ca   : > { %10812 = vmatpush1.bf16.msra.mxu0 %v10811_v34  ;;  %10696 = vmatpush1.bf16.msra.mxu1 %v10695_v6  ;;  %v4425_v34 = vld [vmem:[%s15747_s19 + $0x288] sm:$0xff] }
 0x3cb   : > { %10698 = vmatprep.subr.bf16.mxu1 %v10697_v35  ;;  %10814 = vmatprep.subr.bf16.mxu0 %v10813_v51  ;;  %v10711_v3 = vpack.c.bf16 %v4425_v34, %v4422_v10  ;;  %v4431_v35 = vld [vmem:[%s15747_s19 + $0x2b8] sm:$0xff] }
 0x3ce   : > { %10700 = vmatpush1.bf16.msra.mxu1 %v10699_v52  ;;  %10816 = vmatpush1.bf16.msra.mxu0 %v10815_v48 }
 0x3cf   : > { %10702 = vmatprep.subr.bf16.mxu1 %v10701_v25  ;;  %10818 = vmatprep.subr.bf16.mxu0 %v10817_v22 }
 0x3d2   : > { %10704 = vmatpush1.bf16.msra.mxu1 %v10703_v57 }
 0x3d3   : > { %10706 = vmatprep.subr.bf16.mxu1 %v10705_v4 }
 0x3d6   : > { %10708 = vmatpush1.bf16.msra.mxu1 %v10707_v53 }
 0x3d7   : > { %10710 = vmatprep.subr.bf16.mxu1 %v10709_v13  ;;  %v10721_v13 = vpack.c.bf16 %v4444_v33, %v4441_v8  ;;  %v4367_v8 = vld [vmem:[%s15747_s19 + $0xb8] sm:$0xff] }
 0x3da   : > { %10712 = vmatpush1.bf16.msra.mxu1 %v10711_v3 }
 0x3db   : > { %10714 = vmatprep.subr.bf16.mxu1 %v10713_v20 }
 0x415   : > { %v14132_v27 = vpop.permute.xlu1 %11726 }
 0x416   : > { %v11729_v21 = vunpack.i.h.bf16 %v14132_v27  ;;  %v11728_v19 = vunpack.i.l.bf16 %v14132_v27  ;;  %v4349_v27 = vld [vmem:[%s15747_s19 + $0x28] sm:$0xff] }
 0x418   : > { %v4276_v38 = vmax.f32 %v4201_v37, %v11729_v21  ;;  %v4248_v11 = vsel %vm805_vm0, %v11728_v19, %v11729_v21  ;;  %v4428_v37 = vld [vmem:[%s15747_s19 + $0x2a0] sm:$0xff] }
 0x419   : > { %v14173_v6 = vmax.f32 %v4200_v58, %v4248_v11  ;;  %v10715_v56 = vpack.c.bf16 %v4431_v35, %v4428_v37 }
 0x41b   : > { %v11755_v9 = vpack.i.bf16 %v4276_v38, %v14173_v6  ;;  %10716 = vmatpush1.bf16.msra.mxu1 %v10715_v56  ;;  %v4352_v56 = vld [vmem:[%s15747_s19 + $0x40] sm:$0xff] }
 0x41c   : > { %10718 = vmatprep.subr.bf16.mxu1 %v10717_v15 }
 0x41d   : > { %11756 = vrot.lane.b32.xlu1 %v11755_v9, %s15896_s3  ;;  %v10821_v9 = vpack.c.bf16 %v4403_v47, %v4400_v63  ;;  %v4427_v63 = vld [vmem:[%s15747_s19 + $0x298] sm:$0xff] }
 0x41e   : > { %v11732_v50 = vpop.permute.xlu0 %11731 }
 0x41f   : > { %v11734_v58 = vunpack.i.h.bf16 %v11732_v50  ;;  %v11733_v16 = vunpack.i.l.bf16 %v11732_v50  ;;  %v11737_v26 = vpop.permute.xlu1 %11736  ;;  %v4355_v50 = vld [vmem:[%s15747_s19 + $0x58] sm:$0xff] }
 0x420   : > { %v11739_v52 = vunpack.i.h.bf16 %v11737_v26  ;;  %v11738_v25 = vunpack.i.l.bf16 %v11737_v26 }
 0x421   : > { %v4245_v57 = vsel %vm805_vm0, %v11733_v16, %v11734_v58 }
 0x422   : > { %v14192_v55 = vmax.f32 %v4197_v36, %v4245_v57  ;;  %v4246_v0 = vsel %vm805_vm0, %v11734_v58, %v11738_v25  ;;  %v11742_v4 = vpop.permute.xlu0 %11741  ;;  %v4244_v1 = vsel %vm805_vm0, %v11739_v52, %v11733_v16  ;;  %v4406_v58 = vld [vmem:[%s15747_s19 + $0x1f0] sm:$0xff]  ;;  %v4409_v16 = vld [vmem:[%s15747_s19 + $0x208] sm:$0xff] }
 0x423   : > { %v14204_v51 = vmax.f32 %v4198_v29, %v4246_v0  ;;  %v11744_v41 = vunpack.i.h.bf16 %v11742_v4  ;;  %v11743_v36 = vunpack.i.l.bf16 %v11742_v4  ;;  %v11747_v53 = vpop.permute.xlu1 %11746  ;;  %v10719_v29 = vpack.c.bf16 %v4437_v49, %v4434_v46  ;;  %v4358_v52 = vld [vmem:[%s15747_s19 + $0x70] sm:$0xff]  ;;  %v4440_v49 = vld [vmem:[%s15747_s19 + $0x300] sm:$0xff] }
 0x424   : > { %v11749_v62 = vunpack.i.h.bf16 %v11747_v53  ;;  %v11748_v21 = vunpack.i.l.bf16 %v11747_v53  ;;  %v14217_v14 = vmax.f32 %v4196_v7, %v4244_v1  ;;  %v10825_v26 = vpack.c.bf16 %v4409_v16, %v4406_v58  ;;  %v4443_v1 = vld [vmem:[%s15747_s19 + $0x318] sm:$0xff]  ;;  %v4364_v53 = vld [vmem:[%s15747_s19 + $0xa0] sm:$0xff] }
 0x425   : > { %v4253_v48 = vsel %vm805_vm0, %v11743_v36, %v11744_v41  ;;  %v11760_v59 = vpack.i.bf16 %v14204_v51, %v14192_v55  ;;  %10720 = vmatpush1.bf16.msra.mxu1 %v10719_v29  ;;  %v4277_v12 = vmax.f32 %v4207_v60, %v11744_v41  ;;  %v4247_v60 = vsel %vm805_vm0, %v11738_v25, %v11728_v19  ;;  %v4361_v25 = vld [vmem:[%s15747_s19 + $0x88] sm:$0xff]  ;;  %v4450_v29 = vld [vmem:[%s15747_s19 + $0x350] sm:$0xff] }
 0x426   : > { %v14221_v44 = vmax.f32 %v4206_v31, %v4253_v48  ;;  %v11752_v18 = vpop.permute.xlu0 %11751  ;;  %v4250_v22 = vsel %vm805_vm0, %v11748_v21, %v11749_v62  ;;  %10722 = vmatprep.subr.bf16.mxu1 %v10721_v13  ;;  %v14256_v45 = vmax.f32 %v4199_v43, %v4247_v60  ;;  %v5058_v43 = vld [vmem:[%s15898_s1] sm:$0xff]  ;;  %v10827_v4 = vpack.c.bf16 %v4361_v25, %v4358_v52  ;;  %v4418_v13 = vld [vmem:[%s15747_s19 + $0x250] sm:$0xff]  ;;  %v4379_v52 = vld [vmem:[%s15747_s19 + $0x118] sm:$0xff]  ;;  %s15902_s1 = smov 72  }
 0x427   : > { %v11754_v10 = vunpack.i.h.bf16 %v11752_v18  ;;  %v11753_v34 = vunpack.i.l.bf16 %v11752_v18  ;;  %11761 = vrot.lane.b32.xlu0 %v11760_v59, %s15896_s3  ;;  %v14232_v7 = vmax.f32 %v4203_v32, %v4250_v22  ;;  %v10829_v46 = vpack.c.bf16 %v4415_v39, %v4412_v30  ;;  %v4447_v59 = vld [vmem:[%s15747_s19 + $0x338] sm:$0xff]  ;;  %v4421_v22 = vld [vmem:[%s15747_s19 + $0x268] sm:$0xff]  ;;  %v4462_v30 = vld [vmem:[%s15747_s19 + $0x3b0] sm:$0xff] }
 0x428   : > { %v11765_v38 = vpack.i.bf16 %v14221_v44, %v14217_v14  ;;  %v10723_v18 = vpack.c.bf16 %v4443_v1, %v4440_v49  ;;  %v10725_v60 = vpack.c.bf16 %v4450_v29, %v4447_v59  ;;  %v4430_v39 = vld [vmem:[%s15747_s19 + $0x2b0] sm:$0xff]  ;;  %v4461_v49 = vld [vmem:[%s15747_s19 + $0x3a8] sm:$0xff] }
 0x429   : > { %v4251_v17 = vsel %vm805_vm0, %v11749_v62, %v11753_v34  ;;  %v4249_v31 = vsel %vm805_vm0, %v11754_v10, %v11748_v21  ;;  %v4252_v32 = vsel %vm805_vm0, %v11753_v34, %v11743_v36  ;;  %v10831_v34 = vpack.c.bf16 %v4367_v8, %v4364_v53  ;;  %v4385_v53 = vld [vmem:[%s15747_s19 + $0x148] sm:$0xff] }
 0x42a   : > { %v14237_v11 = vmax.f32 %v4204_v42, %v4251_v17  ;;  %11766 = vrot.lane.b32.xlu1 %v11765_v38, %s15896_s3  ;;  %v14248_v40 = vmax.f32 %v4202_v24, %v4249_v31  ;;  %v14260_v42 = vmax.f32 %v4205_v28, %v4252_v32  ;;  %v4346_v24 = vld [vmem:[%s15747_s19 + $0x10] sm:$0xff]  ;;  %v4465_v8 = vld [vmem:[%s15747_s19 + $0x3c8] sm:$0xff] }
 0x42b   : > { %4312 = vrot.lane.b32.xlu0 %v4277_v12, %s15896_s3  ;;  %v10819_v37 = vpack.c.bf16 %v4349_v27, %v4346_v24  ;;  %v4446_v38 = vld [vmem:[%s15747_s19 + $0x330] sm:$0xff]  ;;  %v4449_v12 = vld [vmem:[%s15747_s19 + $0x348] sm:$0xff]  ;;  %v4456_v24 = vld [vmem:[%s15747_s19 + $0x380] sm:$0xff] }
 0x42c   : > { %v11770_v2 = vpack.i.bf16 %v14237_v11, %v14232_v7  ;;  %v4370_v32 = vld [vmem:[%s15747_s19 + $0xd0] sm:$0xff]  ;;  %v10727_v27 = vpack.c.bf16 %v4449_v12, %v4446_v38  ;;  %v4493_v12 = vld [vmem:[%s15747_s19 + $0x4a8] sm:$0xff] }
 0x42d   : > { %v4490_v38 = vld [vmem:[%s15747_s19 + $0x490] sm:$0xff] }
 0x42e   : > { %11771 = vrot.lane.b32.xlu1 %v11770_v2, %s15896_s3 }
 0x42f   : > { %4302 = vrot.lane.b32.xlu0 %v14248_v40, %s15896_s3 }
 0x432   : > { %4296 = vrot.lane.b32.xlu1 %v14256_v45, %s15896_s3 }
 0x433   : > { %4308 = vrot.lane.b32.xlu0 %v14260_v42, %s15896_s3 }
 0x436   : > { %5044 = vperm.xlu1 %11484, %v5040_v54   ;;  %v4373_v54 = vld [vmem:[%s15747_s19 + $0xe8] sm:$0xff] }
 0x437   : > { %5049 = vperm.xlu0 %11483, %v5041_v5  }
 0x43a   : > { %5062 = vperm.xlu1 %11484, %v5058_v43  }
 0x43b   : > { %5067 = vperm.xlu0 %11483, %v5059_v23   ;;  %v10833_v23 = vpack.c.bf16 %v4421_v22, %v4418_v13  ;;  %v4467_v13 = vld [vmem:[%s15747_s19 + $0x3d8] sm:$0xff] }
 0x48f   : > { %v14278_v28 = vpop.permute.xlu1 %11756 }
 0x490   : > { %v11759_v19 = vunpack.i.h.bf16 %v14278_v28  ;;  %v11758_v3 = vunpack.i.l.bf16 %v14278_v28 }
 0x492   : > { %v4318_v20 = vsel %vm987_vm2, %v11758_v3, %v11759_v19  ;;  %v4424_v19 = vld [vmem:[%s15747_s19 + $0x280] sm:$0xff] }
 0x493   : > { %v14298_v35 = vmax.f32 %v14173_v6, %v4318_v20  ;;  %v10823_v6 = vpack.c.bf16 %v4355_v50, %v4352_v56  ;;  %v4455_v56 = vld [vmem:[%s15747_s19 + $0x378] sm:$0xff] }
 0x495   : > { %4803 = vmatmul.mubr.f32.vlgmr.msra.gmra.mrb[8].mxu0 %v14298_v35 }
 0x496   : > { %10820 = vmatpush3.bf16.msra.mxu0 %v10819_v37  ;;  %4808 = vmatprep.mubr.f32.mxu0 %v15885_v61  ;;  %v10835_v37 = vpack.c.bf16 %v4373_v54, %v4370_v32  ;;  %v4474_v32 = vld [vmem:[%s15747_s19 + $0x410] sm:$0xff] }
 0x497   : > { %10822 = vmatprep.subr.bf16.mxu0 %v10821_v9  ;;  %v4452_v9 = vld [vmem:[%s15747_s19 + $0x360] sm:$0xff] }
 0x498   : > { %v10731_v28 = vpack.c.bf16 %v4455_v56, %v4452_v9 }
 0x499   : > { %v14326_v57 = vpop.permute.xlu0 %11761 }
 0x49a   : > { %v11764_v15 = vunpack.i.h.bf16 %v14326_v57  ;;  %v11763_v0 = vunpack.i.l.bf16 %v14326_v57  ;;  %10824 = vmatpush3.bf16.msra.mxu0 %v10823_v6 }
 0x49b   : > { %10826 = vmatprep.subr.bf16.mxu0 %v10825_v26  ;;  %v4376_v26 = vld [vmem:[%s15747_s19 + $0x100] sm:$0xff] }
 0x49c   : > { %v14336_v41 = vpop.permute.xlu1 %11766  ;;  %v4315_v36 = vsel %vm987_vm2, %v11763_v0, %v11764_v15 }
 0x49d   : > { %v11769_v33 = vunpack.i.h.bf16 %v14336_v41  ;;  %v11768_v62 = vunpack.i.l.bf16 %v14336_v41  ;;  %v4313_v21 = vpop.permute.xlu0 %4312  ;;  %v4335_v48 = vmax.f32 %v14192_v55, %v4315_v36  ;;  %v4382_v36 = vld [vmem:[%s15747_s19 + $0x130] sm:$0xff]  ;;  %v4531_v41 = vld [vmem:[%s15747_s19 + $0x5d8] sm:$0xff] }
 0x49e   : > { %10828 = vmatpush3.bf16.msra.mxu0 %v10827_v4  ;;  %v10843_v29 = vpack.c.bf16 %v4385_v53, %v4382_v36  ;;  %v4489_v53 = vld [vmem:[%s15747_s19 + $0x488] sm:$0xff] }
 0x49f   : > { %v4314_v55 = vsel %vm987_vm2, %v11768_v62, %v11763_v0  ;;  %v4323_v10 = vsel %vm987_vm2, %v11769_v33, %v4313_v21  ;;  %4648 = vmatprep.mubr.f32.mxu1 %v4335_v48  ;;  %10830 = vmatprep.subr.bf16.mxu0 %v10829_v46  ;;  %v4433_v0 = vld [vmem:[%s15747_s19 + $0x2c8] sm:$0xff]  ;;  %v4458_v46 = vld [vmem:[%s15747_s19 + $0x390] sm:$0xff]  ;;  %v4468_v62 = vld [vmem:[%s15747_s19 + $0x3e0] sm:$0xff] }
 0x4a0   : > { %v14373_v17 = vmax.f32 %v14217_v14, %v4314_v55  ;;  %v14376_v31 = vmax.f32 %v14221_v44, %v4323_v10  ;;  %v14378_v2 = vpop.permute.xlu1 %11771  ;;  %v4453_v44 = vld [vmem:[%s15747_s19 + $0x368] sm:$0xff]  ;;  %v4436_v21 = vld [vmem:[%s15747_s19 + $0x2e0] sm:$0xff]  ;;  %v10735_v59 = vpack.c.bf16 %v4461_v49, %v4458_v46  ;;  %v10737_v22 = vpack.c.bf16 %v4468_v62, %v4465_v8 }
 0x4a1   : > { %v11774_v5 = vunpack.i.h.bf16 %v14378_v2  ;;  %v11773_v43 = vunpack.i.l.bf16 %v14378_v2  ;;  %v4303_v14 = vpop.permute.xlu0 %4302  ;;  %v10729_v6 = vpack.c.bf16 %v4456_v24, %v4453_v44  ;;  %v4388_v10 = vld [vmem:[%s15747_s19 + $0x160] sm:$0xff]  ;;  %v4470_v44 = vld [vmem:[%s15747_s19 + $0x3f0] sm:$0xff]  ;;  %v4473_v24 = vld [vmem:[%s15747_s19 + $0x408] sm:$0xff] }
 0x4a2   : > { %4649 = vmatmul.mubr.f32.vlgmr.msra.gmra.mrb[8].mxu1 %v14373_v17  ;;  %4809 = vmatmul.mubr.f32.gmra.mrb[10].mxu0 %v14376_v31  ;;  %v10743_v9 = vpack.c.bf16 %v4473_v24, %v4470_v44  ;;  %v4492_v8 = vld [vmem:[%s15747_s19 + $0x4a0] sm:$0xff]  ;;  %v4469_v44 = vld [vmem:[%s15747_s19 + $0x3e8] sm:$0xff] }
 0x4a3   : > { %v4319_v47 = vsel %vm987_vm2, %v4303_v14, %v11773_v43  ;;  %10724 = vmatpush1.bf16.msra.mxu1 %v10723_v18  ;;  %10832 = vmatpush3.bf16.msra.mxu0 %v10831_v34  ;;  %v4320_v20 = vsel %vm987_vm2, %v11773_v43, %v11774_v5  ;;  %v4464_v18 = vld [vmem:[%s15747_s19 + $0x3c0] sm:$0xff]  ;;  %v4391_v34 = vld [vmem:[%s15747_s19 + $0x178] sm:$0xff]  ;;  %v10849_v14 = vpack.c.bf16 %v4493_v12, %v4490_v38  ;;  %v4517_v38 = vld [vmem:[%s15747_s19 + $0x568] sm:$0xff] }
 0x4a4   : > { %v14413_v50 = vmax.f32 %v14248_v40, %v4319_v47  ;;  %4879 = vmatprep.mubr.f32.mxu0 %v4335_v48  ;;  %v14415_v58 = vpop.permute.xlu1 %4296  ;;  %10726 = vmatprep.subr.bf16.mxu1 %v10725_v60  ;;  %v14418_v16 = vmax.f32 %v14232_v7, %v4320_v20  ;;  %v4459_v40 = vld [vmem:[%s15747_s19 + $0x398] sm:$0xff]  ;;  %v10837_v7 = vpack.c.bf16 %v4427_v63, %v4424_v19  ;;  %v4445_v19 = vld [vmem:[%s15747_s19 + $0x328] sm:$0xff]  ;;  %v4480_v47 = vld [vmem:[%s15747_s19 + $0x440] sm:$0xff] }
 0x4a5   : > { %v4317_v25 = vsel %vm987_vm2, %v14415_v58, %v11758_v3  ;;  %10834 = vmatprep.subr.bf16.mxu0 %v10833_v23  ;;  %v10839_v3 = vpack.c.bf16 %v4379_v52, %v4376_v26  ;;  %v10733_v1 = vpack.c.bf16 %v4462_v30, %v4459_v40  ;;  %v4439_v48 = vld [vmem:[%s15747_s19 + $0x2f8] sm:$0xff]  ;;  %v10739_v54 = vpack.c.bf16 %v4467_v13, %v4464_v18  ;;  %v4477_v63 = vld [vmem:[%s15747_s19 + $0x428] sm:$0xff]  ;;  %v4496_v20 = vld [vmem:[%s15747_s19 + $0x4c0] sm:$0xff] }
 0x4a6   : > { %v14443_v4 = vmax.f32 %v14256_v45, %v4317_v25  ;;  %4654 = vmatprep.mubr.f32.mxu1 %v14418_v16  ;;  %v10841_v45 = vpack.c.bf16 %v4433_v0, %v4430_v39  ;;  %v10845_v55 = vpack.c.bf16 %v4439_v48, %v4436_v21  ;;  %v4471_v60 = vld [vmem:[%s15747_s19 + $0x3f8] sm:$0xff]  ;;  %v10847_v43 = vpack.c.bf16 %v4391_v34, %v4388_v10  ;;  %v4476_v26 = vld [vmem:[%s15747_s19 + $0x420] sm:$0xff]  ;;  %v4486_v39 = vld [vmem:[%s15747_s19 + $0x470] sm:$0xff] }
 0x4a7   : > { %10728 = vmatpush1.bf16.msra.mxu1 %v10727_v27  ;;  %10836 = vmatpush3.bf16.msra.mxu0 %v10835_v37  ;;  %v10741_v23 = vpack.c.bf16 %v4474_v32, %v4471_v60  ;;  %v4442_v27 = vld [vmem:[%s15747_s19 + $0x310] sm:$0xff]  ;;  %v4499_v37 = vld [vmem:[%s15747_s19 + $0x4d8] sm:$0xff]  ;;  %v4448_v40 = vld [vmem:[%s15747_s19 + $0x340] sm:$0xff] }
 0x4a8   : > { %4655 = vmatmul.mubr.f32.gmra.mrb[10].mxu1 %v14413_v50  ;;  %10730 = vmatprep.subr.bf16.mxu1 %v10729_v6  ;;  %v10851_v56 = vpack.c.bf16 %v4445_v19, %v4442_v27  ;;  %v10745_v6 = vpack.c.bf16 %v4480_v47, %v4477_v63  ;;  %v4479_v52 = vld [vmem:[%s15747_s19 + $0x438] sm:$0xff]  ;;  %v10853_v25 = vpack.c.bf16 %v4499_v37, %v4496_v20  ;;  %v4502_v0 = vld [vmem:[%s15747_s19 + $0x4f0] sm:$0xff]  ;;  %v4508_v62 = vld [vmem:[%s15747_s19 + $0x520] sm:$0xff] }
 0x4a9   : > { %4725 = vmatprep.mubr.f32.mxu1 %v14443_v4  ;;  %10838 = vmatprep.subr.bf16.mxu0 %v10837_v7  ;;  %v4451_v7 = vld [vmem:[%s15747_s19 + $0x358] sm:$0xff]  ;;  %v4460_v13 = vld [vmem:[%s15747_s19 + $0x3a0] sm:$0xff]  ;;  %v4498_v10 = vld [vmem:[%s15747_s19 + $0x4d0] sm:$0xff] }
 0x4aa   : > { %v4483_v30 = vld [vmem:[%s15747_s19 + $0x458] sm:$0xff]  ;;  %v10855_v46 = vpack.c.bf16 %v4451_v7, %v4448_v40  ;;  %v4514_v34 = vld [vmem:[%s15747_s19 + $0x550] sm:$0xff]  ;;  %v4501_v24 = vld [vmem:[%s15747_s19 + $0x4e8] sm:$0xff] }
 0x4ab   : > { %10732 = vmatpush1.bf16.msra.mxu1 %v10731_v28  ;;  %10840 = vmatpush3.bf16.msra.mxu0 %v10839_v3  ;;  %v4505_v28 = vld [vmem:[%s15747_s19 + $0x508] sm:$0xff]  ;;  %v10747_v3 = vpack.c.bf16 %v4479_v52, %v4476_v26  ;;  %v10749_v49 = vpack.c.bf16 %v4486_v39, %v4483_v30  ;;  %v4511_v21 = vld [vmem:[%s15747_s19 + $0x538] sm:$0xff]  ;;  %v4504_v27 = vld [vmem:[%s15747_s19 + $0x500] sm:$0xff] }
 0x4ac   : > { %10734 = vmatprep.subr.bf16.mxu1 %v10733_v1  ;;  %10842 = vmatprep.subr.bf16.mxu0 %v10841_v45  ;;  %v4485_v1 = vld [vmem:[%s15747_s19 + $0x468] sm:$0xff]  ;;  %v4454_v45 = vld [vmem:[%s15747_s19 + $0x370] sm:$0xff]  ;;  %v10857_v36 = vpack.c.bf16 %v4505_v28, %v4502_v0  ;;  %v4491_v18 = vld [vmem:[%s15747_s19 + $0x498] sm:$0xff]  ;;  %v10761_v37 = vpack.c.bf16 %v4504_v27, %v4501_v24 }
 0x4ad   : > { %v4520_v19 = vld [vmem:[%s15747_s19 + $0x580] sm:$0xff]  ;;  %v4523_v63 = vld [vmem:[%s15747_s19 + $0x598] sm:$0xff]  ;;  %v4526_v7 = vld [vmem:[%s15747_s19 + $0x5b0] sm:$0xff] }
 0x4ae   : > { %v10869_v26 = vpack.c.bf16 %v4523_v63, %v4520_v19  ;;  %v4475_v52 = vld [vmem:[%s15747_s19 + $0x418] sm:$0xff]  ;;  %v4529_v30 = vld [vmem:[%s15747_s19 + $0x5c8] sm:$0xff] }
 0x4af   : > { %10736 = vmatpush1.bf16.msra.mxu1 %v10735_v59  ;;  %10844 = vmatpush3.bf16.msra.mxu0 %v10843_v29  ;;  %v10753_v29 = vpack.c.bf16 %v4492_v8, %v4489_v53  ;;  %v4507_v40 = vld [vmem:[%s15747_s19 + $0x518] sm:$0xff]  ;;  %v4533_v2 = vld [vmem:[%s15747_s19 + $0x5e8] sm:$0xff] }
 0x4b0   : > { %10738 = vmatprep.subr.bf16.mxu1 %v10737_v22  ;;  %10846 = vmatprep.subr.bf16.mxu0 %v10845_v55  ;;  %v10861_v22 = vpack.c.bf16 %v4511_v21, %v4508_v62  ;;  %v4495_v55 = vld [vmem:[%s15747_s19 + $0x4b8] sm:$0xff] }
 0x4b1   : > { %v10757_v32 = vpack.c.bf16 %v4498_v10, %v4495_v55  ;;  %v4535_v53 = vld [vmem:[%s15747_s19 + $0x5f8] sm:$0xff]  ;;  %v4541_v55 = vld [vmem:[%s15747_s19 + $0x628] sm:$0xff] }
 0x4b2   : > { %v4547_v24 = vld [vmem:[%s15747_s19 + $0x658] sm:$0xff] }
 0x4b3   : > { %10740 = vmatpush1.bf16.msra.mxu1 %v10739_v54  ;;  %10848 = vmatpush3.bf16.msra.mxu0 %v10847_v43  ;;  %v4494_v54 = vld [vmem:[%s15747_s19 + $0x4b0] sm:$0xff]  ;;  %v4497_v43 = vld [vmem:[%s15747_s19 + $0x4c8] sm:$0xff] }
 0x4b4   : > { %10850 = vmatprep.subr.bf16.mxu0 %v10849_v14  ;;  %10742 = vmatprep.subr.bf16.mxu1 %v10741_v23  ;;  %v4466_v14 = vld [vmem:[%s15747_s19 + $0x3d0] sm:$0xff]  ;;  %v10865_v23 = vpack.c.bf16 %v4517_v38, %v4514_v34  ;;  %v10759_v47 = vpack.c.bf16 %v4497_v43, %v4494_v54  ;;  %v4309_v34 = vpop.permute.xlu0 %4308  ;;  %v4525_v43 = vld [vmem:[%s15747_s19 + $0x5a8] sm:$0xff] }
 0x4b5   : > { %v10867_v20 = vpack.c.bf16 %v4469_v44, %v4466_v14  ;;  %v4316_v14 = vsel %vm987_vm2, %v11764_v15, %v14415_v58  ;;  %v4544_v44 = vld [vmem:[%s15747_s19 + $0x640] sm:$0xff]  ;;  %v4322_v27 = vsel %vm987_vm2, %v4309_v34, %v11769_v33  ;;  %v4527_v58 = vld [vmem:[%s15747_s19 + $0x5b8] sm:$0xff]  ;;  %v4321_v33 = vsel %vm987_vm2, %v11774_v5, %v4309_v34 }
 0x4b6   : > { %4880 = vmatmul.mubr.f32.vlgmr.msra.gmra.mrb[12].mxu0 %v14373_v17  ;;  %v4482_v17 = vld [vmem:[%s15747_s19 + $0x450] sm:$0xff]  ;;  %v4524_v15 = vld [vmem:[%s15747_s19 + $0x5a0] sm:$0xff]  ;;  %v4336_v19 = vmax.f32 %v14204_v51, %v4316_v14  ;;  %v4341_v5 = vmax.f32 %v14237_v11, %v4321_v33 }
 0x4b7   : > { %10744 = vmatpush1.bf16.msra.mxu1 %v10743_v9  ;;  %4884 = vmatprep.mubr.f32.mxu0 %v14418_v16  ;;  %v4457_v16 = vld [vmem:[%s15747_s19 + $0x388] sm:$0xff]  ;;  %v10751_v48 = vpack.c.bf16 %v4485_v1, %v4482_v17  ;;  %v4500_v9 = vld [vmem:[%s15747_s19 + $0x4e0] sm:$0xff]  ;;  %v10873_v17 = vpack.c.bf16 %v4529_v30, %v4526_v7  ;;  %v4550_v51 = vld [vmem:[%s15747_s19 + $0x670] sm:$0xff] }
 0x4b8   : > { %10852 = vmatpush3.bf16.msra.mxu0 %v10851_v56  ;;  %10746 = vmatprep.subr.bf16.mxu1 %v10745_v6  ;;  %v10859_v59 = vpack.c.bf16 %v4457_v16, %v4454_v45  ;;  %v4503_v56 = vld [vmem:[%s15747_s19 + $0x4f8] sm:$0xff]  ;;  %v4472_v6 = vld [vmem:[%s15747_s19 + $0x400] sm:$0xff]  ;;  %v4481_v1 = vld [vmem:[%s15747_s19 + $0x448] sm:$0xff] }
 0x4b9   : > { %10854 = vmatprep.subr.bf16.mxu0 %v10853_v25  ;;  %v4510_v25 = vld [vmem:[%s15747_s19 + $0x530] sm:$0xff]  ;;  %v10763_v39 = vpack.c.bf16 %v4503_v56, %v4500_v9  ;;  %v10871_v0 = vpack.c.bf16 %v4475_v52, %v4472_v6  ;;  %v4513_v45 = vld [vmem:[%s15747_s19 + $0x548] sm:$0xff]  ;;  %v4532_v16 = vld [vmem:[%s15747_s19 + $0x5e0] sm:$0xff]  ;;  %v10779_v56 = vpack.c.bf16 %v4527_v58, %v4524_v15 }
 0x4ba   : > { %4885 = vmatmul.mubr.f32.gmra.mrb[14].mxu0 %v14413_v50  ;;  %v4488_v50 = vld [vmem:[%s15747_s19 + $0x480] sm:$0xff]  ;;  %v10765_v28 = vpack.c.bf16 %v4510_v25, %v4507_v40  ;;  %v4553_v9 = vld [vmem:[%s15747_s19 + $0x688] sm:$0xff]  ;;  %v4559_v40 = vld [vmem:[%s15747_s19 + $0x6b8] sm:$0xff] }
 0x4bb   : > { %10748 = vmatpush1.bf16.msra.mxu1 %v10747_v3  ;;  %4954 = vmatprep.mubr.f32.mxu0 %v14443_v4  ;;  %v4463_v4 = vld [vmem:[%s15747_s19 + $0x3b8] sm:$0xff]  ;;  %v10755_v12 = vpack.c.bf16 %v4491_v18, %v4488_v50  ;;  %v4506_v3 = vld [vmem:[%s15747_s19 + $0x510] sm:$0xff]  ;;  %v10877_v50 = vpack.c.bf16 %v4535_v53, %v4532_v16  ;;  %v4556_v52 = vld [vmem:[%s15747_s19 + $0x6a0] sm:$0xff] }
 0x4bc   : > { %10856 = vmatpush3.bf16.msra.mxu0 %v10855_v46  ;;  %10750 = vmatprep.subr.bf16.mxu1 %v10749_v49  ;;  %v10863_v60 = vpack.c.bf16 %v4463_v4, %v4460_v13  ;;  %v4509_v46 = vld [vmem:[%s15747_s19 + $0x528] sm:$0xff]  ;;  %v4478_v49 = vld [vmem:[%s15747_s19 + $0x430] sm:$0xff]  ;;  %v4487_v18 = vld [vmem:[%s15747_s19 + $0x478] sm:$0xff]  ;;  %v10893_v11 = vpack.c.bf16 %v4559_v40, %v4556_v52 }
 0x4bd   : > { %10858 = vmatprep.subr.bf16.mxu0 %v10857_v36  ;;  %v4516_v36 = vld [vmem:[%s15747_s19 + $0x560] sm:$0xff]  ;;  %v10767_v8 = vpack.c.bf16 %v4509_v46, %v4506_v3  ;;  %v10875_v62 = vpack.c.bf16 %v4481_v1, %v4478_v49  ;;  %v4519_v13 = vld [vmem:[%s15747_s19 + $0x578] sm:$0xff]  ;;  %v4538_v4 = vld [vmem:[%s15747_s19 + $0x610] sm:$0xff] }
 0x4be   : > { %v10769_v21 = vpack.c.bf16 %v4516_v36, %v4513_v45  ;;  %v10881_v54 = vpack.c.bf16 %v4541_v55, %v4538_v4  ;;  %v4562_v7 = vld [vmem:[%s15747_s19 + $0x6d0] sm:$0xff]  ;;  %v4565_v30 = vld [vmem:[%s15747_s19 + $0x6e8] sm:$0xff]  ;;  %v4583_v1 = vld [vmem:[%s15747_s19 + $0x778] sm:$0xff] }
 0x4bf   : > { %10752 = vmatpush1.bf16.msra.mxu1 %v10751_v48  ;;  %v4512_v48 = vld [vmem:[%s15747_s19 + $0x540] sm:$0xff]  ;;  %v4574_v3 = vld [vmem:[%s15747_s19 + $0x730] sm:$0xff]  ;;  %v4577_v46 = vld [vmem:[%s15747_s19 + $0x748] sm:$0xff] }
 0x4c0   : > { %10860 = vmatpush3.bf16.msra.mxu0 %v10859_v59  ;;  %10754 = vmatprep.subr.bf16.mxu1 %v10753_v29  ;;  %v4515_v59 = vld [vmem:[%s15747_s19 + $0x558] sm:$0xff]  ;;  %v4484_v29 = vld [vmem:[%s15747_s19 + $0x460] sm:$0xff]  ;;  %v10905_v49 = vpack.c.bf16 %v4577_v46, %v4574_v3 }
 0x4c1   : > { %10862 = vmatprep.subr.bf16.mxu0 %v10861_v22  ;;  %v4522_v22 = vld [vmem:[%s15747_s19 + $0x590] sm:$0xff]  ;;  %v10771_v10 = vpack.c.bf16 %v4515_v59, %v4512_v48  ;;  %v10879_v38 = vpack.c.bf16 %v4487_v18, %v4484_v29 }
 0x4c3   : > { %10756 = vmatpush1.bf16.msra.mxu1 %v10755_v12  ;;  %v10773_v12 = vpack.c.bf16 %v4522_v22, %v4519_v13 }
 0x4c4   : > { %10864 = vmatpush3.bf16.msra.mxu0 %v10863_v60  ;;  %10758 = vmatprep.subr.bf16.mxu1 %v10757_v32  ;;  %v4518_v60 = vld [vmem:[%s15747_s19 + $0x570] sm:$0xff]  ;;  %v4521_v32 = vld [vmem:[%s15747_s19 + $0x588] sm:$0xff] }
 0x4c5   : > { %10866 = vmatprep.subr.bf16.mxu0 %v10865_v23  ;;  %v4528_v23 = vld [vmem:[%s15747_s19 + $0x5c0] sm:$0xff]  ;;  %v10775_v57 = vpack.c.bf16 %v4521_v32, %v4518_v60  ;;  %v5045_v32 = vpop.permute.xlu1 %5044 }
 0x4c6   : > { %v10777_v63 = vpack.c.bf16 %v4528_v23, %v4525_v43 }
 0x4c7   : > { %10760 = vmatpush1.bf16.msra.mxu1 %v10759_v47  ;;  %v10885_v47 = vpack.c.bf16 %v4547_v24, %v4544_v44 }
 0x4c8   : > { %10868 = vmatpush3.bf16.msra.mxu0 %v10867_v20  ;;  %10762 = vmatprep.subr.bf16.mxu1 %v10761_v37  ;;  %v4342_v20 = vmax.f32 %v14260_v42, %v4322_v27  ;;  %v4534_v37 = vld [vmem:[%s15747_s19 + $0x5f0] sm:$0xff] }
 0x4c9   : > { %10870 = vmatprep.subr.bf16.mxu0 %v10869_v26  ;;  %v4530_v42 = vld [vmem:[%s15747_s19 + $0x5d0] sm:$0xff]  ;;  %v10781_v6 = vpack.c.bf16 %v4534_v37, %v4531_v41  ;;  %v10889_v26 = vpack.c.bf16 %v4553_v9, %v4550_v51  ;;  %v5063_v58 = vpop.permute.xlu1 %5062 }
 0x4ca   : > { %v10783_v25 = vpack.c.bf16 %v4533_v2, %v4530_v42 }
 0x4cb   : > { %10764 = vmatpush1.bf16.msra.mxu1 %v10763_v39  ;;  %v10897_v39 = vpack.c.bf16 %v4565_v30, %v4562_v7 }
 0x4cc   : > { %10872 = vmatpush3.bf16.msra.mxu0 %v10871_v0  ;;  %10766 = vmatprep.subr.bf16.mxu1 %v10765_v28  ;;  %v4571_v0 = vld [vmem:[%s15747_s19 + $0x718] sm:$0xff] }
 0x4cd   : > { %10874 = vmatprep.subr.bf16.mxu0 %v10873_v17  ;;  %v4580_v17 = vld [vmem:[%s15747_s19 + $0x760] sm:$0xff] }
 0x4ce   : > { %v10909_v45 = vpack.c.bf16 %v4583_v1, %v4580_v17 }
 0x4cf   : > { %10768 = vmatpush1.bf16.msra.mxu1 %v10767_v8 }
 0x4d0   : > { %10876 = vmatpush3.bf16.msra.mxu0 %v10875_v62  ;;  %10770 = vmatprep.subr.bf16.mxu1 %v10769_v21 }
 0x4d1   : > { %10878 = vmatprep.subr.bf16.mxu0 %v10877_v50 }
 0x4d3   : > { %10772 = vmatpush1.bf16.msra.mxu1 %v10771_v10 }
 0x4d4   : > { %10880 = vmatpush3.bf16.msra.mxu0 %v10879_v38  ;;  %10774 = vmatprep.subr.bf16.mxu1 %v10773_v12 }
 0x4d5   : > { %10882 = vmatprep.subr.bf16.mxu0 %v10881_v54 }
 0x4d7   : > { %4955 = vmatmul.mubr.f32.vlgmr.msra.gmra.mrb[16].mxu0 %v4336_v19  ;;  %10776 = vmatpush1.bf16.msra.mxu1 %v10775_v57 }
 0x4d8   : > { %4959 = vmatprep.mubr.f32.mxu0 %v4342_v20  ;;  %10884 = vmatpush3.bf16.msra.mxu0 %v10881_v54  ;;  %v5050_v54 = vpop.permute.xlu0 %5049 }
 0x4d9   : > { %10778 = vmatprep.subr.bf16.mxu1 %v10777_v63  ;;  %10886 = vmatprep.subr.bf16.mxu0 %v10885_v47 }
 0x4db   : > { %4960 = vmatmul.mubr.f32.gmra.mrb[18].mxu0 %v4341_v5  ;;  %10780 = vmatpush1.bf16.msra.mxu1 %v10779_v56 }
 0x4dc   : > { %10888 = vmatpush3.bf16.msra.mxu0 %v10885_v47  ;;  %10483 = vmatprep.mubr.f32.mxu0 %v14298_v35  ;;  %v4568_v35 = vld [vmem:[%s15747_s19 + $0x700] sm:$0xff] }
 0x4dd   : > { %10782 = vmatprep.subr.bf16.mxu1 %v10781_v6  ;;  %10890 = vmatprep.subr.bf16.mxu0 %v10889_v26  ;;  %v10901_v28 = vpack.c.bf16 %v4571_v0, %v4568_v35  ;;  %v6780_v35 = vld [vmem:[%s15904_s8] sm:$0xff] }
 0x4df   : > { %10784 = vmatpush1.bf16.msra.mxu1 %v10783_v25  ;;  %v14797_v25 = vld [vmem:[%s15899_s7 + $0x10] sm:$0xff] }
 0x4e0   : > { %10892 = vmatpush3.bf16.msra.mxu0 %v10889_v26 }
 0x4e1   : > { %10894 = vmatprep.subr.bf16.mxu0 %v10893_v11 }
 0x4e2   : > { %4726 = vmatmul.mubr.f32.vlgmr.msra.gmra.mrb[8].mxu1 %v4336_v19  ;;  %v5068_v19 = vpop.permute.xlu0 %5067 }
 0x4e3   : > { %4731 = vmatprep.mubr.f32.mxu1 %v4342_v20 }
 0x4e4   : > { %10896 = vmatpush3.bf16.msra.mxu0 %v10893_v11 }
 0x4e5   : > { %10898 = vmatprep.subr.bf16.mxu0 %v10897_v39 }
 0x4e6   : > { %4732 = vmatmul.mubr.f32.gmra.mrb[10].mxu1 %v4341_v5 }
 0x4e7   : > { %5184 = vmatprep.mubr.f32.mxu1 %v15885_v61 }
 0x4e8   : > { %10900 = vmatpush3.bf16.msra.mxu0 %v10897_v39  ;;  %v6781_v39 = vld [vmem:[%s15904_s8 + $0x8] sm:$0x3] }
 0x4e9   : > { %10902 = vmatprep.subr.bf16.mxu0 %v10901_v28 }
 0x4ec   : > { %10904 = vmatpush3.bf16.msra.mxu0 %v10901_v28 }
 0x4ed   : > { %10906 = vmatprep.subr.bf16.mxu0 %v10905_v49 }
 0x4f0   : > { %10908 = vmatpush3.bf16.msra.mxu0 %v10905_v49 }
 0x4f1   : > { %10910 = vmatprep.subr.bf16.mxu0 %v10909_v45 }
 0x4f4   : > { %10912 = vmatpush3.bf16.msra.mxu0 %v10909_v45  ;;  %v10241_v45 = vld [vmem:[%s15907_s9 + $0x88] sm:$0xff] }
 0x4f7   : > { %10484 = vmatmul.mubr.f32.vlgmr.msra.gmra.mrb[20].mxu0 %v14376_v31 }
 0x4f8   : > { %10490 = vmatprep.mubr.msk.f32.mxu0 %vm5106_vm9, %v14797_v25 }
 0x568   : > { %v4804_v36 = vpop.f32.mrb[8].mxu0 }
 0x569   : > { %v4806_v16 = vpop.f32.mrb[9].mxu0 }
 0x575   : > { %v4810_v53 = vpop.f32.mrb[10].mxu0 }
 0x576   : > { %v4812_v8 = vpop.f32.mrb[11].mxu0 }
 0x589   : > { %v10353_v62 = vpop.f32.mrb[12].mxu0 }
 0x58a   : > { %v10354_v21 = vpop.f32.mrb[13].mxu0 }
 0x58b   : > { %v10355_v48 = vadd.f32 %v10354_v21, %v10353_v62 }
 0x58d   : > { %v10356_v59 = vpop.f32.mrb[14].mxu0 }
 0x58e   : > { %v10357_v29 = vpop.f32.mrb[15].mxu0 }
 0x58f   : > { %v10358_v50 = vadd.f32 %v10357_v29, %v10356_v59  ;;  %v10116_v59 = vld [vmem:[%s15899_s7 + $0x18] sm:$0x3] }
 0x5aa   : > { %v10391_v18 = vpop.f32.mrb[16].mxu0 }
 0x5ab   : > { %v10392_v13 = vpop.f32.mrb[17].mxu0 }
 0x5ac   : > { %v10393_v22 = vadd.f32 %v10392_v13, %v10391_v18 }
 0x5ae   : > { %v10394_v4 = vpop.f32.mrb[18].mxu0  ;;  %v4957_v55 = vadd.f32 %v10393_v22, %v10355_v48 }
 0x5af   : > { %v10395_v10 = vpop.f32.mrb[19].mxu0 }
 0x5b0   : > { %v10396_v34 = vadd.f32 %v10395_v10, %v10394_v4  ;;  %v5076_v10 = vld [vmem:[%s15899_s7] sm:$0xff] }
 0x5b2   : > { %v4962_v38 = vadd.f32 %v10396_v34, %v10358_v50 }
 0x5b5   : > { %v4727_v12 = vpop.f32.mrb[8].mxu1 }
 0x5b6   : > { %v11199_v31 = vadd.f32 %v4804_v36, %v4727_v12  ;;  %v4729_v60 = vpop.f32.mrb[9].mxu1 }
 0x5b7   : > { %v11200_v43 = vadd.f32 %v4806_v16, %v4729_v60 }
 0x5b8   : > { %v5052_v23 = vmul.f32 %v11199_v31, %v5045_v32 }
 0x5b9   : > { %v4733_v14 = vpop.f32.mrb[10].mxu1  ;;  %v5053_v27 = vmul.f32 %v11200_v43, %v5045_v32 }
 0x5ba   : > { %v11201_v44 = vadd.f32 %v4810_v53, %v4733_v14  ;;  %v4735_v24 = vpop.f32.mrb[11].mxu1  ;;  %v14780_v47 = vadd.f32 %v5063_v58, %v5052_v23 }
 0x5bb   : > { %v11202_v57 = vadd.f32 %v4812_v8, %v4735_v24  ;;  %v14784_v33 = vadd.f32 %v5063_v58, %v5053_v27 }
 0x5bc   : > { %v5055_v15 = vmul.f32 %v11201_v44, %v5050_v54 }
 0x5bd   : > { %v5056_v63 = vmul.f32 %v11202_v57, %v5050_v54 }
 0x5be   : > { %v14782_v41 = vadd.f32 %v5068_v19, %v5055_v15  ;;  %v5077_v15 = vld [vmem:[%s15899_s7 + $0x8] sm:$0x3] }
 0x5bf   : > { %v14786_v20 = vadd.f32 %v5068_v19, %v5056_v63 }
 0x5c0   : > { %v11785_v37 = vpack.i.bf16 %v14782_v41, %v14780_v47  ;;  %v10928_v9 = vpack.c.bf16 %v14782_v41, %v14780_v47  ;;  %v10131_v47 = vld [vmem:[%s15899_s7 + $0x20] sm:$0xff] }
 0x5c1   : > { %v10925_v51 = vpack.c.bf16 %v14786_v20, %v14784_v33 }
 0x5ca   : > { %v10485_v56 = vpop.f32.mrb[20].mxu0 }
 0x5cb   : > { %v5037_v42 = vadd.f32 %v10485_v56, %v4962_v38  ;;  %v5031_v2 = vpop.f32.mrb[21].mxu0 }
 0x5cc   : > { %v5032_v5 = vadd.f32 %v5031_v2, %v4957_v55 }
 0x5cd   : > { %v5057_v6 = vmul.f32 %v5050_v54, %v5037_v42 }
 0x5ce   : > { %v5054_v26 = vmul.f32 %v5045_v32, %v5032_v5 }
 0x5cf   : > { %v5075_v52 = vadd.f32 %v5068_v19, %v5057_v6 }
 0x5d0   : > { %v5072_v40 = vadd.f32 %v5063_v58, %v5054_v26 }
 0x5d1   : > { %v11775_v11 = vpack.i.bf16 %v5075_v52, %v14786_v20 }
 0x5d2   : > { %v11780_v7 = vpack.i.bf16 %v5072_v40, %v14784_v33  ;;  %v10931_v30 = vpack.c.bf16 %v5075_v52, %v5072_v40  ;;  %v10132_v40 = vld [vmem:[%s15899_s7 + $0x28] sm:$0x3] }
 0x5d3   : > { %11776 = vrot.lane.b32.xlu0 %v11775_v11, %s15895_s0 }
 0x5d4   : > { %11781 = vrot.lane.b32.xlu1 %v11780_v7, %s15895_s0 }
 0x5d7   : > { %11796 = vrot.lane.b32.xlu0 %v11780_v7, %s15887_s23 }
 0x5d8   : > { %11786 = vrot.lane.b32.xlu1 %v11785_v37, %s15895_s0 }
 0x5db   : > { %11801 = vrot.lane.b32.xlu0 %v11785_v37, %s15887_s23 }
 0x5dc   : > { %11791 = vrot.lane.b32.xlu1 %v11775_v11, %s15887_s23 }
 0x5df   : > { %11806 = vrot.lane.b32.xlu0 %v11775_v11, %s15896_s3 }
 0x5e0   : > { %11811 = vrot.lane.b32.xlu1 %v11780_v7, %s15896_s3 }
 0x5e3   : > { %11826 = vrot.lane.b32.xlu0 %v11780_v7, %s15900_s30 }
 0x5e4   : > { %11816 = vrot.lane.b32.xlu1 %v11785_v37, %s15896_s3 }
 0x5e7   : > { %11831 = vrot.lane.b32.xlu0 %v11785_v37, %s15900_s30 }
 0x5e8   : > { %11821 = vrot.lane.b32.xlu1 %v11775_v11, %s15900_s30 }
 0x5eb   : > { %11836 = vrot.lane.b32.xlu0 %v11775_v11, %s15901_s2 }
 0x5ec   : > { %11841 = vrot.lane.b32.xlu1 %v11780_v7, %s15901_s2 }
 0x5ef   : > { %11856 = vrot.lane.b32.xlu0 %v11780_v7, %s15902_s1 }
 0x5f0   : > { %11846 = vrot.lane.b32.xlu1 %v11785_v37, %s15901_s2 }
 0x5f3   : > { %11861 = vrot.lane.b32.xlu0 %v11785_v37, %s15902_s1 }
 0x5f4   : > { %11851 = vrot.lane.b32.xlu1 %v11775_v11, %s15902_s1 }
 0x5f7   : > { %11866 = vrot.lane.b32.xlu0 %v11775_v11, %s15903_s5 }
 0x5f8   : > { %11871 = vrot.lane.b32.xlu1 %v11780_v7, %s15903_s5 }
 0x5fb   : > { %11886 = vrot.lane.b32.xlu0 %v11780_v7, %s15888_s26 }
 0x5fc   : > { %11876 = vrot.lane.b32.xlu1 %v11785_v37, %s15903_s5 }
 0x5ff   : > { %11891 = vrot.lane.b32.xlu0 %v11785_v37, %s15888_s26 }
 0x600   : > { %11881 = vrot.lane.b32.xlu1 %v11775_v11, %s15888_s26 }
 0x603   : > { %6789 = vperm.xlu0 %11483, %v6781_v39   ;;  %v10140_v39 = vld [vmem:[%s15899_s7 + $0x30] sm:$0xff] }
 0x604   : > { %6784 = vperm.xlu1 %11484, %v6780_v35  }
 0x645   : > { %v11777_v0 = vpop.permute.xlu0 %11776 }
 0x646   : > { %v11779_v28 = vunpack.i.h.bf16 %v11777_v0  ;;  %v11778_v3 = vunpack.i.l.bf16 %v11777_v0  ;;  %v11782_v46 = vpop.permute.xlu1 %11781 }
 0x647   : > { %v11784_v49 = vunpack.i.h.bf16 %v11782_v46  ;;  %v11783_v17 = vunpack.i.l.bf16 %v11782_v46 }
 0x648   : > { %v5102_v1 = vsel %vm805_vm0, %v11778_v3, %v11779_v28 }
 0x649   : > { %v5100_v36 = vsel %vm805_vm0, %v11783_v17, %v11784_v49  ;;  %v10919_v16 = vpack.c.bf16 %v11779_v28, %v11784_v49  ;;  %v11797_v53 = vpop.permute.xlu0 %11796 }
 0x64a   : > { %v10913_v8 = vpack.c.bf16 %v5102_v1, %v5100_v36  ;;  %v11787_v62 = vpop.permute.xlu1 %11786  ;;  %v11799_v29 = vunpack.i.h.bf16 %v11797_v53  ;;  %v11798_v50 = vunpack.i.l.bf16 %v11797_v53 }
 0x64b   : > { %v11789_v21 = vunpack.i.h.bf16 %v11787_v62  ;;  %v11788_v48 = vunpack.i.l.bf16 %v11787_v62  ;;  %10921 = vmatprep.subr.msk.bf16.mxu0 %vm14835_vm12, %v10919_v16 }
 0x64c   : > { %10915 = vmatprep.subr.msk.bf16.mxu1 %vm14835_vm12, %v10913_v8  ;;  %10924 = vmatpush3.bf16.msk.msra.mxu0 %vm14835_vm12, %v10919_v16  ;;  %v5452_v12 = vsel %vm896_vm1, %v11798_v50, %v11799_v29 }
 0x64d   : > { %v5101_v18 = vsel %vm805_vm0, %v11789_v21, %v11778_v3  ;;  %v5099_v13 = vsel %vm805_vm0, %v11788_v48, %v11783_v17  ;;  %10933 = vmatprep.subr.msk.bf16.mxu0 %vm14835_vm12, %v10931_v30  ;;  %v11802_v22 = vpop.permute.xlu0 %11801  ;;  %v10141_v48 = vld [vmem:[%s15899_s7 + $0x38] sm:$0x3] }
 0x64e   : > { %v10916_v4 = vpack.c.bf16 %v5101_v18, %v5099_v13  ;;  %v11792_v55 = vpop.permute.xlu1 %11791  ;;  %v11803_v54 = vunpack.i.l.bf16 %v11802_v22  ;;  %v11804_v44 = vunpack.i.h.bf16 %v11802_v22 }
 0x64f   : > { %v11794_v34 = vunpack.i.h.bf16 %v11792_v55  ;;  %v11793_v38 = vunpack.i.l.bf16 %v11792_v55  ;;  %10491 = vmatmul.mubr.msk.f32.vlgmr.msra.gmra.mrb[22].mxu0 %vm5106_vm9, %v10116_v59 }
 0x650   : > { %10918 = vmatpush1.bf16.msk.msra.mxu1 %vm14835_vm12, %v10916_v4  ;;  %10936 = vmatpush3.bf16.msk.msra.mxu0 %vm14835_vm12, %v10931_v30  ;;  %v5451_v63 = vsel %vm896_vm1, %v11803_v54, %v11798_v50  ;;  %v10150_v54 = vld [vmem:[%s15899_s7 + $0x48] sm:$0x3] }
 0x651   : > { %v10943_v31 = vpack.c.bf16 %v11794_v34, %v11799_v29  ;;  %v5454_v60 = vsel %vm896_vm1, %v11793_v38, %v11794_v34  ;;  %v11807_v32 = vpop.permute.xlu0 %11806  ;;  %10927 = vmatprep.subr.msk.bf16.mxu1 %vm14835_vm12, %v10925_v51  ;;  %10497 = vmatprep.mubr.msk.f32.mxu0 %vm5106_vm9, %v5076_v10  ;;  %v5453_v41 = vsel %vm896_vm1, %v11804_v44, %v11793_v38  ;;  %v10149_v29 = vld [vmem:[%s15899_s7 + $0x40] sm:$0xff] }
 0x652   : > { %v10937_v43 = vpack.c.bf16 %v5454_v60, %v5452_v12  ;;  %v11809_v14 = vunpack.i.h.bf16 %v11807_v32  ;;  %v11812_v23 = vpop.permute.xlu1 %11811  ;;  %v11808_v24 = vunpack.i.l.bf16 %v11807_v32 }
 0x653   : > { %v11814_v27 = vunpack.i.h.bf16 %v11812_v23  ;;  %v11813_v57 = vunpack.i.l.bf16 %v11812_v23  ;;  %10119 = vmatmul.mubr.msk.f32.vlgmr.msra.gmra.mrb[12].mxu1 %vm5106_vm9, %v14797_v25  ;;  %10945 = vmatprep.subr.msk.bf16.mxu0 %vm14835_vm12, %v10943_v31  ;;  %v10158_v23 = vld [vmem:[%s15899_s7 + $0x50] sm:$0xff] }
 0x654   : > { %10930 = vmatpush1.bf16.msk.msra.mxu1 %vm14835_vm12, %v10928_v9  ;;  %5190 = vmatprep.mubr.f32.mxu1 %v15885_v61  ;;  %v5646_v20 = vsel %vm987_vm2, %v11808_v24, %v11809_v14  ;;  %v10940_v9 = vpack.c.bf16 %v5453_v41, %v5451_v63 }
 0x655   : > { %v10955_v58 = vpack.c.bf16 %v11809_v14, %v11814_v27  ;;  %v11827_v19 = vpop.permute.xlu0 %11826  ;;  %10939 = vmatprep.subr.msk.bf16.mxu1 %vm14835_vm12, %v10937_v43  ;;  %v5644_v37 = vsel %vm987_vm2, %v11813_v57, %v11814_v27 }
 0x656   : > { %v11817_v33 = vpop.permute.xlu1 %11816  ;;  %v10949_v56 = vpack.c.bf16 %v5646_v20, %v5644_v37  ;;  %v11829_v2 = vunpack.i.h.bf16 %v11827_v19  ;;  %v11828_v11 = vunpack.i.l.bf16 %v11827_v19 }
 0x657   : > { %10120 = vmatmul.mubr.msk.f32.gmra.mrb[14].mxu1 %vm5106_vm9, %v10116_v59  ;;  %10498 = vmatmul.mubr.msk.f32.vlgmr.msra.gmra.mrb[22].mxu0 %vm5106_vm9, %v5077_v15  ;;  %v11819_v5 = vunpack.i.h.bf16 %v11817_v33  ;;  %v11818_v6 = vunpack.i.l.bf16 %v11817_v33 }
 0x658   : > { %10948 = vmatpush3.bf16.msk.msra.mxu0 %vm14835_vm12, %v10943_v31  ;;  %5348 = vmatprep.mubr.f32.mxu1 %v15885_v61  ;;  %v5836_v3 = vsel %vm1078_vm3, %v11828_v11, %v11829_v2 }
 0x659   : > { %10957 = vmatprep.subr.msk.bf16.mxu0 %vm14835_vm12, %v10955_v58  ;;  %v11832_v51 = vpop.permute.xlu0 %11831  ;;  %10504 = vmatprep.mubr.msk.f32.mxu0 %vm5106_vm9, %v10131_v47  ;;  %v5645_v35 = vsel %vm987_vm2, %v11819_v5, %v11808_v24  ;;  %v5643_v0 = vsel %vm987_vm2, %v11818_v6, %v11813_v57 }
 0x65a   : > { %v11822_v42 = vpop.permute.xlu1 %11821  ;;  %v10952_v46 = vpack.c.bf16 %v5645_v35, %v5643_v0  ;;  %v11834_v49 = vunpack.i.h.bf16 %v11832_v51  ;;  %v11833_v1 = vunpack.i.l.bf16 %v11832_v51 }
 0x65b   : > { %v11824_v26 = vunpack.i.h.bf16 %v11822_v42  ;;  %10126 = vmatmul.mubr.msk.f32.vlgmr.msra.gmra.mrb[12].mxu1 %vm5106_vm9, %v5076_v10  ;;  %v11823_v52 = vunpack.i.l.bf16 %v11822_v42  ;;  %v10167_v42 = vld [vmem:[%s15899_s7 + $0x60] sm:$0xff] }
 0x65c   : > { %10942 = vmatpush1.bf16.msk.msra.mxu1 %vm14835_vm12, %v10940_v9  ;;  %5354 = vmatprep.mubr.f32.mxu1 %v15885_v61  ;;  %v5835_v50 = vsel %vm1078_vm3, %v11833_v1, %v11828_v11 }
 0x65d   : > { %v10967_v25 = vpack.c.bf16 %v11824_v26, %v11829_v2  ;;  %10951 = vmatprep.subr.msk.bf16.mxu1 %vm14835_vm12, %v10949_v56  ;;  %v11837_v7 = vpop.permute.xlu0 %11836  ;;  %v5838_v28 = vsel %vm1078_vm3, %v11823_v52, %v11824_v26  ;;  %v5837_v18 = vsel %vm1078_vm3, %v11834_v49, %v11823_v52  ;;  %v10159_v56 = vld [vmem:[%s15899_s7 + $0x58] sm:$0x3]  ;;  %v10176_v49 = vld [vmem:[%s15899_s7 + $0x70] sm:$0xff] }
 0x65e   : > { %v11842_v30 = vpop.permute.xlu1 %11841  ;;  %v10961_v36 = vpack.c.bf16 %v5838_v28, %v5836_v3  ;;  %v11839_v16 = vunpack.i.h.bf16 %v11837_v7  ;;  %v11838_v8 = vunpack.i.l.bf16 %v11837_v7  ;;  %v10964_v55 = vpack.c.bf16 %v5837_v18, %v5835_v50  ;;  %v10168_v28 = vld [vmem:[%s15899_s7 + $0x68] sm:$0x3]  ;;  %v10185_v50 = vld [vmem:[%s15899_s7 + $0x80] sm:$0xff] }
 0x65f   : > { %10127 = vmatmul.mubr.msk.f32.gmra.mrb[14].mxu1 %vm5106_vm9, %v5077_v15  ;;  %10505 = vmatmul.mubr.msk.f32.vlgmr.msra.gmra.mrb[22].mxu0 %vm5106_vm9, %v10132_v40  ;;  %v11844_v53 = vunpack.i.h.bf16 %v11842_v30  ;;  %v11843_v62 = vunpack.i.l.bf16 %v11842_v30 }
 0x660   : > { %10960 = vmatpush3.bf16.msk.msra.mxu0 %vm14835_vm12, %v10955_v58  ;;  %5534 = vmatprep.mubr.f32.mxu1 %v15885_v61  ;;  %v6030_v22 = vsel %vm1169_vm4, %v11838_v8, %v11839_v16 }
 0x661   : > { %10969 = vmatprep.subr.msk.bf16.mxu0 %vm14835_vm12, %v10967_v25  ;;  %10511 = vmatprep.mubr.msk.f32.mxu0 %vm5106_vm9, %v10140_v39  ;;  %v14924_v21 = vpop.permute.xlu0 %11856  ;;  %v10979_v13 = vpack.c.bf16 %v11839_v16, %v11844_v53  ;;  %v6028_v4 = vsel %vm1169_vm4, %v11843_v62, %v11844_v53 }
 0x662   : > { %v11847_v17 = vpop.permute.xlu1 %11846  ;;  %v10973_v34 = vpack.c.bf16 %v6030_v22, %v6028_v4  ;;  %v11859_v43 = vunpack.i.h.bf16 %v14924_v21  ;;  %v11858_v14 = vunpack.i.l.bf16 %v14924_v21  ;;  %v10186_v4 = vld [vmem:[%s15899_s7 + $0x88] sm:$0x3] }
 0x663   : > { %10135 = vmatmul.mubr.msk.f32.vlgmr.msra.gmra.mrb[12].mxu1 %vm5106_vm9, %v10131_v47  ;;  %v11849_v38 = vunpack.i.h.bf16 %v11847_v17  ;;  %v11848_v12 = vunpack.i.l.bf16 %v11847_v17 }
 0x664   : > { %10954 = vmatpush1.bf16.msk.msra.mxu1 %vm14835_vm12, %v10952_v46  ;;  %5540 = vmatprep.mubr.f32.mxu1 %v15885_v61  ;;  %v6220_v58 = vsel %vm1273_vm5, %v11858_v14, %v11859_v43 }
 0x665   : > { %10963 = vmatprep.subr.msk.bf16.mxu1 %vm14835_vm12, %v10961_v36  ;;  %v11862_v10 = vpop.permute.xlu0 %11861  ;;  %v6029_v44 = vsel %vm1169_vm4, %v11849_v38, %v11838_v8  ;;  %v6027_v24 = vsel %vm1169_vm4, %v11848_v12, %v11843_v62 }
 0x666   : > { %v11852_v59 = vpop.permute.xlu1 %11851  ;;  %v10976_v19 = vpack.c.bf16 %v6029_v44, %v6027_v24  ;;  %v11864_v63 = vunpack.i.h.bf16 %v11862_v10  ;;  %v11863_v47 = vunpack.i.l.bf16 %v11862_v10 }
 0x667   : > { %10136 = vmatmul.mubr.msk.f32.gmra.mrb[14].mxu1 %vm5106_vm9, %v10132_v40  ;;  %10512 = vmatmul.mubr.msk.f32.vlgmr.msra.gmra.mrb[22].mxu0 %vm5106_vm9, %v10141_v48  ;;  %v11854_v31 = vunpack.i.h.bf16 %v11852_v59  ;;  %v11853_v60 = vunpack.i.l.bf16 %v11852_v59 }
 0x668   : > { %10972 = vmatpush3.bf16.msk.msra.mxu0 %vm14835_vm12, %v10967_v25  ;;  %5726 = vmatprep.mubr.f32.mxu1 %v15885_v61  ;;  %v6219_v2 = vsel %vm1273_vm5, %v11863_v47, %v11858_v14 }
 0x669   : > { %10981 = vmatprep.subr.msk.bf16.mxu0 %vm14835_vm12, %v10979_v13  ;;  %10518 = vmatprep.mubr.msk.f32.mxu0 %vm5106_vm9, %v10149_v29  ;;  %v10991_v27 = vpack.c.bf16 %v11854_v31, %v11859_v43  ;;  %v6222_v57 = vsel %vm1273_vm5, %v11853_v60, %v11854_v31  ;;  %v11867_v15 = vpop.permute.xlu0 %11866  ;;  %v6221_v5 = vsel %vm1273_vm5, %v11864_v63, %v11853_v60 }
 0x66a   : > { %v14950_v32 = vpop.permute.xlu1 %11871  ;;  %v10985_v41 = vpack.c.bf16 %v6222_v57, %v6220_v58  ;;  %v11869_v20 = vunpack.i.h.bf16 %v11867_v15  ;;  %v11868_v51 = vunpack.i.l.bf16 %v11867_v15  ;;  %v10988_v25 = vpack.c.bf16 %v6221_v5, %v6219_v2  ;;  %v7780_v2 = vld [vmem:[%s15738_s10 + $0x8] sm:$0xff]  ;;  %v7815_v5 = vld [vmem:[%s15740_s12] sm:$0xff] }
 0x66b   : > { %10144 = vmatmul.mubr.msk.f32.vlgmr.msra.gmra.mrb[12].mxu1 %vm5106_vm9, %v10140_v39  ;;  %v11874_v37 = vunpack.i.h.bf16 %v14950_v32  ;;  %v11873_v9 = vunpack.i.l.bf16 %v14950_v32 }
 0x66c   : > { %10966 = vmatpush1.bf16.msk.msra.mxu1 %vm14835_vm12, %v10964_v55  ;;  %5732 = vmatprep.mubr.f32.mxu1 %v15885_v61  ;;  %v6414_v26 = vsel %vm1374_vm6, %v11868_v51, %v11869_v20 }
 0x66d   : > { %10975 = vmatprep.subr.msk.bf16.mxu1 %vm14835_vm12, %v10973_v34  ;;  %v11003_v6 = vpack.c.bf16 %v11869_v20, %v11874_v37  ;;  %v6412_v52 = vsel %vm1374_vm6, %v11873_v9, %v11874_v37  ;;  %v11887_v11 = vpop.permute.xlu0 %11886 }
 0x66e   : > { %v11877_v33 = vpop.permute.xlu1 %11876  ;;  %v10997_v7 = vpack.c.bf16 %v6414_v26, %v6412_v52  ;;  %v11889_v3 = vunpack.i.h.bf16 %v11887_v11  ;;  %v11888_v46 = vunpack.i.l.bf16 %v11887_v11  ;;  %v7816_v26 = vld [vmem:[%s15740_s12 + $0x8] sm:$0xff] }
 0x66f   : > { %10145 = vmatmul.mubr.msk.f32.gmra.mrb[14].mxu1 %vm5106_vm9, %v10141_v48  ;;  %10519 = vmatmul.mubr.msk.f32.vlgmr.msra.gmra.mrb[22].mxu0 %vm5106_vm9, %v10150_v54  ;;  %v11879_v30 = vunpack.i.h.bf16 %v11877_v33  ;;  %v11878_v39 = vunpack.i.l.bf16 %v11877_v33 }
 0x670   : > { %10984 = vmatpush3.bf16.msk.msra.mxu0 %vm14835_vm12, %v10979_v13  ;;  %5918 = vmatprep.mubr.f32.mxu1 %v15885_v61  ;;  %v6604_v8 = vsel %vm1475_vm7, %v11888_v46, %v11889_v3 }
 0x671   : > { %10993 = vmatprep.subr.msk.bf16.mxu0 %vm14835_vm12, %v10991_v27  ;;  %10525 = vmatprep.mubr.msk.f32.mxu0 %vm5106_vm9, %v10158_v23  ;;  %v6413_v17 = vsel %vm1374_vm6, %v11879_v30, %v11868_v51  ;;  %v6411_v1 = vsel %vm1374_vm6, %v11878_v39, %v11873_v9  ;;  %v11892_v16 = vpop.permute.xlu0 %11891 }
 0x672   : > { %v11882_v40 = vpop.permute.xlu1 %11881  ;;  %v11000_v62 = vpack.c.bf16 %v6413_v17, %v6411_v1  ;;  %v11894_v21 = vunpack.i.h.bf16 %v11892_v16  ;;  %v11893_v48 = vunpack.i.l.bf16 %v11892_v16  ;;  %v10194_v1 = vld [vmem:[%s15907_s9 + $0x10] sm:$0xff] }
 0x673   : > { %10153 = vmatmul.mubr.msk.f32.vlgmr.msra.gmra.mrb[12].mxu1 %vm5106_vm9, %v10149_v29  ;;  %v11884_v35 = vunpack.i.h.bf16 %v11882_v40  ;;  %v11883_v0 = vunpack.i.l.bf16 %v11882_v40  ;;  %v10177_v29 = vld [vmem:[%s15899_s7 + $0x78] sm:$0x3]  ;;  %s15912_s7 = sld [smem:[#allocation41_spill]] }
 0x674   : > { %10978 = vmatpush1.bf16.msk.msra.mxu1 %vm14835_vm12, %v10976_v19  ;;  %5924 = vmatprep.mubr.f32.mxu1 %v15885_v61  ;;  %v6603_v18 = vsel %vm1475_vm7, %v11893_v48, %v11888_v46 }
 0x675   : > { %10987 = vmatprep.subr.msk.bf16.mxu1 %vm14835_vm12, %v10985_v41  ;;  %v11015_v36 = vpack.c.bf16 %v11884_v35, %v11889_v3  ;;  %v6606_v53 = vsel %vm1475_vm7, %v11883_v0, %v11884_v35  ;;  %v6605_v13 = vsel %vm1475_vm7, %v11894_v21, %v11883_v0 }
 0x676   : > { %v11009_v59 = vpack.c.bf16 %v6606_v53, %v6604_v8  ;;  %v11012_v22 = vpack.c.bf16 %v6605_v13, %v6603_v18 }
 0x677   : > { %10154 = vmatmul.mubr.msk.f32.gmra.mrb[14].mxu1 %vm5106_vm9, %v10150_v54  ;;  %10526 = vmatmul.mubr.msk.f32.vlgmr.msra.gmra.mrb[22].mxu0 %vm5106_vm9, %v10159_v56 }
 0x678   : > { %10996 = vmatpush3.bf16.msk.msra.mxu0 %vm14835_vm12, %v10991_v27  ;;  %6110 = vmatprep.mubr.f32.mxu1 %v15885_v61 }
 0x679   : > { %11005 = vmatprep.subr.msk.bf16.mxu0 %vm14835_vm12, %v11003_v6  ;;  %10532 = vmatprep.mubr.msk.f32.mxu0 %vm5106_vm9, %v10167_v42  ;;  %s680_s8 = scalar_lea.vmem %s15912_s7, %s10320_s4 }
 0x67b   : > { %10162 = vmatmul.mubr.msk.f32.vlgmr.msra.gmra.mrb[12].mxu1 %vm5106_vm9, %v10158_v23 }
 0x67c   : > { %10990 = vmatpush1.bf16.msk.msra.mxu1 %vm14835_vm12, %v10988_v25  ;;  %6116 = vmatprep.mubr.f32.mxu1 %v15885_v61 }
 0x67d   : > { %10999 = vmatprep.subr.msk.bf16.mxu1 %vm14835_vm12, %v10997_v7 }
 0x67f   : > { %10163 = vmatmul.mubr.msk.f32.gmra.mrb[14].mxu1 %vm5106_vm9, %v10159_v56  ;;  %10533 = vmatmul.mubr.msk.f32.vlgmr.msra.gmra.mrb[22].mxu0 %vm5106_vm9, %v10168_v28  ;;  %v7779_v56 = vld [vmem:[%s15738_s10] sm:$0xff] }
 0x680   : > { %11008 = vmatpush3.bf16.msk.msra.mxu0 %vm14835_vm12, %v11003_v6  ;;  %6302 = vmatprep.mubr.f32.mxu1 %v15885_v61  ;;  %v7800_v6 = vld [vmem:[%s15739_s11 + $0x8] sm:$0xff] }
 0x681   : > { %11017 = vmatprep.subr.msk.bf16.mxu0 %vm14835_vm12, %v11015_v36  ;;  %10539 = vmatprep.mubr.msk.f32.mxu0 %vm5106_vm9, %v10176_v49 }
 0x682   : > { %v6790_v54 = vpop.permute.xlu0 %6789 }
 0x683   : > { %10171 = vmatmul.mubr.msk.f32.vlgmr.msra.gmra.mrb[12].mxu1 %vm5106_vm9, %v10167_v42  ;;  %v6785_v34 = vpop.permute.xlu1 %6784  ;;  %v7799_v42 = vld [vmem:[%s15739_s11] sm:$0xff] }
 0x684   : > { %11002 = vmatpush1.bf16.msk.msra.mxu1 %vm14835_vm12, %v11000_v62  ;;  %6308 = vmatprep.mubr.f32.mxu1 %v15885_v61 }
 0x685   : > { %11011 = vmatprep.subr.msk.bf16.mxu1 %vm14835_vm12, %v11009_v59  ;;  %v10195_v59 = vld [vmem:[%s15907_s9 + $0x18] sm:$0xff] }
 0x687   : > { %10172 = vmatmul.mubr.msk.f32.gmra.mrb[14].mxu1 %vm5106_vm9, %v10168_v28  ;;  %10540 = vmatmul.mubr.msk.f32.vlgmr.msra.gmra.mrb[22].mxu0 %vm5106_vm9, %v10177_v29 }
 0x688   : > { %11020 = vmatpush3.bf16.msk.msra.mxu0 %vm14835_vm12, %v11015_v36  ;;  %6494 = vmatprep.mubr.f32.mxu1 %v15885_v61 }
 0x689   : > { %10546 = vmatprep.mubr.msk.f32.mxu0 %vm5106_vm9, %v10185_v50 }
 0x68b   : > { %10180 = vmatmul.mubr.msk.f32.vlgmr.msra.gmra.mrb[12].mxu1 %vm5106_vm9, %v10176_v49 }
 0x68c   : > { %11014 = vmatpush1.bf16.msk.msra.mxu1 %vm14835_vm12, %v11012_v22  ;;  %6500 = vmatprep.mubr.f32.mxu1 %v15885_v61 }
 0x68f   : > { %10181 = vmatmul.mubr.msk.f32.gmra.mrb[14].mxu1 %vm5106_vm9, %v10177_v29  ;;  %10547 = vmatmul.mubr.msk.f32.vlgmr.msra.gmra.mrb[22].mxu0 %vm5106_vm9, %v10186_v4 }
 0x690   : > { %6686 = vmatprep.mubr.f32.mxu1 %v15885_v61  ;;  %6899 = vmatprep.mubr.f32.mxu0 %v15885_v61 }
 0x693   : > { %10189 = vmatmul.mubr.msk.f32.vlgmr.msra.gmra.mrb[12].mxu1 %vm5106_vm9, %v10185_v50 }
 0x694   : > { %6692 = vmatprep.mubr.f32.mxu1 %v15885_v61 }
 0x697   : > { %10190 = vmatmul.mubr.msk.f32.gmra.mrb[14].mxu1 %vm5106_vm9, %v10186_v4 }
 0x698   : > { %7924 = vmatprep.mubr.f32.mxu1 %v15885_v61 }
 0x762   : > { %v10548_v55 = vpop.f32.mrb[22].mxu0 }
 0x763   : > { %v6765_v10 = vpop.f32.mrb[23].mxu0  ;;  %v6797_v14 = vadd.f32 %v10548_v55, %v6790_v54 }
 0x764   : > { %v6794_v38 = vadd.f32 %v6785_v34, %v6765_v10  ;;  %v6804_v10 = vld [vmem:[%s15907_s9] sm:$0xff] }
 0x765   : > { %v6803_v33 = vmax.f32 %v6797_v14, 0.0 }
 0x766   : > { %v6688_v12 = vpop.f32.mrb[12].mxu1  ;;  %v6800_v23 = vmax.f32 %v6794_v38, 0.0 }
 0x767   : > { %v6792_v31 = vadd.f32 %v6785_v34, %v6688_v12  ;;  %v6690_v60 = vpop.f32.mrb[13].mxu1 }
 0x768   : > { %v6793_v32 = vadd.f32 %v6785_v34, %v6690_v60 }
 0x769   : > { %v15062_v43 = vmax.f32 %v6792_v31, 0.0 }
 0x76a   : > { %v15064_v44 = vmax.f32 %v6793_v32, 0.0  ;;  %v6694_v24 = vpop.f32.mrb[14].mxu1 }
 0x76b   : > { %v6795_v27 = vadd.f32 %v6790_v54, %v6694_v24  ;;  %v6696_v57 = vpop.f32.mrb[15].mxu1 }
 0x76c   : > { %v6796_v15 = vadd.f32 %v6790_v54, %v6696_v57  ;;  %v11895_v58 = vpack.i.bf16 %v15064_v44, %v15062_v43  ;;  %v11915_v19 = vpack.i.bf16 %v6800_v23, %v15064_v44 }
 0x76d   : > { %v15069_v63 = vmax.f32 %v6795_v27, 0.0  ;;  %v6805_v27 = vld [vmem:[%s15907_s9 + $0x8] sm:$0xff] }
 0x76e   : > { %v6802_v47 = vmax.f32 %v6796_v15, 0.0  ;;  %11896 = vrot.lane.b32.xlu1 %v11895_v58, %s15895_s0 }
 0x76f   : > { %v11925_v41 = vpack.i.bf16 %v15069_v63, %v15062_v43  ;;  %v11030_v9 = vpack.c.bf16 %v15069_v63, %v15062_v43 }
 0x770   : > { %v11900_v20 = vpack.i.bf16 %v6802_v47, %v15069_v63  ;;  %v11920_v37 = vpack.i.bf16 %v6803_v33, %v6802_v47  ;;  %v11027_v51 = vpack.c.bf16 %v6802_v47, %v15064_v44  ;;  %v10204_v33 = vld [vmem:[%s15907_s9 + $0x20] sm:$0xff] }
 0x772   : > { %11906 = vrot.lane.b32.xlu1 %v11895_v58, %s15887_s23  ;;  %11901 = vrot.lane.b32.xlu0 %v11900_v20, %s15895_s0 }
 0x776   : > { %11916 = vrot.lane.b32.xlu1 %v11915_v19, %s15896_s3  ;;  %11911 = vrot.lane.b32.xlu0 %v11900_v20, %s15887_s23 }
 0x77a   : > { %11926 = vrot.lane.b32.xlu1 %v11925_v41, %s15896_s3  ;;  %11921 = vrot.lane.b32.xlu0 %v11920_v37, %s15896_s3 }
 0x77e   : > { %11936 = vrot.lane.b32.xlu1 %v11920_v37, %s15900_s30  ;;  %11931 = vrot.lane.b32.xlu0 %v11915_v19, %s15900_s30 }
 0x782   : > { %11946 = vrot.lane.b32.xlu1 %v11915_v19, %s15901_s2  ;;  %11941 = vrot.lane.b32.xlu0 %v11925_v41, %s15900_s30 }
 0x786   : > { %11956 = vrot.lane.b32.xlu1 %v11925_v41, %s15901_s2  ;;  %11951 = vrot.lane.b32.xlu0 %v11920_v37, %s15901_s2 }
 0x78a   : > { %11966 = vrot.lane.b32.xlu1 %v11920_v37, %s15902_s1  ;;  %11961 = vrot.lane.b32.xlu0 %v11915_v19, %s15902_s1 }
 0x78e   : > { %11976 = vrot.lane.b32.xlu1 %v11915_v19, %s15903_s5  ;;  %11971 = vrot.lane.b32.xlu0 %v11925_v41, %s15902_s1 }
 0x792   : > { %11986 = vrot.lane.b32.xlu1 %v11925_v41, %s15903_s5  ;;  %11981 = vrot.lane.b32.xlu0 %v11920_v37, %s15903_s5 }
 0x796   : > { %11996 = vrot.lane.b32.xlu1 %v11920_v37, %s15888_s26  ;;  %11991 = vrot.lane.b32.xlu0 %v11915_v19, %s15888_s26 }
 0x79a   : > { %7783 = vperm.xlu1 %11484, %v7779_v56   ;;  %12001 = vrot.lane.b32.xlu0 %v11925_v41, %s15888_s26 }
 0x79e   : > { %7803 = vperm.xlu1 %11484, %v7799_v42   ;;  %7788 = vperm.xlu0 %11483, %v7780_v2   ;;  %v10205_v42 = vld [vmem:[%s15907_s9 + $0x28] sm:$0xff] }
 0x7a2   : > { %7819 = vperm.xlu1 %11484, %v7815_v5   ;;  %7808 = vperm.xlu0 %11483, %v7800_v6  }
 0x7a6   : > { %7824 = vperm.xlu0 %11483, %v7816_v26  }
 0x7e0   : > { %v11897_v52 = vpop.permute.xlu1 %11896 }
 0x7e1   : > { %v11899_v40 = vunpack.i.h.bf16 %v11897_v52  ;;  %v11898_v25 = vunpack.i.l.bf16 %v11897_v52 }
 0x7e3   : > { %v6821_v35 = vsel %vm805_vm0, %v11898_v25, %v11899_v40 }
 0x7e4   : > { %v11907_v11 = vpop.permute.xlu1 %11906  ;;  %v11902_v7 = vpop.permute.xlu0 %11901 }
 0x7e5   : > { %v11904_v30 = vunpack.i.h.bf16 %v11902_v7  ;;  %v11903_v39 = vunpack.i.l.bf16 %v11902_v7  ;;  %v11909_v36 = vunpack.i.h.bf16 %v11907_v11  ;;  %v11908_v29 = vunpack.i.l.bf16 %v11907_v11  ;;  %v10210_v11 = vld [vmem:[%s15907_s9 + $0x30] sm:$0xff] }
 0x7e7   : > { %v11021_v0 = vpack.c.bf16 %v11904_v30, %v11899_v40  ;;  %v6822_v28 = vsel %vm805_vm0, %v11903_v39, %v11904_v30  ;;  %v7010_v34 = vsel %vm896_vm1, %v11908_v29, %v11909_v36 }
 0x7e8   : > { %v11024_v3 = vpack.c.bf16 %v6822_v28, %v6821_v35  ;;  %v11917_v46 = vpop.permute.xlu1 %11916  ;;  %v11912_v49 = vpop.permute.xlu0 %11911 }
 0x7e9   : > { %v11914_v17 = vunpack.i.h.bf16 %v11912_v49  ;;  %11023 = vmatprep.subr.msk.bf16.mxu0 %vm14835_vm12, %v11021_v0  ;;  %v11913_v62 = vunpack.i.l.bf16 %v11912_v49  ;;  %v11919_v50 = vunpack.i.h.bf16 %v11917_v46  ;;  %v11918_v18 = vunpack.i.l.bf16 %v11917_v46 }
 0x7ea   : > { %11026 = vmatpush1.bf16.msk.msra.mxu0 %vm14835_vm12, %v11024_v3 }
 0x7eb   : > { %11029 = vmatprep.subr.msk.bf16.mxu0 %vm14835_vm12, %v11027_v51  ;;  %v11033_v8 = vpack.c.bf16 %v11914_v17, %v11909_v36  ;;  %v7011_v4 = vsel %vm896_vm1, %v11913_v62, %v11914_v17  ;;  %v7123_v38 = vsel %vm987_vm2, %v11918_v18, %v11919_v50 }
 0x7ec   : > { %v11927_v16 = vpop.permute.xlu1 %11926  ;;  %v11922_v53 = vpop.permute.xlu0 %11921  ;;  %v11036_v12 = vpack.c.bf16 %v7011_v4, %v7010_v34 }
 0x7ed   : > { %10198 = vmatmul.mubr.msk.f32.vlgmr.msra.gmra.mrb[24].mxu0 %vm5106_vm9, %v10194_v1  ;;  %v11924_v21 = vunpack.i.h.bf16 %v11922_v53  ;;  %v11923_v48 = vunpack.i.l.bf16 %v11922_v53  ;;  %v11929_v60 = vunpack.i.h.bf16 %v11927_v16  ;;  %v11928_v32 = vunpack.i.l.bf16 %v11927_v16  ;;  %v10211_v1 = vld [vmem:[%s15907_s9 + $0x38] sm:$0xff] }
 0x7ee   : > { %11032 = vmatpush1.bf16.msk.msra.mxu0 %vm14835_vm12, %v11030_v9  ;;  %6905 = vmatprep.mubr.f32.mxu0 %v15885_v61 }
 0x7ef   : > { %11035 = vmatprep.subr.msk.bf16.mxu0 %vm14835_vm12, %v11033_v8  ;;  %v7125_v55 = vsel %vm987_vm2, %v11923_v48, %v11924_v21  ;;  %v7122_v57 = vsel %vm987_vm2, %v11928_v32, %v11918_v18  ;;  %v7124_v15 = vsel %vm987_vm2, %v11929_v60, %v11923_v48  ;;  %v10216_v21 = vld [vmem:[%s15907_s9 + $0x40] sm:$0xff]  ;;  %v10222_v60 = vld [vmem:[%s15907_s9 + $0x50] sm:$0xff] }
 0x7f0   : > { %v11937_v13 = vpop.permute.xlu1 %11936  ;;  %v11932_v22 = vpop.permute.xlu0 %11931  ;;  %v11039_v54 = vpack.c.bf16 %v7125_v55, %v7123_v38  ;;  %v11042_v41 = vpack.c.bf16 %v7124_v15, %v7122_v57  ;;  %v10217_v55 = vld [vmem:[%s15907_s9 + $0x48] sm:$0xff] }
 0x7f1   : > { %10199 = vmatmul.mubr.msk.f32.gmra.mrb[26].mxu0 %vm5106_vm9, %v10195_v59  ;;  %v11939_v14 = vunpack.i.h.bf16 %v11937_v13  ;;  %v11938_v23 = vunpack.i.l.bf16 %v11937_v13  ;;  %v11934_v44 = vunpack.i.h.bf16 %v11932_v22  ;;  %v11933_v24 = vunpack.i.l.bf16 %v11932_v22 }
 0x7f2   : > { %6986 = vmatprep.mubr.f32.mxu0 %v15885_v61 }
 0x7f3   : > { %v7237_v19 = vsel %vm1078_vm3, %v11938_v23, %v11939_v14  ;;  %v7235_v63 = vsel %vm1078_vm3, %v11933_v24, %v11934_v44 }
 0x7f4   : > { %v11942_v31 = vpop.permute.xlu0 %11941  ;;  %v11947_v43 = vpop.permute.xlu1 %11946  ;;  %v11045_v20 = vpack.c.bf16 %v7237_v19, %v7235_v63  ;;  %v10223_v19 = vld [vmem:[%s15907_s9 + $0x58] sm:$0xff] }
 0x7f5   : > { %10202 = vmatmul.mubr.msk.f32.vlgmr.msra.gmra.mrb[24].mxu0 %vm5106_vm9, %v6804_v10  ;;  %v11944_v37 = vunpack.i.h.bf16 %v11942_v31  ;;  %v11943_v51 = vunpack.i.l.bf16 %v11942_v31  ;;  %v11949_v5 = vunpack.i.h.bf16 %v11947_v43  ;;  %v11948_v6 = vunpack.i.l.bf16 %v11947_v43 }
 0x7f6   : > { %11038 = vmatpush1.bf16.msk.msra.mxu0 %vm14835_vm12, %v11036_v12  ;;  %6992 = vmatprep.mubr.f32.mxu0 %v15885_v61 }
 0x7f7   : > { %11041 = vmatprep.subr.msk.bf16.mxu0 %vm14835_vm12, %v11039_v54  ;;  %v7236_v26 = vsel %vm1078_vm3, %v11944_v37, %v11938_v23  ;;  %v7234_v52 = vsel %vm1078_vm3, %v11943_v51, %v11933_v24  ;;  %v7347_v7 = vsel %vm1169_vm4, %v11948_v6, %v11949_v5  ;;  %v10228_v37 = vld [vmem:[%s15907_s9 + $0x60] sm:$0xff] }
 0x7f8   : > { %v11952_v58 = vpop.permute.xlu0 %11951  ;;  %v11957_v47 = vpop.permute.xlu1 %11956  ;;  %v11048_v30 = vpack.c.bf16 %v7236_v26, %v7234_v52  ;;  %v10234_v26 = vld [vmem:[%s15907_s9 + $0x70] sm:$0xff] }
 0x7f9   : > { %10203 = vmatmul.mubr.msk.f32.gmra.mrb[26].mxu0 %vm5106_vm9, %v6805_v27  ;;  %v11954_v9 = vunpack.i.h.bf16 %v11952_v58  ;;  %v11953_v56 = vunpack.i.l.bf16 %v11952_v58  ;;  %v11959_v39 = vunpack.i.h.bf16 %v11957_v47  ;;  %v11958_v35 = vunpack.i.l.bf16 %v11957_v47 }
 0x7fa   : > { %7088 = vmatprep.mubr.f32.mxu0 %v15885_v61 }
 0x7fb   : > { %v7349_v25 = vsel %vm1169_vm4, %v11953_v56, %v11954_v9  ;;  %v7346_v16 = vsel %vm1169_vm4, %v11958_v35, %v11948_v6  ;;  %v7348_v53 = vsel %vm1169_vm4, %v11959_v39, %v11953_v56 }
 0x7fc   : > { %v11962_v2 = vpop.permute.xlu0 %11961  ;;  %v11967_v40 = vpop.permute.xlu1 %11966  ;;  %v11051_v0 = vpack.c.bf16 %v7349_v25, %v7347_v7  ;;  %v11054_v59 = vpack.c.bf16 %v7348_v53, %v7346_v16  ;;  %v10240_v25 = vld [vmem:[%s15907_s9 + $0x80] sm:$0xff] }
 0x7fd   : > { %10208 = vmatmul.mubr.msk.f32.vlgmr.msra.gmra.mrb[24].mxu0 %vm5106_vm9, %v10204_v33  ;;  %v11969_v3 = vunpack.i.h.bf16 %v11967_v40  ;;  %v11968_v46 = vunpack.i.l.bf16 %v11967_v40  ;;  %v11964_v49 = vunpack.i.h.bf16 %v11962_v2  ;;  %v11963_v17 = vunpack.i.l.bf16 %v11962_v2  ;;  %v10229_v2 = vld [vmem:[%s15907_s9 + $0x68] sm:$0xff]  ;;  %v10235_v40 = vld [vmem:[%s15907_s9 + $0x78] sm:$0xff] }
 0x7fe   : > { %11044 = vmatpush1.bf16.msk.msra.mxu0 %vm14835_vm12, %v11042_v41  ;;  %7094 = vmatprep.mubr.f32.mxu0 %v15885_v61 }
 0x7ff   : > { %11047 = vmatprep.subr.msk.bf16.mxu0 %vm14835_vm12, %v11045_v20  ;;  %v7461_v8 = vsel %vm1273_vm5, %v11968_v46, %v11969_v3  ;;  %v7459_v62 = vsel %vm1273_vm5, %v11963_v17, %v11964_v49 }
 0x800   : > { %v11972_v28 = vpop.permute.xlu0 %11971  ;;  %v11977_v36 = vpop.permute.xlu1 %11976  ;;  %v11057_v29 = vpack.c.bf16 %v7461_v8, %v7459_v62 }
 0x801   : > { %10209 = vmatmul.mubr.msk.f32.gmra.mrb[26].mxu0 %vm5106_vm9, %v10205_v42  ;;  %v11974_v50 = vunpack.i.h.bf16 %v11972_v28  ;;  %v11973_v18 = vunpack.i.l.bf16 %v11972_v28  ;;  %v11979_v10 = vunpack.i.h.bf16 %v11977_v36  ;;  %v11978_v34 = vunpack.i.l.bf16 %v11977_v36 }
 0x802   : > { %7202 = vmatprep.mubr.f32.mxu0 %v15885_v61 }
 0x803   : > { %v7460_v38 = vsel %vm1273_vm5, %v11974_v50, %v11968_v46  ;;  %v7458_v12 = vsel %vm1273_vm5, %v11973_v18, %v11963_v17  ;;  %v7571_v43 = vsel %vm1374_vm6, %v11978_v34, %v11979_v10 }
 0x804   : > { %v11982_v48 = vpop.permute.xlu0 %11981  ;;  %v11987_v13 = vpop.permute.xlu1 %11986  ;;  %v11060_v14 = vpack.c.bf16 %v7460_v38, %v7458_v12  ;;  %v8748_v12 = vld [vmem:[%s15742_s14] sm:$0xff] }
 0x805   : > { %10214 = vmatmul.mubr.msk.f32.vlgmr.msra.gmra.mrb[24].mxu0 %vm5106_vm9, %v10210_v11  ;;  %v11984_v22 = vunpack.i.h.bf16 %v11982_v48  ;;  %v11983_v4 = vunpack.i.l.bf16 %v11982_v48  ;;  %v11989_v23 = vunpack.i.h.bf16 %v11987_v13  ;;  %v11988_v44 = vunpack.i.l.bf16 %v11987_v13 }
 0x806   : > { %11050 = vmatpush1.bf16.msk.msra.mxu0 %vm14835_vm12, %v11048_v30  ;;  %7208 = vmatprep.mubr.f32.mxu0 %v15885_v61 }
 0x807   : > { %11053 = vmatprep.subr.msk.bf16.mxu0 %vm14835_vm12, %v11051_v0  ;;  %v7573_v31 = vsel %vm1374_vm6, %v11983_v4, %v11984_v22  ;;  %v7570_v63 = vsel %vm1374_vm6, %v11988_v44, %v11978_v34  ;;  %v7572_v33 = vsel %vm1374_vm6, %v11989_v23, %v11983_v4  ;;  %v8789_v23 = vld [vmem:[%s15748_s20 + $0x28] sm:$0xff]  ;;  %v8791_v44 = vld [vmem:[%s15748_s20 + $0x38] sm:$0xff] }
 0x808   : > { %v11997_v32 = vpop.permute.xlu1 %11996  ;;  %v11992_v54 = vpop.permute.xlu0 %11991  ;;  %v11063_v24 = vpack.c.bf16 %v7573_v31, %v7571_v43  ;;  %v11066_v51 = vpack.c.bf16 %v7572_v33, %v7570_v63  ;;  %v8749_v31 = vld [vmem:[%s15742_s14 + $0x8] sm:$0xff] }
 0x809   : > { %10215 = vmatmul.mubr.msk.f32.gmra.mrb[26].mxu0 %vm5106_vm9, %v10211_v1  ;;  %v11999_v27 = vunpack.i.h.bf16 %v11997_v32  ;;  %v11998_v57 = vunpack.i.l.bf16 %v11997_v32  ;;  %v11994_v15 = vunpack.i.h.bf16 %v11992_v54  ;;  %v11993_v58 = vunpack.i.l.bf16 %v11992_v54  ;;  %v8787_v32 = vld [vmem:[%s15748_s20 + $0x18] sm:$0xff]  ;;  %v8784_v54 = vld [vmem:[%s15748_s20] sm:$0xff] }
 0x80a   : > { %7314 = vmatprep.mubr.f32.mxu0 %v15885_v61 }
 0x80b   : > { %v7685_v47 = vsel %vm1475_vm7, %v11998_v57, %v11999_v27  ;;  %v7683_v41 = vsel %vm1475_vm7, %v11993_v58, %v11994_v15  ;;  %v11115_v27 = vpack.c.bf16 %v8791_v44, %v8789_v23  ;;  %v8790_v15 = vld [vmem:[%s15748_s20 + $0x30] sm:$0xff] }
 0x80c   : > { %v12002_v20 = vpop.permute.xlu0 %12001  ;;  %v11069_v9 = vpack.c.bf16 %v7685_v47, %v7683_v41  ;;  %v8792_v47 = vld [vmem:[%s15748_s20 + $0x40] sm:$0xff]  ;;  %v8794_v41 = vld [vmem:[%s15748_s20 + $0x50] sm:$0xff] }
 0x80d   : > { %10220 = vmatmul.mubr.msk.f32.vlgmr.msra.gmra.mrb[24].mxu0 %vm5106_vm9, %v10216_v21  ;;  %v12004_v56 = vunpack.i.h.bf16 %v12002_v20  ;;  %v12003_v42 = vunpack.i.l.bf16 %v12002_v20  ;;  %v8797_v20 = vld [vmem:[%s15748_s20 + $0x68] sm:$0xff] }
 0x80e   : > { %11056 = vmatpush1.bf16.msk.msra.mxu0 %vm14835_vm12, %v11054_v59  ;;  %7320 = vmatprep.mubr.f32.mxu0 %v15885_v61 }
 0x80f   : > { %11059 = vmatprep.subr.msk.bf16.mxu0 %vm14835_vm12, %v11057_v29  ;;  %v7684_v5 = vsel %vm1475_vm7, %v12004_v56, %v11998_v57  ;;  %v7682_v6 = vsel %vm1475_vm7, %v12003_v42, %v11993_v58  ;;  %v8788_v57 = vld [vmem:[%s15748_s20 + $0x20] sm:$0xff]  ;;  %v8793_v58 = vld [vmem:[%s15748_s20 + $0x48] sm:$0xff]  ;;  %v8798_v42 = vld [vmem:[%s15748_s20 + $0x70] sm:$0xff] }
 0x810   : > { %v11072_v52 = vpack.c.bf16 %v7684_v5, %v7682_v6  ;;  %v11117_v63 = vpack.c.bf16 %v8790_v15, %v8788_v57  ;;  %v8796_v56 = vld [vmem:[%s15748_s20 + $0x60] sm:$0xff]  ;;  %v8803_v5 = vld [vmem:[%s15748_s20 + $0x98] sm:$0xff]  ;;  %v10246_v15 = vld [vmem:[%s15741_s13 + $0x10] sm:$0xff] }
 0x811   : > { %10221 = vmatmul.mubr.msk.f32.gmra.mrb[26].mxu0 %vm5106_vm9, %v10217_v55  ;;  %v11125_v6 = vpack.c.bf16 %v8798_v42, %v8796_v56  ;;  %v7832_v56 = vld [vmem:[%s15741_s13 + $0x8] sm:$0xff] }
 0x812   : > { %7426 = vmatprep.mubr.f32.mxu0 %v15885_v61 }
 0x815   : > { %10226 = vmatmul.mubr.msk.f32.vlgmr.msra.gmra.mrb[24].mxu0 %vm5106_vm9, %v10222_v60  ;;  %v8785_v60 = vld [vmem:[%s15748_s20 + $0x8] sm:$0xff] }
 0x816   : > { %11062 = vmatpush1.bf16.msk.msra.mxu0 %vm14835_vm12, %v11060_v14  ;;  %7432 = vmatprep.mubr.f32.mxu0 %v15885_v61  ;;  %v11111_v43 = vpack.c.bf16 %v8787_v32, %v8785_v60  ;;  %v8786_v14 = vld [vmem:[%s15748_s20 + $0x10] sm:$0xff] }
 0x817   : > { %11065 = vmatprep.subr.msk.bf16.mxu0 %vm14835_vm12, %v11063_v24  ;;  %v11113_v24 = vpack.c.bf16 %v8786_v14, %v8784_v54 }
 0x819   : > { %10227 = vmatmul.mubr.msk.f32.gmra.mrb[26].mxu0 %vm5106_vm9, %v10223_v19  ;;  %v7784_v11 = vpop.permute.xlu1 %7783  ;;  %v8795_v19 = vld [vmem:[%s15748_s20 + $0x58] sm:$0xff] }
 0x81a   : > { %7538 = vmatprep.mubr.f32.mxu0 %v15885_v61  ;;  %v11119_v33 = vpack.c.bf16 %v8795_v19, %v8793_v58 }
 0x81d   : > { %10232 = vmatmul.mubr.msk.f32.vlgmr.msra.gmra.mrb[24].mxu0 %vm5106_vm9, %v10228_v37  ;;  %v7789_v7 = vpop.permute.xlu0 %7788  ;;  %v7804_v30 = vpop.permute.xlu1 %7803  ;;  %v8799_v37 = vld [vmem:[%s15748_s20 + $0x78] sm:$0xff] }
 0x81e   : > { %11068 = vmatpush1.bf16.msk.msra.mxu0 %vm14835_vm12, %v11066_v51  ;;  %7544 = vmatprep.mubr.f32.mxu0 %v15885_v61  ;;  %v11121_v51 = vpack.c.bf16 %v8794_v41, %v8792_v47  ;;  %v10247_v47 = vld [vmem:[%s15741_s13 + $0x18] sm:$0xff] }
 0x81f   : > { %11071 = vmatprep.subr.msk.bf16.mxu0 %vm14835_vm12, %v11069_v9  ;;  %v11123_v9 = vpack.c.bf16 %v8799_v37, %v8797_v20 }
 0x821   : > { %10233 = vmatmul.mubr.msk.f32.gmra.mrb[26].mxu0 %vm5106_vm9, %v10229_v2  ;;  %v7809_v46 = vpop.permute.xlu0 %7808  ;;  %v7820_v53 = vpop.permute.xlu1 %7819  ;;  %v8801_v2 = vld [vmem:[%s15748_s20 + $0x88] sm:$0xff] }
 0x822   : > { %7650 = vmatprep.mubr.f32.mxu0 %v15885_v61 }
 0x825   : > { %10238 = vmatmul.mubr.msk.f32.vlgmr.msra.gmra.mrb[24].mxu0 %vm5106_vm9, %v10234_v26  ;;  %v7825_v18 = vpop.permute.xlu0 %7824  ;;  %v11127_v26 = vpack.c.bf16 %v8803_v5, %v8801_v2 }
 0x826   : > { %11074 = vmatpush1.bf16.msk.msra.mxu0 %vm14835_vm12, %v11072_v52  ;;  %7656 = vmatprep.mubr.f32.mxu0 %v15885_v61  ;;  %v8800_v52 = vld [vmem:[%s15748_s20 + $0x80] sm:$0xff] }
 0x827   : > { %11112 = vmatprep.subr.bf16.mxu0 %v11111_v43 }
 0x829   : > { %10239 = vmatmul.mubr.msk.f32.gmra.mrb[26].mxu0 %vm5106_vm9, %v10235_v40  ;;  %v8802_v40 = vld [vmem:[%s15748_s20 + $0x90] sm:$0xff] }
 0x82a   : > { %7762 = vmatprep.mubr.f32.mxu0 %v15885_v61 }
 0x82d   : > { %10244 = vmatmul.mubr.msk.f32.vlgmr.msra.gmra.mrb[24].mxu0 %vm5106_vm9, %v10240_v25  ;;  %v8805_v25 = vld [vmem:[%s15748_s20 + $0xa8] sm:$0xff] }
 0x82e   : > { %7768 = vmatprep.mubr.f32.mxu0 %v15885_v61  ;;  %11114 = vmatpush1.bf16.msra.mxu0 %v11113_v24 }
 0x82f   : > { %11116 = vmatprep.subr.bf16.mxu0 %v11115_v27 }
 0x831   : > { %10245 = vmatmul.mubr.msk.f32.gmra.mrb[26].mxu0 %vm5106_vm9, %v10241_v45  ;;  %v8807_v45 = vld [vmem:[%s15748_s20 + $0xb8] sm:$0xff] }
 0x832   : > { %11118 = vmatpush1.bf16.msra.mxu0 %v11117_v63 }
 0x833   : > { %11120 = vmatprep.subr.bf16.mxu0 %v11119_v33 }
 0x836   : > { %11122 = vmatpush1.bf16.msra.mxu0 %v11121_v51 }
 0x837   : > { %11124 = vmatprep.subr.bf16.mxu0 %v11123_v9 }
 0x83a   : > { %11126 = vmatpush1.bf16.msra.mxu0 %v11125_v6 }
 0x83b   : > { %11128 = vmatprep.subr.bf16.mxu0 %v11127_v26  ;;  %v10252_v26 = vld [vmem:[%s15741_s13 + $0x20] sm:$0xff] }
 0x900   : > { %v7764_v39 = vpop.f32.mrb[24].mxu0 }
 0x901   : > { %v7791_v35 = vadd.f32 %v7784_v11, %v7764_v39  ;;  %v7766_v0 = vpop.f32.mrb[25].mxu0  ;;  %v8806_v39 = vld [vmem:[%s15748_s20 + $0xb0] sm:$0xff] }
 0x902   : > { %v7792_v28 = vadd.f32 %v7784_v11, %v7766_v0  ;;  %v11129_v11 = vpack.c.bf16 %v8802_v40, %v8800_v52  ;;  %v8811_v0 = vld [vmem:[%s15748_s20 + $0xd8] sm:$0xff] }
 0x903   : > { %v7795_v3 = vmax.f32 %v7791_v35, 0.0  ;;  %v8809_v35 = vld [vmem:[%s15748_s20 + $0xc8] sm:$0xff] }
 0x904   : > { %v7796_v49 = vmax.f32 %v7792_v28, 0.0  ;;  %v7770_v17 = vpop.f32.mrb[26].mxu0  ;;  %11130 = vmatpush1.bf16.msra.mxu0 %v11129_v11 }
 0x905   : > { %v7811_v1 = vmul.f32 %v7804_v30, %v7795_v3  ;;  %v7793_v36 = vadd.f32 %v7789_v7, %v7770_v17  ;;  %v7772_v16 = vpop.f32.mrb[27].mxu0  ;;  %v11135_v3 = vpack.c.bf16 %v8811_v0, %v8809_v35  ;;  %v8813_v17 = vld [vmem:[%s15748_s20 + $0xe8] sm:$0xff] }
 0x906   : > { %v7812_v8 = vmul.f32 %v7804_v30, %v7796_v49  ;;  %v7794_v62 = vadd.f32 %v7789_v7, %v7772_v16  ;;  %v11131_v7 = vpack.c.bf16 %v8807_v45, %v8805_v25  ;;  %v8804_v30 = vld [vmem:[%s15748_s20 + $0xa0] sm:$0xff]  ;;  %v8810_v49 = vld [vmem:[%s15748_s20 + $0xd0] sm:$0xff] }
 0x907   : > { %v15270_v21 = vadd.f32 %v7820_v53, %v7811_v1  ;;  %v7797_v48 = vmax.f32 %v7793_v36, 0.0  ;;  %v11133_v28 = vpack.c.bf16 %v8806_v39, %v8804_v30  ;;  %v8815_v1 = vld [vmem:[%s15748_s20 + $0xf8] sm:$0xff]  ;;  %v10253_v30 = vld [vmem:[%s15741_s13 + $0x28] sm:$0xff] }
 0x908   : > { %v15272_v59 = vadd.f32 %v7820_v53, %v7812_v8  ;;  %v7798_v29 = vmax.f32 %v7794_v62, 0.0  ;;  %11132 = vmatprep.subr.bf16.mxu0 %v11131_v7  ;;  %v11139_v16 = vpack.c.bf16 %v8815_v1, %v8813_v17  ;;  %v8812_v53 = vld [vmem:[%s15748_s20 + $0xe0] sm:$0xff]  ;;  %v8814_v8 = vld [vmem:[%s15748_s20 + $0xf0] sm:$0xff]  ;;  %v8817_v62 = vld [vmem:[%s15748_s20 + $0x108] sm:$0xff] }
 0x909   : > { %v7813_v50 = vmul.f32 %v7809_v46, %v7797_v48  ;;  %11134 = vmatpush1.bf16.msra.mxu0 %v11133_v28  ;;  %v8819_v48 = vld [vmem:[%s15748_s20 + $0x118] sm:$0xff] }
 0x90a   : > { %v7814_v13 = vmul.f32 %v7809_v46, %v7798_v29  ;;  %v12005_v22 = vpack.i.bf16 %v15272_v59, %v15270_v21  ;;  %v8808_v46 = vld [vmem:[%s15748_s20 + $0xc0] sm:$0xff]  ;;  %11136 = vmatprep.subr.bf16.mxu0 %v11135_v3  ;;  %v11141_v29 = vpack.c.bf16 %v8814_v8, %v8812_v53  ;;  %v10256_v3 = vld [vmem:[%s15741_s13 + $0x30] sm:$0xff]  ;;  %v10257_v53 = vld [vmem:[%s15741_s13 + $0x38] sm:$0xff] }
 0x90b   : > { %v15276_v4 = vadd.f32 %v7825_v18, %v7813_v50  ;;  %v11137_v36 = vpack.c.bf16 %v8810_v49, %v8808_v46  ;;  %v11143_v50 = vpack.c.bf16 %v8819_v48, %v8817_v62 }
 0x90c   : > { %v15278_v55 = vadd.f32 %v7825_v18, %v7814_v13  ;;  %12006 = vrot.lane.b32.xlu1 %v12005_v22, %s15895_s0  ;;  %v8816_v18 = vld [vmem:[%s15748_s20 + $0x100] sm:$0xff]  ;;  %v8818_v13 = vld [vmem:[%s15748_s20 + $0x110] sm:$0xff] }
 0x90d   : > { %v11081_v10 = vpack.c.bf16 %v15276_v4, %v15270_v21  ;;  %11138 = vmatpush1.bf16.msra.mxu0 %v11137_v36  ;;  %v7831_v21 = vld [vmem:[%s15741_s13] sm:$0xff] }
 0x90e   : > { %v12010_v34 = vpack.i.bf16 %v15278_v55, %v15276_v4  ;;  %v11079_v38 = vpack.c.bf16 %v15278_v55, %v15272_v59  ;;  %11140 = vmatprep.subr.bf16.mxu0 %v11139_v16 }
 0x910   : > { %12016 = vrot.lane.b32.xlu1 %v12005_v22, %s15887_s23  ;;  %12011 = vrot.lane.b32.xlu0 %v12010_v34, %s15895_s0 }
 0x911   : > { %11142 = vmatpush1.bf16.msra.mxu0 %v11141_v29 }
 0x912   : > { %11144 = vmatprep.subr.bf16.mxu0 %v11143_v50  ;;  %v10260_v50 = vld [vmem:[%s15741_s13 + $0x40] sm:$0xff] }
 0x914   : > { %12026 = vrot.lane.b32.xlu1 %v12005_v22, %s15896_s3  ;;  %12021 = vrot.lane.b32.xlu0 %v12010_v34, %s15887_s23 }
 0x918   : > { %12036 = vrot.lane.b32.xlu1 %v12005_v22, %s15900_s30  ;;  %12031 = vrot.lane.b32.xlu0 %v12010_v34, %s15896_s3 }
 0x91c   : > { %12046 = vrot.lane.b32.xlu1 %v12005_v22, %s15901_s2  ;;  %12041 = vrot.lane.b32.xlu0 %v12010_v34, %s15900_s30 }
 0x920   : > { %12056 = vrot.lane.b32.xlu1 %v12005_v22, %s15902_s1  ;;  %12051 = vrot.lane.b32.xlu0 %v12010_v34, %s15901_s2 }
 0x924   : > { %12066 = vrot.lane.b32.xlu1 %v12005_v22, %s15903_s5  ;;  %12061 = vrot.lane.b32.xlu0 %v12010_v34, %s15902_s1 }
 0x928   : > { %12076 = vrot.lane.b32.xlu1 %v12005_v22, %s15888_s26  ;;  %12071 = vrot.lane.b32.xlu0 %v12010_v34, %s15903_s5  ;;  %v11145_v22 = vpack.c.bf16 %v8818_v13, %v8816_v18 }
 0x92a   : > { %11146 = vmatpush1.bf16.msra.mxu0 %v11145_v22 }
 0x92c   : > { %8752 = vperm.xlu1 %11484, %v8748_v12   ;;  %12081 = vrot.lane.b32.xlu0 %v12010_v34, %s15888_s26 }
 0x930   : > { %8757 = vperm.xlu0 %11483, %v8749_v31  }
 0x97e   : > { %v12007_v34 = vpop.permute.xlu1 %12006 }
 0x97f   : > { %v12009_v12 = vunpack.i.h.bf16 %v12007_v34  ;;  %v12008_v31 = vunpack.i.l.bf16 %v12007_v34 }
 0x981   : > { %v7848_v43 = vsel %vm805_vm0, %v12008_v31, %v12009_v12 }
 0x982   : > { %v12012_v60 = vpop.permute.xlu0 %12011  ;;  %v12017_v44 = vpop.permute.xlu1 %12016 }
 0x983   : > { %v12014_v32 = vunpack.i.h.bf16 %v12012_v60  ;;  %v12013_v54 = vunpack.i.l.bf16 %v12012_v60  ;;  %v12019_v58 = vunpack.i.h.bf16 %v12017_v44  ;;  %v12018_v41 = vunpack.i.l.bf16 %v12017_v44  ;;  %v10261_v60 = vld [vmem:[%s15741_s13 + $0x48] sm:$0xff] }
 0x985   : > { %v11075_v14 = vpack.c.bf16 %v12014_v32, %v12009_v12  ;;  %v7849_v23 = vsel %vm805_vm0, %v12013_v54, %v12014_v32  ;;  %v8031_v4 = vsel %vm896_vm1, %v12018_v41, %v12019_v58 }
 0x986   : > { %v11077_v24 = vpack.c.bf16 %v7849_v23, %v7848_v43  ;;  %v12022_v27 = vpop.permute.xlu0 %12021  ;;  %v12027_v20 = vpop.permute.xlu1 %12026  ;;  %v10264_v23 = vld [vmem:[%s15741_s13 + $0x50] sm:$0xff] }
 0x987   : > { %v12024_v57 = vunpack.i.h.bf16 %v12022_v27  ;;  %11076 = vmatprep.subr.bf16.mxu1 %v11075_v14  ;;  %v12023_v63 = vunpack.i.l.bf16 %v12022_v27  ;;  %v12028_v42 = vunpack.i.l.bf16 %v12027_v20 }
 0x988   : > { %11078 = vmatpush1.bf16.msra.mxu1 %v11077_v24 }
 0x989   : > { %11080 = vmatprep.subr.bf16.mxu1 %v11079_v38  ;;  %v11083_v19 = vpack.c.bf16 %v12024_v57, %v12019_v58  ;;  %v8032_v59 = vsel %vm896_vm1, %v12023_v63, %v12024_v57 }
 0x98a   : > { %v12032_v33 = vpop.permute.xlu0 %12031  ;;  %v11085_v38 = vpack.c.bf16 %v8032_v59, %v8031_v4  ;;  %v12037_v2 = vpop.permute.xlu1 %12036 }
 0x98b   : > { %10248 = vmatmul.mubr.msk.f32.vlgmr.msra.gmra.mrb[16].mxu1 %vm1611_vm8, %v10246_v15  ;;  %v12034_v55 = vunpack.i.h.bf16 %v12032_v33  ;;  %v12033_v51 = vunpack.i.l.bf16 %v12032_v33  ;;  %v12039_v40 = vunpack.i.h.bf16 %v12037_v2  ;;  %v12038_v39 = vunpack.i.l.bf16 %v12037_v2  ;;  %v10273_v2 = vld [vmem:[%s15741_s13 + $0x78] sm:$0xff] }
 0x98c   : > { %11082 = vmatpush1.bf16.msra.mxu1 %v11081_v10  ;;  %7930 = vmatprep.mubr.f32.mxu1 %v15885_v61  ;;  %v12029_v10 = vunpack.i.h.bf16 %v12027_v20  ;;  %v10268_v20 = vld [vmem:[%s15741_s13 + $0x60] sm:$0xff] }
 0x98d   : > { %11084 = vmatprep.subr.bf16.mxu1 %v11083_v19  ;;  %v8136_v5 = vsel %vm987_vm2, %v12033_v51, %v12034_v55  ;;  %v8239_v46 = vsel %vm1078_vm3, %v12038_v39, %v12039_v40  ;;  %v10265_v19 = vld [vmem:[%s15741_s13 + $0x58] sm:$0xff]  ;;  %v8824_v39 = vld [vmem:[%s15748_s20 + $0x140] sm:$0xff] }
 0x98e   : > { %v11087_v37 = vpack.c.bf16 %v12034_v55, %v12029_v10  ;;  %v12042_v9 = vpop.permute.xlu0 %12041  ;;  %v8135_v52 = vsel %vm987_vm2, %v12028_v42, %v12029_v10  ;;  %v12047_v35 = vpop.permute.xlu1 %12046 }
 0x98f   : > { %10249 = vmatmul.mubr.msk.f32.gmra.mrb[18].mxu1 %vm1611_vm8, %v10247_v47  ;;  %v12044_v6 = vunpack.i.h.bf16 %v12042_v9  ;;  %v11089_v25 = vpack.c.bf16 %v8136_v5, %v8135_v52  ;;  %v12043_v11 = vunpack.i.l.bf16 %v12042_v9  ;;  %v12049_v49 = vunpack.i.h.bf16 %v12047_v35  ;;  %v10272_v9 = vld [vmem:[%s15741_s13 + $0x70] sm:$0xff]  ;;  %v10276_v5 = vld [vmem:[%s15741_s13 + $0x80] sm:$0xff]  ;;  %v8823_v52 = vld [vmem:[%s15748_s20 + $0x138] sm:$0xff] }
 0x990   : > { %8007 = vmatprep.mubr.f32.mxu1 %v15885_v61  ;;  %v12048_v8 = vunpack.i.l.bf16 %v12047_v35 }
 0x991   : > { %v11091_v45 = vpack.c.bf16 %v12044_v6, %v12039_v40  ;;  %v8240_v0 = vsel %vm1078_vm3, %v12043_v11, %v12044_v6  ;;  %v10277_v6 = vld [vmem:[%s15741_s13 + $0x88] sm:$0xff]  ;;  %v8820_v40 = vld [vmem:[%s15748_s20 + $0x120] sm:$0xff] }
 0x992   : > { %v12052_v7 = vpop.permute.xlu0 %12051  ;;  %v11093_v17 = vpack.c.bf16 %v8240_v0, %v8239_v46  ;;  %v12057_v62 = vpop.permute.xlu1 %12056  ;;  %v8343_v18 = vsel %vm1169_vm4, %v12048_v8, %v12049_v49  ;;  %v8826_v0 = vld [vmem:[%s15748_s20 + $0x150] sm:$0xff] }
 0x993   : > { %10250 = vmatmul.mubr.msk.f32.vlgmr.msra.gmra.mrb[16].mxu1 %vm1611_vm8, %v7831_v21  ;;  %v12054_v28 = vunpack.i.h.bf16 %v12052_v7  ;;  %v12053_v36 = vunpack.i.l.bf16 %v12052_v7  ;;  %v12059_v13 = vunpack.i.h.bf16 %v12057_v62  ;;  %v12058_v32 = vunpack.i.l.bf16 %v12057_v62  ;;  %v8825_v7 = vld [vmem:[%s15748_s20 + $0x148] sm:$0xff] }
 0x994   : > { %11086 = vmatpush1.bf16.msra.mxu1 %v11085_v38  ;;  %8013 = vmatprep.mubr.f32.mxu1 %v15885_v61  ;;  %v10269_v38 = vld [vmem:[%s15741_s13 + $0x68] sm:$0xff] }
 0x995   : > { %11088 = vmatprep.subr.bf16.mxu1 %v11087_v37  ;;  %v11095_v1 = vpack.c.bf16 %v12054_v28, %v12049_v49  ;;  %v8344_v48 = vsel %vm1169_vm4, %v12053_v36, %v12054_v28  ;;  %v8447_v44 = vsel %vm1273_vm5, %v12058_v32, %v12059_v13  ;;  %v11153_v28 = vpack.c.bf16 %v8826_v0, %v8824_v39 }
 0x996   : > { %v12062_v16 = vpop.permute.xlu0 %12061  ;;  %v11097_v22 = vpack.c.bf16 %v8344_v48, %v8343_v18  ;;  %v12067_v54 = vpop.permute.xlu1 %12066 }
 0x997   : > { %10251 = vmatmul.mubr.msk.f32.gmra.mrb[18].mxu1 %vm1611_vm8, %v7832_v56  ;;  %v12064_v29 = vunpack.i.h.bf16 %v12062_v16  ;;  %v12063_v12 = vunpack.i.l.bf16 %v12062_v16  ;;  %v12069_v24 = vunpack.i.h.bf16 %v12067_v54  ;;  %v12068_v63 = vunpack.i.l.bf16 %v12067_v54  ;;  %v15908_v16 = vld [vmem:[#allocation4_spill] sm:$0xff] }
 0x998   : > { %8107 = vmatprep.mubr.f32.mxu1 %v15885_v61  ;;  %v15910_v48 = vsub.s32 0, %v15908_v16 }
 0x999   : > { %v11099_v34 = vpack.c.bf16 %v12064_v29, %v12059_v13  ;;  %v8448_v43 = vsel %vm1273_vm5, %v12063_v12, %v12064_v29  ;;  %v8551_v59 = vsel %vm1374_vm6, %v12068_v63, %v12069_v24  ;;  %v9829_v63 = vld [vmem:[%s15744_s16] sm:$0xff] }
 0x99a   : > { %v12072_v31 = vpop.permute.xlu0 %12071  ;;  %v11101_v27 = vpack.c.bf16 %v8448_v43, %v8447_v44  ;;  %v12077_v33 = vpop.permute.xlu1 %12076 }
 0x99b   : > { %10254 = vmatmul.mubr.msk.f32.vlgmr.msra.gmra.mrb[16].mxu1 %vm1611_vm8, %v10252_v26  ;;  %v12074_v14 = vunpack.i.h.bf16 %v12072_v31  ;;  %v12073_v15 = vunpack.i.l.bf16 %v12072_v31  ;;  %v12079_v55 = vunpack.i.h.bf16 %v12077_v33  ;;  %v12078_v37 = vunpack.i.l.bf16 %v12077_v33  ;;  %v8821_v26 = vld [vmem:[%s15748_s20 + $0x128] sm:$0xff] }
 0x99c   : > { %11090 = vmatpush1.bf16.msra.mxu1 %v11089_v25  ;;  %8113 = vmatprep.mubr.f32.mxu1 %v15885_v61  ;;  %v11147_v25 = vpack.c.bf16 %v8823_v52, %v8821_v26  ;;  %v9830_v33 = vld [vmem:[%s15744_s16 + $0x8] sm:$0xff]  ;;  %v10283_v52 = vld [vmem:[%s15743_s15 + $0x18] sm:$0xff] }
 0x99d   : > { %11092 = vmatprep.subr.bf16.mxu1 %v11091_v45  ;;  %v11103_v57 = vpack.c.bf16 %v12074_v14, %v12069_v24  ;;  %v8552_v47 = vsel %vm1374_vm6, %v12073_v15, %v12074_v14  ;;  %v8655_v56 = vsel %vm1475_vm7, %v12078_v37, %v12079_v55  ;;  %v8822_v45 = vld [vmem:[%s15748_s20 + $0x130] sm:$0xff] }
 0x99e   : > { %v12082_v58 = vpop.permute.xlu0 %12081  ;;  %v11105_v21 = vpack.c.bf16 %v8552_v47, %v8551_v59  ;;  %v11149_v11 = vpack.c.bf16 %v8822_v45, %v8820_v40  ;;  %11148 = vmatprep.subr.bf16.mxu0 %v11147_v25 }
 0x99f   : > { %10255 = vmatmul.mubr.msk.f32.gmra.mrb[18].mxu1 %vm1611_vm8, %v10253_v30  ;;  %v12084_v41 = vunpack.i.h.bf16 %v12082_v58  ;;  %v12083_v10 = vunpack.i.l.bf16 %v12082_v58  ;;  %v8827_v30 = vld [vmem:[%s15748_s20 + $0x158] sm:$0xff] }
 0x9a0   : > { %8211 = vmatprep.mubr.f32.mxu1 %v15885_v61  ;;  %11150 = vmatpush1.bf16.msra.mxu0 %v11149_v11  ;;  %v11151_v35 = vpack.c.bf16 %v8827_v30, %v8825_v7  ;;  %v8912_v7 = vld [vmem:[%s15743_s15] sm:$0xff] }
 0x9a1   : > { %v11107_v4 = vpack.c.bf16 %v12084_v41, %v12079_v55  ;;  %v8656_v51 = vsel %vm1475_vm7, %v12083_v10, %v12084_v41 }
 0x9a2   : > { %v11109_v42 = vpack.c.bf16 %v8656_v51, %v8655_v56  ;;  %11152 = vmatprep.subr.bf16.mxu0 %v11151_v35 }
 0x9a3   : > { %10258 = vmatmul.mubr.msk.f32.vlgmr.msra.gmra.mrb[16].mxu1 %vm1611_vm8, %v10256_v3  ;;  %v8768_v3 = vld [vmem:[%s15749_s21] sm:$0x3] }
 0x9a4   : > { %11094 = vmatpush1.bf16.msra.mxu1 %v11093_v17  ;;  %8217 = vmatprep.mubr.f32.mxu1 %v15885_v61  ;;  %v15561_v29 = vrot.slane %v8768_v3, %v15910_v48 }
 0x9a5   : > { %11096 = vmatprep.subr.bf16.mxu1 %v11095_v1  ;;  %11154 = vmatpush1.bf16.msra.mxu0 %v11153_v28 }
 0x9a7   : > { %10259 = vmatmul.mubr.msk.f32.gmra.mrb[18].mxu1 %vm1611_vm8, %v10257_v53  ;;  %v15909_v53 = vsub.s32 1, %v15908_v16  ;;  %v10288_v16 = vld [vmem:[%s15743_s15 + $0x20] sm:$0xff] }
 0x9a8   : > { %8315 = vmatprep.mubr.f32.mxu1 %v15885_v61 }
 0x9a9   : > { %v15557_v8 = vrot.slane %v8768_v3, %v15909_v53 }
 0x9ab   : > { %10262 = vmatmul.mubr.msk.f32.vlgmr.msra.gmra.mrb[16].mxu1 %vm1611_vm8, %v10260_v50  ;;  %v8753_v46 = vpop.permute.xlu1 %8752 }
 0x9ac   : > { %11098 = vmatpush1.bf16.msra.mxu1 %v11097_v22  ;;  %8321 = vmatprep.mubr.f32.mxu1 %v15885_v61 }
 0x9ad   : > { %11100 = vmatprep.subr.bf16.mxu1 %v11099_v34 }
 0x9af   : > { %10263 = vmatmul.mubr.msk.f32.gmra.mrb[18].mxu1 %vm1611_vm8, %v10261_v60  ;;  %v8758_v50 = vpop.permute.xlu0 %8757 }
 0x9b0   : > { %8419 = vmatprep.mubr.f32.mxu1 %v15885_v61 }
 0x9b3   : > { %10266 = vmatmul.mubr.msk.f32.vlgmr.msra.gmra.mrb[16].mxu1 %vm1611_vm8, %v10264_v23 }
 0x9b4   : > { %11102 = vmatpush1.bf16.msra.mxu1 %v11101_v27  ;;  %8425 = vmatprep.mubr.f32.mxu1 %v15885_v61 }
 0x9b5   : > { %11104 = vmatprep.subr.bf16.mxu1 %v11103_v57 }
 0x9b7   : > { %10267 = vmatmul.mubr.msk.f32.gmra.mrb[18].mxu1 %vm1611_vm8, %v10265_v19 }
 0x9b8   : > { %8523 = vmatprep.mubr.f32.mxu1 %v15885_v61 }
 0x9bb   : > { %10270 = vmatmul.mubr.msk.f32.vlgmr.msra.gmra.mrb[16].mxu1 %vm1611_vm8, %v10268_v20 }
 0x9bc   : > { %11106 = vmatpush1.bf16.msra.mxu1 %v11105_v21  ;;  %8529 = vmatprep.mubr.f32.mxu1 %v15885_v61 }
 0x9bd   : > { %11108 = vmatprep.subr.bf16.mxu1 %v11107_v4 }
 0x9bf   : > { %10271 = vmatmul.mubr.msk.f32.gmra.mrb[18].mxu1 %vm1611_vm8, %v10269_v38 }
 0x9c0   : > { %8627 = vmatprep.mubr.f32.mxu1 %v15885_v61 }
 0x9c3   : > { %10274 = vmatmul.mubr.msk.f32.vlgmr.msra.gmra.mrb[16].mxu1 %vm1611_vm8, %v10272_v9 }
 0x9c4   : > { %11110 = vmatpush1.bf16.msra.mxu1 %v11109_v42  ;;  %8633 = vmatprep.mubr.f32.mxu1 %v15885_v61  ;;  %v10282_v42 = vld [vmem:[%s15743_s15 + $0x10] sm:$0xff] }
 0x9c7   : > { %10275 = vmatmul.mubr.msk.f32.gmra.mrb[18].mxu1 %vm1611_vm8, %v10273_v2 }
 0x9c8   : > { %8731 = vmatprep.mubr.f32.mxu1 %v15885_v61 }
 0x9cb   : > { %10278 = vmatmul.mubr.msk.f32.vlgmr.msra.gmra.mrb[16].mxu1 %vm1611_vm8, %v10276_v5 }
 0x9cc   : > { %8737 = vmatprep.mubr.f32.mxu1 %v15885_v61 }
 0x9cf   : > { %10279 = vmatmul.mubr.msk.f32.gmra.mrb[18].mxu1 %vm1611_vm8, %v10277_v6 }
 0x9d0   : > { %9005 = vmatprep.mubr.f32.mxu1 %v15885_v61 }
 0xa9e   : > { %v8733_v49 = vpop.f32.mrb[16].mxu1 }
 0xa9f   : > { %v8760_v17 = vadd.f32 %v8753_v46, %v8733_v49  ;;  %v8735_v1 = vpop.f32.mrb[17].mxu1 }
 0xaa0   : > { %v8761_v36 = vadd.f32 %v8753_v46, %v8735_v1  ;;  %v8913_v46 = vld [vmem:[%s15743_s15 + $0x8] sm:$0xff] }
 0xaa1   : > { %v8764_v62 = vmax.f32 %v8760_v17, 0.0 }
 0xaa2   : > { %v8765_v18 = vmax.f32 %v8761_v36, 0.0  ;;  %v8739_v13 = vpop.f32.mrb[18].mxu1 }
 0xaa3   : > { %v8762_v22 = vadd.f32 %v8758_v50, %v8739_v13  ;;  %v8741_v34 = vpop.f32.mrb[19].mxu1  ;;  %v8780_v60 = vmul.f32 %v15561_v29, %v8764_v62 }
 0xaa4   : > { %v8781_v12 = vmul.f32 %v15557_v8, %v8765_v18  ;;  %v8763_v31 = vadd.f32 %v8758_v50, %v8741_v34 }
 0xaa5   : > { %v8766_v32 = vmax.f32 %v8762_v22, 0.0  ;;  %v10289_v22 = vld [vmem:[%s15743_s15 + $0x28] sm:$0xff] }
 0xaa6   : > { %v8767_v54 = vmax.f32 %v8763_v31, 0.0  ;;  %10280 = vmatprep.mubr.msk.f32.mxu0 %vm8828_vm13, %v8781_v12 }
 0xaa7   : > { %8900 = vmatmul.mubr.f32.vlgmr.msra.gmra.mrb[28].mxu0 %v8780_v60  ;;  %v8782_v14 = vmul.f32 %v15561_v29, %v8766_v32  ;;  %v10292_v32 = vld [vmem:[%s15743_s15 + $0x30] sm:$0xff] }
 0xaa8   : > { %v8783_v43 = vmul.f32 %v15557_v8, %v8767_v54 }
 0xaaa   : > { %10281 = vmatprep.mubr.msk.f32.mxu0 %vm8828_vm13, %v8783_v43 }
 0xaab   : > { %8906 = vmatmul.mubr.f32.gmra.mrb[30].mxu0 %v8782_v14 }
 0xaac   : > { %9921 = vmatprep.mubr.f32.mxu0 %v15885_v61 }
 0xb7a   : > { %v8901_v23 = vpop.f32.mrb[28].mxu0 }
 0xb7b   : > { %v8903_v44 = vpop.f32.mrb[29].mxu0 }
 0xb7c   : > { %v12085_v24 = vpack.i.bf16 %v8903_v44, %v8901_v23 }
 0xb7e   : > { %12086 = vrot.lane.b32.xlu1 %v12085_v24, %s15895_s0  ;;  %v8907_v27 = vpop.f32.mrb[30].mxu0 }
 0xb7f   : > { %v8909_v57 = vpop.f32.mrb[31].mxu0  ;;  %v11161_v15 = vpack.c.bf16 %v8907_v27, %v8901_v23 }
 0xb80   : > { %v12090_v58 = vpack.i.bf16 %v8909_v57, %v8907_v27  ;;  %v11159_v19 = vpack.c.bf16 %v8909_v57, %v8903_v44  ;;  %v10293_v27 = vld [vmem:[%s15743_s15 + $0x38] sm:$0xff] }
 0xb82   : > { %12096 = vrot.lane.b32.xlu1 %v12085_v24, %s15887_s23  ;;  %12091 = vrot.lane.b32.xlu0 %v12090_v58, %s15895_s0 }
 0xb86   : > { %12106 = vrot.lane.b32.xlu1 %v12085_v24, %s15896_s3  ;;  %12101 = vrot.lane.b32.xlu0 %v12090_v58, %s15887_s23 }
 0xb8a   : > { %12116 = vrot.lane.b32.xlu1 %v12085_v24, %s15900_s30  ;;  %12111 = vrot.lane.b32.xlu0 %v12090_v58, %s15896_s3 }
 0xb8e   : > { %12126 = vrot.lane.b32.xlu1 %v12085_v24, %s15901_s2  ;;  %12121 = vrot.lane.b32.xlu0 %v12090_v58, %s15900_s30 }
 0xb92   : > { %12136 = vrot.lane.b32.xlu1 %v12085_v24, %s15902_s1  ;;  %12131 = vrot.lane.b32.xlu0 %v12090_v58, %s15901_s2 }
 0xb96   : > { %12146 = vrot.lane.b32.xlu1 %v12085_v24, %s15903_s5  ;;  %12141 = vrot.lane.b32.xlu0 %v12090_v58, %s15902_s1 }
 0xb9a   : > { %12156 = vrot.lane.b32.xlu1 %v12085_v24, %s15888_s26  ;;  %12151 = vrot.lane.b32.xlu0 %v12090_v58, %s15903_s5 }
 0xb9e   : > { %9833 = vperm.xlu1 %11484, %v9829_v63   ;;  %12161 = vrot.lane.b32.xlu0 %v12090_v58, %s15888_s26  ;;  %v10296_v63 = vld [vmem:[%s15743_s15 + $0x40] sm:$0xff] }
 0xba2   : > { %9838 = vperm.xlu0 %11483, %v9830_v33  }
 0xbf0   : > { %v12087_v47 = vpop.permute.xlu1 %12086 }
 0xbf1   : > { %v12089_v41 = vunpack.i.h.bf16 %v12087_v47  ;;  %v12088_v20 = vunpack.i.l.bf16 %v12087_v47 }
 0xbf3   : > { %v8929_v4 = vsel %vm805_vm0, %v12088_v20, %v12089_v41 }
 0xbf4   : > { %v12092_v59 = vpop.permute.xlu0 %12091  ;;  %v12097_v37 = vpop.permute.xlu1 %12096 }
 0xbf5   : > { %v12094_v55 = vunpack.i.h.bf16 %v12092_v59  ;;  %v12093_v21 = vunpack.i.l.bf16 %v12092_v59  ;;  %v12099_v2 = vunpack.i.h.bf16 %v12097_v37  ;;  %v12098_v40 = vunpack.i.l.bf16 %v12097_v37 }
 0xbf7   : > { %v11155_v10 = vpack.c.bf16 %v12094_v55, %v12089_v41  ;;  %v8930_v38 = vsel %vm805_vm0, %v12093_v21, %v12094_v55  ;;  %v9112_v30 = vsel %vm896_vm1, %v12098_v40, %v12099_v2  ;;  %v10297_v21 = vld [vmem:[%s15743_s15 + $0x48] sm:$0xff]  ;;  %vm9951_vm0 = vcmask 7168  }
 0xbf8   : > { %v11157_v51 = vpack.c.bf16 %v8930_v38, %v8929_v4  ;;  %v12102_v9 = vpop.permute.xlu0 %12101  ;;  %v12107_v25 = vpop.permute.xlu1 %12106 }
 0xbf9   : > { %v12104_v56 = vunpack.i.h.bf16 %v12102_v9  ;;  %11156 = vmatprep.subr.bf16.mxu1 %v11155_v10  ;;  %v12103_v6 = vunpack.i.l.bf16 %v12102_v9  ;;  %v12109_v39 = vunpack.i.h.bf16 %v12107_v25  ;;  %v12108_v49 = vunpack.i.l.bf16 %v12107_v25 }
 0xbfa   : > { %11158 = vmatpush1.bf16.msra.mxu1 %v11157_v51  ;;  %v10300_v51 = vld [vmem:[%s15743_s15 + $0x50] sm:$0xff] }
 0xbfb   : > { %11160 = vmatprep.subr.bf16.mxu1 %v11159_v19  ;;  %v11163_v5 = vpack.c.bf16 %v12104_v56, %v12099_v2  ;;  %v9113_v45 = vsel %vm896_vm1, %v12103_v6, %v12104_v56  ;;  %v9216_v53 = vsel %vm987_vm2, %v12108_v49, %v12109_v39  ;;  %v10308_v49 = vld [vmem:[%s15743_s15 + $0x70] sm:$0xff]  ;;  %vm9953_vm1 = vcmask 1024  }
 0xbfc   : > { %v12112_v26 = vpop.permute.xlu0 %12111  ;;  %v11165_v35 = vpack.c.bf16 %v9113_v45, %v9112_v30  ;;  %v12117_v17 = vpop.permute.xlu1 %12116 }
 0xbfd   : > { %10284 = vmatmul.mubr.msk.f32.vlgmr.msra.gmra.mrb[20].mxu1 %vm1611_vm8, %v10282_v42  ;;  %v12114_v11 = vunpack.i.h.bf16 %v12112_v26  ;;  %v12113_v28 = vunpack.i.l.bf16 %v12112_v26  ;;  %v12119_v62 = vunpack.i.h.bf16 %v12117_v17  ;;  %v12118_v34 = vunpack.i.l.bf16 %v12117_v17  ;;  %v10301_v26 = vld [vmem:[%s15743_s15 + $0x58] sm:$0xff] }
 0xbfe   : > { %11162 = vmatpush1.bf16.msra.mxu1 %v11161_v15  ;;  %9011 = vmatprep.mubr.f32.mxu1 %v15885_v61 }
 0xbff   : > { %11164 = vmatprep.subr.bf16.mxu1 %v11163_v5  ;;  %v11167_v0 = vpack.c.bf16 %v12114_v11, %v12109_v39  ;;  %v9217_v1 = vsel %vm987_vm2, %v12113_v28, %v12114_v11  ;;  %v9320_v54 = vsel %vm1078_vm3, %v12118_v34, %v12119_v62  ;;  %v10304_v11 = vld [vmem:[%s15743_s15 + $0x60] sm:$0xff]  ;;  %v10305_v28 = vld [vmem:[%s15743_s15 + $0x68] sm:$0xff] }
 0xc00   : > { %v12122_v3 = vpop.permute.xlu0 %12121  ;;  %v11169_v48 = vpack.c.bf16 %v9217_v1, %v9216_v53  ;;  %v12127_v12 = vpop.permute.xlu1 %12126  ;;  %v10313_v53 = vld [vmem:[%s15743_s15 + $0x88] sm:$0xff] }
 0xc01   : > { %10285 = vmatmul.mubr.msk.f32.gmra.mrb[22].mxu1 %vm1611_vm8, %v10283_v52  ;;  %v12124_v36 = vunpack.i.h.bf16 %v12122_v3  ;;  %v12123_v18 = vunpack.i.l.bf16 %v12122_v3  ;;  %v12129_v43 = vunpack.i.h.bf16 %v12127_v12  ;;  %v12128_v57 = vunpack.i.l.bf16 %v12127_v12 }
 0xc02   : > { %9088 = vmatprep.mubr.f32.mxu1 %v15885_v61 }
 0xc03   : > { %v11171_v50 = vpack.c.bf16 %v12124_v36, %v12119_v62  ;;  %v9321_v31 = vsel %vm1078_vm3, %v12123_v18, %v12124_v36  ;;  %v9424_v33 = vsel %vm1169_vm4, %v12128_v57, %v12129_v43  ;;  %v10309_v36 = vld [vmem:[%s15743_s15 + $0x78] sm:$0xff] }
 0xc04   : > { %v12132_v13 = vpop.permute.xlu0 %12131  ;;  %v11173_v14 = vpack.c.bf16 %v9321_v31, %v9320_v54  ;;  %v12137_v15 = vpop.permute.xlu1 %12136 }
 0xc05   : > { %10286 = vmatmul.mubr.msk.f32.vlgmr.msra.gmra.mrb[20].mxu1 %vm1611_vm8, %v8912_v7  ;;  %v12134_v60 = vunpack.i.h.bf16 %v12132_v13  ;;  %v12133_v44 = vunpack.i.l.bf16 %v12132_v13  ;;  %v12139_v47 = vunpack.i.h.bf16 %v12137_v15  ;;  %v12138_v4 = vunpack.i.l.bf16 %v12137_v15 }
 0xc06   : > { %11166 = vmatpush1.bf16.msra.mxu1 %v11165_v35  ;;  %9094 = vmatprep.mubr.f32.mxu1 %v15885_v61 }
 0xc07   : > { %11168 = vmatprep.subr.bf16.mxu1 %v11167_v0  ;;  %v11175_v23 = vpack.c.bf16 %v12134_v60, %v12129_v43  ;;  %v9425_v58 = vsel %vm1169_vm4, %v12133_v44, %v12134_v60  ;;  %v9528_v9 = vsel %vm1273_vm5, %v12138_v4, %v12139_v47 }
 0xc08   : > { %v12142_v24 = vpop.permute.xlu0 %12141  ;;  %v11177_v41 = vpack.c.bf16 %v9425_v58, %v9424_v33  ;;  %v12147_v10 = vpop.permute.xlu1 %12146 }
 0xc09   : > { %10287 = vmatmul.mubr.msk.f32.gmra.mrb[22].mxu1 %vm1611_vm8, %v8913_v46  ;;  %v12144_v19 = vunpack.i.h.bf16 %v12142_v24  ;;  %v12143_v59 = vunpack.i.l.bf16 %v12142_v24  ;;  %v12149_v56 = vunpack.i.h.bf16 %v12147_v10  ;;  %v12148_v52 = vunpack.i.l.bf16 %v12147_v10  ;;  %v9849_v24 = vld [vmem:[%s15745_s17] sm:$0xff] }
 0xc0a   : > { %9188 = vmatprep.mubr.f32.mxu1 %v15885_v61 }
 0xc0b   : > { %v11179_v20 = vpack.c.bf16 %v12144_v19, %v12139_v47  ;;  %v9529_v38 = vsel %vm1273_vm5, %v12143_v59, %v12144_v19  ;;  %v9632_v7 = vsel %vm1374_vm6, %v12148_v52, %v12149_v56  ;;  %v9948_v59 = vld [vmem:[%s15746_s18 + $0x8] sm:$0x3] }
 0xc0c   : > { %v12152_v55 = vpop.permute.xlu0 %12151  ;;  %v11181_v42 = vpack.c.bf16 %v9529_v38, %v9528_v9  ;;  %v12157_v40 = vpop.permute.xlu1 %12156 }
 0xc0d   : > { %10290 = vmatmul.mubr.msk.f32.vlgmr.msra.gmra.mrb[20].mxu1 %vm1611_vm8, %v10288_v16  ;;  %v12154_v37 = vunpack.i.h.bf16 %v12152_v55  ;;  %v12153_v5 = vunpack.i.l.bf16 %v12152_v55  ;;  %v12159_v30 = vunpack.i.h.bf16 %v12157_v40  ;;  %v12158_v3 = vunpack.i.l.bf16 %v12157_v40  ;;  %v10312_v16 = vld [vmem:[%s15743_s15 + $0x80] sm:$0xff] }
 0xc0e   : > { %11170 = vmatpush1.bf16.msra.mxu1 %v11169_v48  ;;  %9194 = vmatprep.mubr.f32.mxu1 %v15885_v61 }
 0xc0f   : > { %11172 = vmatprep.subr.bf16.mxu1 %v11171_v50  ;;  %v11183_v2 = vpack.c.bf16 %v12154_v37, %v12149_v56  ;;  %v9633_v25 = vsel %vm1374_vm6, %v12153_v5, %v12154_v37  ;;  %v9736_v17 = vsel %vm1475_vm7, %v12158_v3, %v12159_v30 }
 0xc10   : > { %v12162_v6 = vpop.permute.xlu0 %12161  ;;  %v11185_v39 = vpack.c.bf16 %v9633_v25, %v9632_v7 }
 0xc11   : > { %10291 = vmatmul.mubr.msk.f32.gmra.mrb[22].mxu1 %vm1611_vm8, %v10289_v22  ;;  %v12164_v45 = vunpack.i.h.bf16 %v12162_v6  ;;  %v12163_v0 = vunpack.i.l.bf16 %v12162_v6 }
 0xc12   : > { %9292 = vmatprep.mubr.f32.mxu1 %v15885_v61 }
 0xc13   : > { %v11187_v35 = vpack.c.bf16 %v12164_v45, %v12159_v30  ;;  %v9737_v46 = vsel %vm1475_vm7, %v12163_v0, %v12164_v45 }
 0xc14   : > { %v11189_v1 = vpack.c.bf16 %v9737_v46, %v9736_v17 }
 0xc15   : > { %10294 = vmatmul.mubr.msk.f32.vlgmr.msra.gmra.mrb[20].mxu1 %vm1611_vm8, %v10292_v32 }
 0xc16   : > { %11174 = vmatpush1.bf16.msra.mxu1 %v11173_v14  ;;  %9298 = vmatprep.mubr.f32.mxu1 %v15885_v61 }
 0xc17   : > { %11176 = vmatprep.subr.bf16.mxu1 %v11175_v23 }
 0xc19   : > { %10295 = vmatmul.mubr.msk.f32.gmra.mrb[22].mxu1 %vm1611_vm8, %v10293_v27 }
 0xc1a   : > { %9396 = vmatprep.mubr.f32.mxu1 %v15885_v61 }
 0xc1d   : > { %10298 = vmatmul.mubr.msk.f32.vlgmr.msra.gmra.mrb[20].mxu1 %vm1611_vm8, %v10296_v63  ;;  %v9834_v50 = vpop.permute.xlu1 %9833 }
 0xc1e   : > { %11178 = vmatpush1.bf16.msra.mxu1 %v11177_v41  ;;  %9402 = vmatprep.mubr.f32.mxu1 %v15885_v61 }
 0xc1f   : > { %11180 = vmatprep.subr.bf16.mxu1 %v11179_v20  ;;  %v9947_v20 = vld [vmem:[%s15746_s18] sm:$0xff] }
 0xc21   : > { %10299 = vmatmul.mubr.msk.f32.gmra.mrb[22].mxu1 %vm1611_vm8, %v10297_v21  ;;  %v9839_v13 = vpop.permute.xlu0 %9838 }
 0xc22   : > { %9500 = vmatprep.mubr.f32.mxu1 %v15885_v61 }
 0xc25   : > { %10302 = vmatmul.mubr.msk.f32.vlgmr.msra.gmra.mrb[20].mxu1 %vm1611_vm8, %v10300_v51 }
 0xc26   : > { %11182 = vmatpush1.bf16.msra.mxu1 %v11181_v42  ;;  %9506 = vmatprep.mubr.f32.mxu1 %v15885_v61 }
 0xc27   : > { %11184 = vmatprep.subr.bf16.mxu1 %v11183_v2 }
 0xc29   : > { %10303 = vmatmul.mubr.msk.f32.gmra.mrb[22].mxu1 %vm1611_vm8, %v10301_v26 }
 0xc2a   : > { %9604 = vmatprep.mubr.f32.mxu1 %v15885_v61 }
 0xc2d   : > { %10306 = vmatmul.mubr.msk.f32.vlgmr.msra.gmra.mrb[20].mxu1 %vm1611_vm8, %v10304_v11 }
 0xc2e   : > { %11186 = vmatpush1.bf16.msra.mxu1 %v11185_v39  ;;  %9610 = vmatprep.mubr.f32.mxu1 %v15885_v61 }
 0xc2f   : > { %11188 = vmatprep.subr.bf16.mxu1 %v11187_v35 }
 0xc31   : > { %10307 = vmatmul.mubr.msk.f32.gmra.mrb[22].mxu1 %vm1611_vm8, %v10305_v28 }
 0xc32   : > { %9708 = vmatprep.mubr.f32.mxu1 %v15885_v61 }
 0xc35   : > { %10310 = vmatmul.mubr.msk.f32.vlgmr.msra.gmra.mrb[20].mxu1 %vm1611_vm8, %v10308_v49 }
 0xc36   : > { %11190 = vmatpush1.bf16.msra.mxu1 %v11189_v1  ;;  %9714 = vmatprep.mubr.f32.mxu1 %v15885_v61 }
 0xc39   : > { %10311 = vmatmul.mubr.msk.f32.gmra.mrb[22].mxu1 %vm1611_vm8, %v10309_v36 }
 0xc3a   : > { %9812 = vmatprep.mubr.f32.mxu1 %v15885_v61 }
 0xc3d   : > { %10314 = vmatmul.mubr.msk.f32.vlgmr.msra.gmra.mrb[20].mxu1 %vm1611_vm8, %v10312_v16 }
 0xc3e   : > { %9818 = vmatprep.mubr.f32.mxu1 %v15885_v61 }
 0xc41   : > { %10315 = vmatmul.mubr.msk.f32.gmra.mrb[22].mxu1 %vm1611_vm8, %v10313_v53 }
 0xd10   : > { %v9814_v62 = vpop.f32.mrb[20].mxu1 }
 0xd11   : > { %v9816_v48 = vpop.f32.mrb[21].mxu1  ;;  %v9841_v18 = vadd.f32 %v9834_v50, %v9814_v62 }
 0xd12   : > { %v9842_v22 = vadd.f32 %v9834_v50, %v9816_v48 }
 0xd13   : > { %v9845_v32 = vmul.f32 %v9841_v18, %v15561_v29 }
 0xd14   : > { %v9820_v34 = vpop.f32.mrb[22].mxu1  ;;  %v9846_v43 = vmul.f32 %v9842_v22, %v15557_v8 }
 0xd15   : > { %v9843_v12 = vadd.f32 %v9839_v13, %v9820_v34  ;;  %v9822_v31 = vpop.f32.mrb[23].mxu1 }
 0xd16   : > { %v9844_v60 = vadd.f32 %v9839_v13, %v9822_v31 }
 0xd17   : > { %v9847_v54 = vmul.f32 %v9843_v12, %v15561_v29  ;;  %v9850_v29 = vld [vmem:[%s15745_s17 + $0x8] sm:$0x3] }
 0xd18   : > { %v9848_v14 = vmul.f32 %v9844_v60, %v15557_v8 }
 0xd19   : > { %v11193_v23 = vpack.c.bf16 %v9847_v54, %v9845_v32 }
 0xd1a   : > { %v11191_v44 = vpack.c.bf16 %v9848_v14, %v9846_v43 }
 0xd1c   : > { %11192 = vmatprep.subr.bf16.mxu0 %v11191_v44 }
 0xd1d   : > { %11194 = vmatpush1.bf16.msra.mxu0 %v11193_v23 }
 0xd20   : > { %10316 = vmatmul.mubr.msk.f32.vlgmr.msra.gmra.mrb[32].mxu0 %vm1611_vm8, %v9849_v24 }
 0xd21   : > { %9927 = vmatprep.mubr.f32.mxu0 %v15885_v61 }
 0xd24   : > { %10317 = vmatmul.mubr.msk.f32.gmra.mrb[34].mxu0 %vm1611_vm8, %v9850_v29 }
 0xdf3   : > { %v9923_v8 = vpop.f32.mrb[32].mxu0 }
 0xdf4   : > { %v9925_v27 = vpop.f32.mrb[33].mxu0 }
 0xdf5   : > { %v9935_v57 = vsel %vm9934_vm14, %v9925_v27, 0.0 }
 0xdf6   : > { %v9936_v15 = vadd.f32 %v9935_v57, %v9923_v8 }
 0xdf7   : > { %v9929_v58 = vpop.f32.mrb[34].mxu0 }
 0xdf8   : > { %v9939_v19 = vsel %vm5113_vm10, %v9929_v58, 0.0  ;;  %v9931_v63 = vpop.f32.mrb[35].mxu0  ;;  %9937 = vadd.xlane.f32.xlu1 %v9936_v15 }
 0xdf9   : > { %v9941_v33 = vsel %vm9940_vm15, %v9931_v63, 0.0 }
 0xdfa   : > { %v9942_v47 = vadd.f32 %v9941_v33, %v9939_v19 }
 0xdfc   : > { %9943 = vadd.xlane.f32.xlu0 %v9942_v47 }
 0xe85   : > { %v9938_v61 = vpop.xlane.xlu1 %9937 }
 0xe86   : > { %v9945_v41 = vmul.f32 0.027777778, %v9938_v61 }
 0xe88   : > { %v9949_v21 = vadd.f32 %v9947_v20, %v9945_v41 }
 0xe89   : > { %v9944_v55 = vpop.xlane.xlu0 %9943 }
 0xe8a   : > { %v9946_v4 = vmul.f32 0.027777778, %v9944_v55  ;;  %v9952_v38 = vsel %vm9951_vm0, %v9949_v21, -inf }
 0xe8c   : > { %v9950_v10 = vadd.f32 %v9948_v59, %v9946_v4 }
 0xe8e   : > { %v9954_v37 = vsel %vm9953_vm1, %v9950_v10, -inf }
 0xe8f   : > { %v9955_v51 = vmax.f32 %v9952_v38, %v9954_v37 }
 0xe91   : > { %v9956_v9 = vrot.slane %v9955_v51, 4 }
 0xe93   : > { %v9957_v56 = vmax.f32 %v9955_v51, %v9956_v9 }
 0xe95   : > { %v9958_v42 = vrot.slane %v9957_v56, 2 }
 0xe97   : > { %v9959_v2 = vmax.f32 %v9957_v56, %v9958_v42 }
 0xe99   : > { %v9960_v5 = vrot.slane %v9959_v2, 1 }
 0xe9b   : > { %v9961_v6 = vmax.f32 %v9959_v2, %v9960_v5 }
 0xe9d   : > { %v9962_v26 = vsub.f32 %v9949_v21, %v9961_v6  ;;  %v9963_v52 = vsub.f32 %v9950_v10, %v9961_v6 }
 0xe9f   : > { %v9964_v40 = vmul.f32 1.442695, %v9962_v26  ;;  %v9966_v25 = vmul.f32 1.442695, %v9963_v52 }
 0xea1   : > { %12165 = vpow2.f32 %v9964_v40 }
 0xea2   : > { %12167 = vpow2.f32 %v9966_v25 }
 0xeab   : > { %v12166_v45 = vpop.eup %12165 }
 0xeac   : > { %v12168_v11 = vpop.eup %12167  ;;  %v9968_v7 = vsel %vm9951_vm0, %v12166_v45, 0.0 }
 0xead   : > { %v9969_v30 = vsel %vm9953_vm1, %v12168_v11, 0.0 }
 0xeae   : > { %v9970_v39 = vadd.f32 %v9969_v30, %v9968_v7 }
 0xeb0   : > { %v9971_v35 = vrot.slane %v9970_v39, 4 }
 0xeb2   : > { %v9972_v0 = vadd.f32 %v9971_v35, %v9970_v39 }
 0xeb4   : > { %v9973_v28 = vrot.slane %v9972_v0, 2 }
 0xeb6   : > { %v9974_v3 = vadd.f32 %v9973_v28, %v9972_v0 }
 0xeb8   : > { %v9975_v46 = vrot.slane %v9974_v3, 1 }
 0xeba   : > { %v9976_v49 = vadd.f32 %v9975_v46, %v9974_v3 }
 0xebc   : > { %12169 = vlog2.f32 %v9976_v49 }
 0xec6   : > { %v12170_v17 = vpop.eup %12169 }
 0xec7   : > { %v9978_v1 = vmul.f32 0.6931472, %v12170_v17 }
 0xec9   : > { %v9979_v36 = vsub.f32 %v9962_v26, %v9978_v1  ;;  %v9980_v16 = vsub.f32 %v9963_v52, %v9978_v1 }
 0xecb   : > { %9981 = vst.msk [vmem:[%s680_s8] sm:$0xff] %vm9951_vm0, %v9979_v36 }
 0xecc   : > { %9982 = vst.msk [vmem:[%s680_s8 + $0x8] sm:$0x3] %vm9953_vm1, %v9980_v16 }
 0xecd PF: > { %s15913_s25 = sld [smem:[#allocation2_spill]] }
 0xed3   : > { %s32_s3 = sadd.s32 1, %s15913_s25  }
 0xed4   : > { %p29_p4 = scmp.ge.s32.totalorder %s32_s3, 4  }
 0xed6   :  { %31 = sbr.rel (!%p29_p4) target bundleno = 12 (0xc), region = 178 }

</bundles_post_ra>
